<compile_context>
chip_gen: v6e
topology: v6e:2x2x1
jax: 0.10.0
libtpu: 0.0.40
codegen_flags: <defaults>
</compile_context>

<pallas_src>
import functools

import jax
import jax.numpy as jnp
from jax.experimental import pallas as pl
from jax.experimental.pallas import tpu as pltpu

LANE = 128


def _round_up(x, m):
    return (x + m - 1) // m * m


def _zindi_kernel(x_ref, wc_ref, bc_ref, wh_ref, bh_ref, o_ref, *,
                  batch_tile, h, w, ksize, hc, inv_hw):
    """Fused conv(SAME) + ReLU + global-avg-pool + linear head for one batch block.

    x_ref : (Bt, H+2p, W+2p, Cin)     bf16  spatially padded NHWC input block
    wc_ref: (ksize*ksize, Cin, COP)   bf16  conv weights (out-ch zero-padded to COP)
    bc_ref: (1, COP)                  f32   conv bias (zero-padded)
    wh_ref: (COP, NCP)                bf16  head weights (zero-padded rows/cols)
    bh_ref: (1, NCP)                  f32   head bias (zero-padded)
    o_ref : (1, Bt, NCP)              f32   logits (lane-padded)
    """
    cop = bc_ref.shape[-1]
    n_chunks = h // hc

    # Running per-image pooled sum over (lane-dense) feature channels, f32.
    pooled = jnp.zeros((batch_tile, cop), jnp.float32)

    # Conv as ksize*ksize shifted, accumulated MXU matmuls (im2col folded
    # in-kernel): no 9x-expanded patches tensor ever touches HBM.  The f32
    # feature map only exists one `hc`-row chunk at a time.
    for c in range(n_chunks):
        h0 = c * hc
        acc = None
        for i in range(ksize):
            for j in range(ksize):
                tap = x_ref[:, h0 + i:h0 + i + hc, j:j + w, :]       # (Bt,hc,W,Cin) bf16
                tap2d = tap.reshape(batch_tile * hc * w, tap.shape[-1])
                part = jnp.dot(tap2d, wc_ref[i * ksize + j],
                               preferred_element_type=jnp.float32)   # f32 accumulate
                acc = part if acc is None else acc + part
        feat = jnp.maximum(acc + bc_ref[...], 0.0)                   # (Bt*hc*W, COP) f32
        pooled = pooled + feat.reshape(batch_tile, hc * w, cop).sum(axis=1)

    # adaptive_avg_pool2d(., 1) == sum * (1/HW): multiply by a constant, no divide.
    pooled = pooled * inv_hw

    # Head: bf16 MXU operands, f32 accumulation, f32 bias add.  Padded feature
    # channels are zero and the padded wh rows are zero, so they contribute 0.
    logits = jnp.dot(pooled.astype(jnp.bfloat16), wh_ref[...],
                     preferred_element_type=jnp.float32) + bh_ref[...]
    o_ref[0] = logits                                                # lane-dense store


def _pick_tiles(B, H, W, Cin, COP, NCP, ksize):
    """VMEM-budget-derived batch tile + in-kernel spatial row-chunk size."""
    Hp, Wp = H + ksize - 1, W + ksize - 1

    # Spatial row-chunk: bounds the f32 feature-map intermediate to
    # hc * W * COP * 4 bytes per image regardless of image size.
    feat_row = W * COP * 4
    hc_cap = max(1, min(8, (1 << 20) // max(feat_row, 1)))
    hc_cap = min(hc_cap, H)
    hc = max(d for d in range(1, hc_cap + 1) if H % d == 0)

    # Per-image VMEM footprint (accounting for (sublane,lane) padding of the
    # NHWC bf16 block); x block is double-buffered by the pipeline.
    x_img = Hp * _round_up(Wp, 16) * _round_up(Cin, LANE) * 2
    feat_img = hc * W * COP * 4
    per_image = 2 * x_img + feat_img
    consts = (ksize * ksize * _round_up(Cin, 16) * COP * 2   # conv weights (bf16)
              + COP * 4 + COP * NCP * 2 + NCP * 4            # biases + head weights
              + 2 * 8 * NCP * 4)                             # double-buffered output
    budget = 24 * 1024 * 1024  # conservative: fits v7x (64 MiB phys); v5e/v6e easily

    bt = max(1, min(B, (budget - consts) // per_image))
    # Keep >=2 (ideally an even number of) grid steps so both v7x TensorCores
    # get work; on 1-TC chips (v5e/v6e) the extra steps cost ~0.35us each.
    if B >= 2:
        while bt > 1 and B // bt < 2:
            bt -= 1
    while B % bt:
        bt -= 1
    if B >= 2 and (B // bt) % 2 == 1 and B % 2 == 0:
        even = [d for d in range(1, bt + 1) if B % d == 0 and (B // d) % 2 == 0]
        if even:
            bt = even[-1]

    vmem_need = consts + bt * per_image
    return bt, hc, vmem_need


def zindi_forward(x_nchw, params, *, kernel_size=3, batch_tile=None):
    """Runs the fused Pallas kernel. x_nchw: (B, Cin, H, W) float32."""
    wc, bc, wh, bh = params["conv_w"], params["conv_b"], params["head_w"], params["head_b"]
    B, Cin, H, W = x_nchw.shape
    assert kernel_size % 2 == 1, "only odd kernel_size supported (symmetric SAME padding)"
    KH = KW = kernel_size
    pad = kernel_size // 2
    Cout = wc.shape[-1]
    num_classes = wh.shape[-1]
    HW = H * W

    COP = _round_up(Cout, LANE)            # feature channels padded to lanes
    NCP = _round_up(num_classes, LANE)     # classes padded to lanes

    bt, hc, vmem_need = _pick_tiles(B, H, W, Cin, COP, NCP, kernel_size)
    if batch_tile is not None:
        bt = batch_tile
    assert B % bt == 0
    num_blocks = B // bt
    Hp, Wp = H + 2 * pad, W + 2 * pad

    # ---- glue (plain JAX, ~1x input bytes): cast to bf16 FIRST, then NHWC + pad.
    # No im2col / expanded patches tensor is ever written to HBM.
    x_bf = x_nchw.astype(jnp.bfloat16)
    x_pad = jnp.pad(jnp.transpose(x_bf, (0, 2, 3, 1)),
                    ((0, 0), (pad, pad), (pad, pad), (0, 0)))

    # NOTE: params store head_w as (in_features, num_classes); a real torch
    # checkpoint loader must transpose nn.Linear's (num_classes, in_features).
    wc_p = jnp.pad(wc.reshape(KH * KW, Cin, Cout).astype(jnp.float32),
                   ((0, 0), (0, 0), (0, COP - Cout))).astype(jnp.bfloat16)
    bc_p = jnp.pad(bc.reshape(1, Cout).astype(jnp.float32), ((0, 0), (0, COP - Cout)))
    wh_p = jnp.pad(wh.astype(jnp.float32),
                   ((0, COP - Cout), (0, NCP - num_classes))).astype(jnp.bfloat16)
    bh_p = jnp.pad(bh.reshape(1, num_classes).astype(jnp.float32),
                   ((0, 0), (0, NCP - num_classes)))

    kernel = functools.partial(_zindi_kernel, batch_tile=bt, h=H, w=W,
                               ksize=kernel_size, hc=hc, inv_hw=1.0 / HW)

    cost = pl.CostEstimate(
        flops=2 * B * HW * KH * KW * Cin * Cout + 2 * B * Cout * num_classes,
        transcendentals=0,
        bytes_accessed=int(x_pad.size * 2 + wc_p.size * 2 + wh_p.size * 2
                           + (bc_p.size + bh_p.size) * 4 + B * NCP * 4),
    )

    out = pl.pallas_call(
        kernel,
        out_shape=jax.ShapeDtypeStruct((num_blocks, bt, NCP), jnp.float32),
        grid_spec=pltpu.PrefetchScalarGridSpec(
            num_scalar_prefetch=0,
            grid=(num_blocks,),
            in_specs=[
                pl.BlockSpec((bt, Hp, Wp, Cin), lambda b: (b, 0, 0, 0)),
                # Constant-index operands below; TODO(synk): single-buffer them
                # (pipeline_mode=pl.Buffered(1)) once validated on this JAX pin —
                # negligible for these shapes, frees VMEM for large backbones.
                pl.BlockSpec((KH * KW, Cin, COP), lambda b: (0, 0, 0)),
                pl.BlockSpec((1, COP), lambda b: (0, 0)),
                pl.BlockSpec((COP, NCP), lambda b: (0, 0)),
                pl.BlockSpec((1, NCP), lambda b: (0, 0)),
            ],
            out_specs=pl.BlockSpec((1, bt, NCP), lambda b: (b, 0, 0)),
        ),
        compiler_params=pltpu.CompilerParams(
            dimension_semantics=("parallel",),
            vmem_limit_bytes=int(min(48 * 1024 * 1024,
                                     max(16 * 1024 * 1024, 2 * vmem_need))),
        ),
        cost_estimate=cost,
    )(x_pad, wc_p, bc_p, wh_p, bh_p)

    return out.reshape(B, NCP)[:, :num_classes]


def zindi_reference(x_nchw, params):
    """Pure-JAX f32 reference (mirrors the PyTorch forward semantics)."""
    wc, bc, wh, bh = params["conv_w"], params["conv_b"], params["head_w"], params["head_b"]
    feat = jax.lax.conv_general_dilated(
        x_nchw, wc, window_strides=(1, 1), padding="SAME",
        dimension_numbers=("NCHW", "HWIO", "NCHW"),
    ) + bc.reshape(1, -1, 1, 1)
    feat = jnp.maximum(feat, 0.0)
    pooled = jnp.mean(feat, axis=(2, 3))            # adaptive_avg_pool2d(.,1) + view
    return pooled @ wh + bh                         # nn.Linear


if __name__ == "__main__":
    # Small deterministic shapes: batch=2, in-channels=4, spatial=16x16,
    # feature channels=32, num_classes=3.
    B, Cin, H, W = 2, 4, 16, 16
    Cfeat, num_classes = 32, 3

    key = jax.random.PRNGKey(0)
    kx, kwc, kbc, kwh, kbh = jax.random.split(key, 5)

    x = jax.random.normal(kx, (B, Cin, H, W), dtype=jnp.float32)

    params = {
        "conv_w": jax.random.normal(kwc, (3, 3, Cin, Cfeat), jnp.float32) * 0.1,
        "conv_b": jax.random.normal(kbc, (Cfeat,), jnp.float32) * 0.1,
        "head_w": jax.random.normal(kwh, (Cfeat, num_classes), jnp.float32) * 0.1,
        "head_b": jax.random.normal(kbh, (num_classes,), jnp.float32) * 0.1,
    }

    logits = jax.block_until_ready(zindi_forward(x, params))
    ref = jax.block_until_ready(zindi_reference(x, params))

    assert logits.shape == (B, num_classes), logits.shape
    # bf16 MXU operands (f32 accumulation) -> relaxed tolerance vs f32 reference.
    assert jnp.allclose(logits, ref, atol=2e-2, rtol=2e-2), (
        f"max abs err {jnp.max(jnp.abs(logits - ref))}"
    )
    print("KERNEL_OK")
</pallas_src>

<mosaic_0001>
module attributes {stable_mosaic.version = 11 : i64} {
  func.func @_zindi_kernel(%arg0: i32, %arg1: memref<1x18x18x4xbf16, #tpu.memory_space<vmem>>, %arg2: memref<9x4x128xbf16, #tpu.memory_space<vmem>>, %arg3: memref<1x128xf32, #tpu.memory_space<vmem>>, %arg4: memref<128x128xbf16, #tpu.memory_space<vmem>>, %arg5: memref<1x128xf32, #tpu.memory_space<vmem>>, %arg6: memref<1x1x128xf32, #tpu.memory_space<vmem>>) attributes {dimension_semantics = [#tpu.dimension_semantics<parallel>], iteration_bounds = array<i64: 2>, scalar_prefetch = 0 : i64, scratch_operands = 0 : i64, tpu.core_type = #tpu.core_type<tc>, window_params = [{transform_indices = @transform_0, window_bounds = array<i64: 1, 18, 18, 4>}, {pipeline_mode = #tpu.pipeline_mode<synchronous>, transform_indices = @transform_1, window_bounds = array<i64: 9, 4, 128>}, {pipeline_mode = #tpu.pipeline_mode<synchronous>, transform_indices = @transform_2, window_bounds = array<i64: 1, 128>}, {pipeline_mode = #tpu.pipeline_mode<synchronous>, transform_indices = @transform_3, window_bounds = array<i64: 128, 128>}, {pipeline_mode = #tpu.pipeline_mode<synchronous>, transform_indices = @transform_4, window_bounds = array<i64: 1, 128>}, {transform_indices = @transform_5, window_bounds = array<i64: 1, 1, 128>}]} {
    %cst = arith.constant 0.000000e+00 : f32
    %0 = vector.broadcast %cst : f32 to vector<1x128xf32>
    %c0 = arith.constant 0 : index
    %c0_0 = arith.constant 0 : index
    %c0_1 = arith.constant 0 : index
    %c0_2 = arith.constant 0 : index
    %1 = vector.load %arg1[%c0, %c0_0, %c0_1, %c0_2] : memref<1x18x18x4xbf16, #tpu.memory_space<vmem>>, vector<1x8x16x4xbf16>
    %2 = vector.shape_cast %1 : vector<1x8x16x4xbf16> to vector<128x4xbf16>
    %c0_3 = arith.constant 0 : index
    %c0_4 = arith.constant 0 : index
    %c0_5 = arith.constant 0 : index
    %3 = vector.load %arg2[%c0_3, %c0_4, %c0_5] : memref<9x4x128xbf16, #tpu.memory_space<vmem>>, vector<1x4x128xbf16>
    %4 = vector.shape_cast %3 : vector<1x4x128xbf16> to vector<4x128xbf16>
    %cst_6 = arith.constant dense<0.000000e+00> : vector<128x128xf32>
    %5 = tpu.matmul %2, %4, %cst_6 {dimension_numbers = #tpu.dot_dimension_numbers<[1], [0], [0], [1], [0, 0, 1, 1], [], []>} : vector<128x4xbf16>, vector<4x128xbf16>, vector<128x128xf32> -> vector<128x128xf32>
    %c0_7 = arith.constant 0 : index
    %c0_8 = arith.constant 0 : index
    %c1 = arith.constant 1 : index
    %c0_9 = arith.constant 0 : index
    %6 = vector.load %arg1[%c0_7, %c0_8, %c1, %c0_9] : memref<1x18x18x4xbf16, #tpu.memory_space<vmem>>, vector<1x8x16x4xbf16>
    %7 = vector.shape_cast %6 : vector<1x8x16x4xbf16> to vector<128x4xbf16>
    %c1_10 = arith.constant 1 : index
    %c0_11 = arith.constant 0 : index
    %c0_12 = arith.constant 0 : index
    %8 = vector.load %arg2[%c1_10, %c0_11, %c0_12] : memref<9x4x128xbf16, #tpu.memory_space<vmem>>, vector<1x4x128xbf16>
    %9 = vector.shape_cast %8 : vector<1x4x128xbf16> to vector<4x128xbf16>
    %cst_13 = arith.constant dense<0.000000e+00> : vector<128x128xf32>
    %10 = tpu.matmul %7, %9, %cst_13 {dimension_numbers = #tpu.dot_dimension_numbers<[1], [0], [0], [1], [0, 0, 1, 1], [], []>} : vector<128x4xbf16>, vector<4x128xbf16>, vector<128x128xf32> -> vector<128x128xf32>
    %11 = arith.addf %5, %10 : vector<128x128xf32>
    %c0_14 = arith.constant 0 : index
    %c0_15 = arith.constant 0 : index
    %c2 = arith.constant 2 : index
    %c0_16 = arith.constant 0 : index
    %12 = vector.load %arg1[%c0_14, %c0_15, %c2, %c0_16] : memref<1x18x18x4xbf16, #tpu.memory_space<vmem>>, vector<1x8x16x4xbf16>
    %13 = vector.shape_cast %12 : vector<1x8x16x4xbf16> to vector<128x4xbf16>
    %c2_17 = arith.constant 2 : index
    %c0_18 = arith.constant 0 : index
    %c0_19 = arith.constant 0 : index
    %14 = vector.load %arg2[%c2_17, %c0_18, %c0_19] : memref<9x4x128xbf16, #tpu.memory_space<vmem>>, vector<1x4x128xbf16>
    %15 = vector.shape_cast %14 : vector<1x4x128xbf16> to vector<4x128xbf16>
    %cst_20 = arith.constant dense<0.000000e+00> : vector<128x128xf32>
    %16 = tpu.matmul %13, %15, %cst_20 {dimension_numbers = #tpu.dot_dimension_numbers<[1], [0], [0], [1], [0, 0, 1, 1], [], []>} : vector<128x4xbf16>, vector<4x128xbf16>, vector<128x128xf32> -> vector<128x128xf32>
    %17 = arith.addf %11, %16 : vector<128x128xf32>
    %c0_21 = arith.constant 0 : index
    %c1_22 = arith.constant 1 : index
    %c0_23 = arith.constant 0 : index
    %c0_24 = arith.constant 0 : index
    %18 = vector.load %arg1[%c0_21, %c1_22, %c0_23, %c0_24] : memref<1x18x18x4xbf16, #tpu.memory_space<vmem>>, vector<1x8x16x4xbf16>
    %19 = vector.shape_cast %18 : vector<1x8x16x4xbf16> to vector<128x4xbf16>
    %c3 = arith.constant 3 : index
    %c0_25 = arith.constant 0 : index
    %c0_26 = arith.constant 0 : index
    %20 = vector.load %arg2[%c3, %c0_25, %c0_26] : memref<9x4x128xbf16, #tpu.memory_space<vmem>>, vector<1x4x128xbf16>
    %21 = vector.shape_cast %20 : vector<1x4x128xbf16> to vector<4x128xbf16>
    %cst_27 = arith.constant dense<0.000000e+00> : vector<128x128xf32>
    %22 = tpu.matmul %19, %21, %cst_27 {dimension_numbers = #tpu.dot_dimension_numbers<[1], [0], [0], [1], [0, 0, 1, 1], [], []>} : vector<128x4xbf16>, vector<4x128xbf16>, vector<128x128xf32> -> vector<128x128xf32>
    %23 = arith.addf %17, %22 : vector<128x128xf32>
    %c0_28 = arith.constant 0 : index
    %c1_29 = arith.constant 1 : index
    %c1_30 = arith.constant 1 : index
    %c0_31 = arith.constant 0 : index
    %24 = vector.load %arg1[%c0_28, %c1_29, %c1_30, %c0_31] : memref<1x18x18x4xbf16, #tpu.memory_space<vmem>>, vector<1x8x16x4xbf16>
    %25 = vector.shape_cast %24 : vector<1x8x16x4xbf16> to vector<128x4xbf16>
    %c4 = arith.constant 4 : index
    %c0_32 = arith.constant 0 : index
    %c0_33 = arith.constant 0 : index
    %26 = vector.load %arg2[%c4, %c0_32, %c0_33] : memref<9x4x128xbf16, #tpu.memory_space<vmem>>, vector<1x4x128xbf16>
    %27 = vector.shape_cast %26 : vector<1x4x128xbf16> to vector<4x128xbf16>
    %cst_34 = arith.constant dense<0.000000e+00> : vector<128x128xf32>
    %28 = tpu.matmul %25, %27, %cst_34 {dimension_numbers = #tpu.dot_dimension_numbers<[1], [0], [0], [1], [0, 0, 1, 1], [], []>} : vector<128x4xbf16>, vector<4x128xbf16>, vector<128x128xf32> -> vector<128x128xf32>
    %29 = arith.addf %23, %28 : vector<128x128xf32>
    %c0_35 = arith.constant 0 : index
    %c1_36 = arith.constant 1 : index
    %c2_37 = arith.constant 2 : index
    %c0_38 = arith.constant 0 : index
    %30 = vector.load %arg1[%c0_35, %c1_36, %c2_37, %c0_38] : memref<1x18x18x4xbf16, #tpu.memory_space<vmem>>, vector<1x8x16x4xbf16>
    %31 = vector.shape_cast %30 : vector<1x8x16x4xbf16> to vector<128x4xbf16>
    %c5 = arith.constant 5 : index
    %c0_39 = arith.constant 0 : index
    %c0_40 = arith.constant 0 : index
    %32 = vector.load %arg2[%c5, %c0_39, %c0_40] : memref<9x4x128xbf16, #tpu.memory_space<vmem>>, vector<1x4x128xbf16>
    %33 = vector.shape_cast %32 : vector<1x4x128xbf16> to vector<4x128xbf16>
    %cst_41 = arith.constant dense<0.000000e+00> : vector<128x128xf32>
    %34 = tpu.matmul %31, %33, %cst_41 {dimension_numbers = #tpu.dot_dimension_numbers<[1], [0], [0], [1], [0, 0, 1, 1], [], []>} : vector<128x4xbf16>, vector<4x128xbf16>, vector<128x128xf32> -> vector<128x128xf32>
    %35 = arith.addf %29, %34 : vector<128x128xf32>
    %c0_42 = arith.constant 0 : index
    %c2_43 = arith.constant 2 : index
    %c0_44 = arith.constant 0 : index
    %c0_45 = arith.constant 0 : index
    %36 = vector.load %arg1[%c0_42, %c2_43, %c0_44, %c0_45] : memref<1x18x18x4xbf16, #tpu.memory_space<vmem>>, vector<1x8x16x4xbf16>
    %37 = vector.shape_cast %36 : vector<1x8x16x4xbf16> to vector<128x4xbf16>
    %c6 = arith.constant 6 : index
    %c0_46 = arith.constant 0 : index
    %c0_47 = arith.constant 0 : index
    %38 = vector.load %arg2[%c6, %c0_46, %c0_47] : memref<9x4x128xbf16, #tpu.memory_space<vmem>>, vector<1x4x128xbf16>
    %39 = vector.shape_cast %38 : vector<1x4x128xbf16> to vector<4x128xbf16>
    %cst_48 = arith.constant dense<0.000000e+00> : vector<128x128xf32>
    %40 = tpu.matmul %37, %39, %cst_48 {dimension_numbers = #tpu.dot_dimension_numbers<[1], [0], [0], [1], [0, 0, 1, 1], [], []>} : vector<128x4xbf16>, vector<4x128xbf16>, vector<128x128xf32> -> vector<128x128xf32>
    %41 = arith.addf %35, %40 : vector<128x128xf32>
    %c0_49 = arith.constant 0 : index
    %c2_50 = arith.constant 2 : index
    %c1_51 = arith.constant 1 : index
    %c0_52 = arith.constant 0 : index
    %42 = vector.load %arg1[%c0_49, %c2_50, %c1_51, %c0_52] : memref<1x18x18x4xbf16, #tpu.memory_space<vmem>>, vector<1x8x16x4xbf16>
    %43 = vector.shape_cast %42 : vector<1x8x16x4xbf16> to vector<128x4xbf16>
    %c7 = arith.constant 7 : index
    %c0_53 = arith.constant 0 : index
    %c0_54 = arith.constant 0 : index
    %44 = vector.load %arg2[%c7, %c0_53, %c0_54] : memref<9x4x128xbf16, #tpu.memory_space<vmem>>, vector<1x4x128xbf16>
    %45 = vector.shape_cast %44 : vector<1x4x128xbf16> to vector<4x128xbf16>
    %cst_55 = arith.constant dense<0.000000e+00> : vector<128x128xf32>
    %46 = tpu.matmul %43, %45, %cst_55 {dimension_numbers = #tpu.dot_dimension_numbers<[1], [0], [0], [1], [0, 0, 1, 1], [], []>} : vector<128x4xbf16>, vector<4x128xbf16>, vector<128x128xf32> -> vector<128x128xf32>
    %47 = arith.addf %41, %46 : vector<128x128xf32>
    %c0_56 = arith.constant 0 : index
    %c2_57 = arith.constant 2 : index
    %c2_58 = arith.constant 2 : index
    %c0_59 = arith.constant 0 : index
    %48 = vector.load %arg1[%c0_56, %c2_57, %c2_58, %c0_59] : memref<1x18x18x4xbf16, #tpu.memory_space<vmem>>, vector<1x8x16x4xbf16>
    %49 = vector.shape_cast %48 : vector<1x8x16x4xbf16> to vector<128x4xbf16>
    %c8 = arith.constant 8 : index
    %c0_60 = arith.constant 0 : index
    %c0_61 = arith.constant 0 : index
    %50 = vector.load %arg2[%c8, %c0_60, %c0_61] : memref<9x4x128xbf16, #tpu.memory_space<vmem>>, vector<1x4x128xbf16>
    %51 = vector.shape_cast %50 : vector<1x4x128xbf16> to vector<4x128xbf16>
    %cst_62 = arith.constant dense<0.000000e+00> : vector<128x128xf32>
    %52 = tpu.matmul %49, %51, %cst_62 {dimension_numbers = #tpu.dot_dimension_numbers<[1], [0], [0], [1], [0, 0, 1, 1], [], []>} : vector<128x4xbf16>, vector<4x128xbf16>, vector<128x128xf32> -> vector<128x128xf32>
    %53 = arith.addf %47, %52 : vector<128x128xf32>
    %c0_63 = arith.constant 0 : index
    %c0_64 = arith.constant 0 : index
    %54 = vector.load %arg3[%c0_63, %c0_64] : memref<1x128xf32, #tpu.memory_space<vmem>>, vector<1x128xf32>
    %55 = vector.broadcast %54 : vector<1x128xf32> to vector<128x128xf32>
    %56 = arith.addf %53, %55 : vector<128x128xf32>
    %cst_65 = arith.constant 0.000000e+00 : f32
    %57 = vector.broadcast %cst_65 : f32 to vector<128x128xf32>
    %58 = arith.maximumf %56, %57 : vector<128x128xf32>
    %59 = vector.shape_cast %58 : vector<128x128xf32> to vector<1x128x128xf32>
    %cst_66 = arith.constant dense<0.000000e+00> : vector<1x128xf32>
    %60 = vector.multi_reduction <add>, %59, %cst_66 [1] : vector<1x128x128xf32> to vector<1x128xf32>
    %61 = arith.addf %0, %60 : vector<1x128xf32>
    %c0_67 = arith.constant 0 : index
    %c8_68 = arith.constant 8 : index
    %c0_69 = arith.constant 0 : index
    %c0_70 = arith.constant 0 : index
    %62 = vector.load %arg1[%c0_67, %c8_68, %c0_69, %c0_70] : memref<1x18x18x4xbf16, #tpu.memory_space<vmem>>, vector<1x8x16x4xbf16>
    %63 = vector.shape_cast %62 : vector<1x8x16x4xbf16> to vector<128x4xbf16>
    %c0_71 = arith.constant 0 : index
    %c0_72 = arith.constant 0 : index
    %c0_73 = arith.constant 0 : index
    %64 = vector.load %arg2[%c0_71, %c0_72, %c0_73] : memref<9x4x128xbf16, #tpu.memory_space<vmem>>, vector<1x4x128xbf16>
    %65 = vector.shape_cast %64 : vector<1x4x128xbf16> to vector<4x128xbf16>
    %cst_74 = arith.constant dense<0.000000e+00> : vector<128x128xf32>
    %66 = tpu.matmul %63, %65, %cst_74 {dimension_numbers = #tpu.dot_dimension_numbers<[1], [0], [0], [1], [0, 0, 1, 1], [], []>} : vector<128x4xbf16>, vector<4x128xbf16>, vector<128x128xf32> -> vector<128x128xf32>
    %c0_75 = arith.constant 0 : index
    %c8_76 = arith.constant 8 : index
    %c1_77 = arith.constant 1 : index
    %c0_78 = arith.constant 0 : index
    %67 = vector.load %arg1[%c0_75, %c8_76, %c1_77, %c0_78] : memref<1x18x18x4xbf16, #tpu.memory_space<vmem>>, vector<1x8x16x4xbf16>
    %68 = vector.shape_cast %67 : vector<1x8x16x4xbf16> to vector<128x4xbf16>
    %c1_79 = arith.constant 1 : index
    %c0_80 = arith.constant 0 : index
    %c0_81 = arith.constant 0 : index
    %69 = vector.load %arg2[%c1_79, %c0_80, %c0_81] : memref<9x4x128xbf16, #tpu.memory_space<vmem>>, vector<1x4x128xbf16>
    %70 = vector.shape_cast %69 : vector<1x4x128xbf16> to vector<4x128xbf16>
    %cst_82 = arith.constant dense<0.000000e+00> : vector<128x128xf32>
    %71 = tpu.matmul %68, %70, %cst_82 {dimension_numbers = #tpu.dot_dimension_numbers<[1], [0], [0], [1], [0, 0, 1, 1], [], []>} : vector<128x4xbf16>, vector<4x128xbf16>, vector<128x128xf32> -> vector<128x128xf32>
    %72 = arith.addf %66, %71 : vector<128x128xf32>
    %c0_83 = arith.constant 0 : index
    %c8_84 = arith.constant 8 : index
    %c2_85 = arith.constant 2 : index
    %c0_86 = arith.constant 0 : index
    %73 = vector.load %arg1[%c0_83, %c8_84, %c2_85, %c0_86] : memref<1x18x18x4xbf16, #tpu.memory_space<vmem>>, vector<1x8x16x4xbf16>
    %74 = vector.shape_cast %73 : vector<1x8x16x4xbf16> to vector<128x4xbf16>
    %c2_87 = arith.constant 2 : index
    %c0_88 = arith.constant 0 : index
    %c0_89 = arith.constant 0 : index
    %75 = vector.load %arg2[%c2_87, %c0_88, %c0_89] : memref<9x4x128xbf16, #tpu.memory_space<vmem>>, vector<1x4x128xbf16>
    %76 = vector.shape_cast %75 : vector<1x4x128xbf16> to vector<4x128xbf16>
    %cst_90 = arith.constant dense<0.000000e+00> : vector<128x128xf32>
    %77 = tpu.matmul %74, %76, %cst_90 {dimension_numbers = #tpu.dot_dimension_numbers<[1], [0], [0], [1], [0, 0, 1, 1], [], []>} : vector<128x4xbf16>, vector<4x128xbf16>, vector<128x128xf32> -> vector<128x128xf32>
    %78 = arith.addf %72, %77 : vector<128x128xf32>
    %c0_91 = arith.constant 0 : index
    %c9 = arith.constant 9 : index
    %c0_92 = arith.constant 0 : index
    %c0_93 = arith.constant 0 : index
    %79 = vector.load %arg1[%c0_91, %c9, %c0_92, %c0_93] : memref<1x18x18x4xbf16, #tpu.memory_space<vmem>>, vector<1x8x16x4xbf16>
    %80 = vector.shape_cast %79 : vector<1x8x16x4xbf16> to vector<128x4xbf16>
    %c3_94 = arith.constant 3 : index
    %c0_95 = arith.constant 0 : index
    %c0_96 = arith.constant 0 : index
    %81 = vector.load %arg2[%c3_94, %c0_95, %c0_96] : memref<9x4x128xbf16, #tpu.memory_space<vmem>>, vector<1x4x128xbf16>
    %82 = vector.shape_cast %81 : vector<1x4x128xbf16> to vector<4x128xbf16>
    %cst_97 = arith.constant dense<0.000000e+00> : vector<128x128xf32>
    %83 = tpu.matmul %80, %82, %cst_97 {dimension_numbers = #tpu.dot_dimension_numbers<[1], [0], [0], [1], [0, 0, 1, 1], [], []>} : vector<128x4xbf16>, vector<4x128xbf16>, vector<128x128xf32> -> vector<128x128xf32>
    %84 = arith.addf %78, %83 : vector<128x128xf32>
    %c0_98 = arith.constant 0 : index
    %c9_99 = arith.constant 9 : index
    %c1_100 = arith.constant 1 : index
    %c0_101 = arith.constant 0 : index
    %85 = vector.load %arg1[%c0_98, %c9_99, %c1_100, %c0_101] : memref<1x18x18x4xbf16, #tpu.memory_space<vmem>>, vector<1x8x16x4xbf16>
    %86 = vector.shape_cast %85 : vector<1x8x16x4xbf16> to vector<128x4xbf16>
    %c4_102 = arith.constant 4 : index
    %c0_103 = arith.constant 0 : index
    %c0_104 = arith.constant 0 : index
    %87 = vector.load %arg2[%c4_102, %c0_103, %c0_104] : memref<9x4x128xbf16, #tpu.memory_space<vmem>>, vector<1x4x128xbf16>
    %88 = vector.shape_cast %87 : vector<1x4x128xbf16> to vector<4x128xbf16>
    %cst_105 = arith.constant dense<0.000000e+00> : vector<128x128xf32>
    %89 = tpu.matmul %86, %88, %cst_105 {dimension_numbers = #tpu.dot_dimension_numbers<[1], [0], [0], [1], [0, 0, 1, 1], [], []>} : vector<128x4xbf16>, vector<4x128xbf16>, vector<128x128xf32> -> vector<128x128xf32>
    %90 = arith.addf %84, %89 : vector<128x128xf32>
    %c0_106 = arith.constant 0 : index
    %c9_107 = arith.constant 9 : index
    %c2_108 = arith.constant 2 : index
    %c0_109 = arith.constant 0 : index
    %91 = vector.load %arg1[%c0_106, %c9_107, %c2_108, %c0_109] : memref<1x18x18x4xbf16, #tpu.memory_space<vmem>>, vector<1x8x16x4xbf16>
    %92 = vector.shape_cast %91 : vector<1x8x16x4xbf16> to vector<128x4xbf16>
    %c5_110 = arith.constant 5 : index
    %c0_111 = arith.constant 0 : index
    %c0_112 = arith.constant 0 : index
    %93 = vector.load %arg2[%c5_110, %c0_111, %c0_112] : memref<9x4x128xbf16, #tpu.memory_space<vmem>>, vector<1x4x128xbf16>
    %94 = vector.shape_cast %93 : vector<1x4x128xbf16> to vector<4x128xbf16>
    %cst_113 = arith.constant dense<0.000000e+00> : vector<128x128xf32>
    %95 = tpu.matmul %92, %94, %cst_113 {dimension_numbers = #tpu.dot_dimension_numbers<[1], [0], [0], [1], [0, 0, 1, 1], [], []>} : vector<128x4xbf16>, vector<4x128xbf16>, vector<128x128xf32> -> vector<128x128xf32>
    %96 = arith.addf %90, %95 : vector<128x128xf32>
    %c0_114 = arith.constant 0 : index
    %c10 = arith.constant 10 : index
    %c0_115 = arith.constant 0 : index
    %c0_116 = arith.constant 0 : index
    %97 = vector.load %arg1[%c0_114, %c10, %c0_115, %c0_116] : memref<1x18x18x4xbf16, #tpu.memory_space<vmem>>, vector<1x8x16x4xbf16>
    %98 = vector.shape_cast %97 : vector<1x8x16x4xbf16> to vector<128x4xbf16>
    %c6_117 = arith.constant 6 : index
    %c0_118 = arith.constant 0 : index
    %c0_119 = arith.constant 0 : index
    %99 = vector.load %arg2[%c6_117, %c0_118, %c0_119] : memref<9x4x128xbf16, #tpu.memory_space<vmem>>, vector<1x4x128xbf16>
    %100 = vector.shape_cast %99 : vector<1x4x128xbf16> to vector<4x128xbf16>
    %cst_120 = arith.constant dense<0.000000e+00> : vector<128x128xf32>
    %101 = tpu.matmul %98, %100, %cst_120 {dimension_numbers = #tpu.dot_dimension_numbers<[1], [0], [0], [1], [0, 0, 1, 1], [], []>} : vector<128x4xbf16>, vector<4x128xbf16>, vector<128x128xf32> -> vector<128x128xf32>
    %102 = arith.addf %96, %101 : vector<128x128xf32>
    %c0_121 = arith.constant 0 : index
    %c10_122 = arith.constant 10 : index
    %c1_123 = arith.constant 1 : index
    %c0_124 = arith.constant 0 : index
    %103 = vector.load %arg1[%c0_121, %c10_122, %c1_123, %c0_124] : memref<1x18x18x4xbf16, #tpu.memory_space<vmem>>, vector<1x8x16x4xbf16>
    %104 = vector.shape_cast %103 : vector<1x8x16x4xbf16> to vector<128x4xbf16>
    %c7_125 = arith.constant 7 : index
    %c0_126 = arith.constant 0 : index
    %c0_127 = arith.constant 0 : index
    %105 = vector.load %arg2[%c7_125, %c0_126, %c0_127] : memref<9x4x128xbf16, #tpu.memory_space<vmem>>, vector<1x4x128xbf16>
    %106 = vector.shape_cast %105 : vector<1x4x128xbf16> to vector<4x128xbf16>
    %cst_128 = arith.constant dense<0.000000e+00> : vector<128x128xf32>
    %107 = tpu.matmul %104, %106, %cst_128 {dimension_numbers = #tpu.dot_dimension_numbers<[1], [0], [0], [1], [0, 0, 1, 1], [], []>} : vector<128x4xbf16>, vector<4x128xbf16>, vector<128x128xf32> -> vector<128x128xf32>
    %108 = arith.addf %102, %107 : vector<128x128xf32>
    %c0_129 = arith.constant 0 : index
    %c10_130 = arith.constant 10 : index
    %c2_131 = arith.constant 2 : index
    %c0_132 = arith.constant 0 : index
    %109 = vector.load %arg1[%c0_129, %c10_130, %c2_131, %c0_132] : memref<1x18x18x4xbf16, #tpu.memory_space<vmem>>, vector<1x8x16x4xbf16>
    %110 = vector.shape_cast %109 : vector<1x8x16x4xbf16> to vector<128x4xbf16>
    %c8_133 = arith.constant 8 : index
    %c0_134 = arith.constant 0 : index
    %c0_135 = arith.constant 0 : index
    %111 = vector.load %arg2[%c8_133, %c0_134, %c0_135] : memref<9x4x128xbf16, #tpu.memory_space<vmem>>, vector<1x4x128xbf16>
    %112 = vector.shape_cast %111 : vector<1x4x128xbf16> to vector<4x128xbf16>
    %cst_136 = arith.constant dense<0.000000e+00> : vector<128x128xf32>
    %113 = tpu.matmul %110, %112, %cst_136 {dimension_numbers = #tpu.dot_dimension_numbers<[1], [0], [0], [1], [0, 0, 1, 1], [], []>} : vector<128x4xbf16>, vector<4x128xbf16>, vector<128x128xf32> -> vector<128x128xf32>
    %114 = arith.addf %108, %113 : vector<128x128xf32>
    %c0_137 = arith.constant 0 : index
    %c0_138 = arith.constant 0 : index
    %115 = vector.load %arg3[%c0_137, %c0_138] : memref<1x128xf32, #tpu.memory_space<vmem>>, vector<1x128xf32>
    %116 = vector.broadcast %115 : vector<1x128xf32> to vector<128x128xf32>
    %117 = arith.addf %114, %116 : vector<128x128xf32>
    %cst_139 = arith.constant 0.000000e+00 : f32
    %118 = vector.broadcast %cst_139 : f32 to vector<128x128xf32>
    %119 = arith.maximumf %117, %118 : vector<128x128xf32>
    %120 = vector.shape_cast %119 : vector<128x128xf32> to vector<1x128x128xf32>
    %cst_140 = arith.constant dense<0.000000e+00> : vector<1x128xf32>
    %121 = vector.multi_reduction <add>, %120, %cst_140 [1] : vector<1x128x128xf32> to vector<1x128xf32>
    %122 = arith.addf %61, %121 : vector<1x128xf32>
    %cst_141 = arith.constant 3.906250e-03 : f32
    %123 = vector.broadcast %cst_141 : f32 to vector<1x128xf32>
    %124 = arith.mulf %122, %123 : vector<1x128xf32>
    %125 = arith.truncf %124 : vector<1x128xf32> to vector<1x128xbf16>
    %c0_142 = arith.constant 0 : index
    %c0_143 = arith.constant 0 : index
    %126 = vector.load %arg4[%c0_142, %c0_143] : memref<128x128xbf16, #tpu.memory_space<vmem>>, vector<128x128xbf16>
    %cst_144 = arith.constant dense<0.000000e+00> : vector<1x128xf32>
    %127 = tpu.matmul %125, %126, %cst_144 {dimension_numbers = #tpu.dot_dimension_numbers<[1], [0], [0], [1], [0, 0, 1, 1], [], []>} : vector<1x128xbf16>, vector<128x128xbf16>, vector<1x128xf32> -> vector<1x128xf32>
    %c0_145 = arith.constant 0 : index
    %c0_146 = arith.constant 0 : index
    %128 = vector.load %arg5[%c0_145, %c0_146] : memref<1x128xf32, #tpu.memory_space<vmem>>, vector<1x128xf32>
    %129 = arith.addf %127, %128 : vector<1x128xf32>
    %c0_147 = arith.constant 0 : index
    %c0_148 = arith.constant 0 : index
    %c0_149 = arith.constant 0 : index
    %130 = vector.load %arg6[%c0_147, %c0_148, %c0_149] : memref<1x1x128xf32, #tpu.memory_space<vmem>>, vector<1x1x128xf32>
    %131 = vector.shape_cast %130 : vector<1x1x128xf32> to vector<1x128xf32>
    %132 = vector.shape_cast %129 : vector<1x128xf32> to vector<1x1x128xf32>
    tpu.vector_store %arg6[%c0_147, %c0_148, %c0_149], %132 {strides = array<i32>} : memref<1x1x128xf32, #tpu.memory_space<vmem>>, vector<1x1x128xf32>,
    return
  }
  func.func @transform_0(%arg0: i32) -> (i32, i32, i32, i32) {
    %c0_i32 = arith.constant 0 : i32
    %c0_i32_0 = arith.constant 0 : i32
    %c0_i32_1 = arith.constant 0 : i32
    %c0_i32_2 = arith.constant 0 : i32
    return %arg0, %c0_i32, %c0_i32_0, %c0_i32_1 : i32, i32, i32, i32
  }
  func.func @transform_1(%arg0: i32) -> (i32, i32, i32) {
    %c0_i32 = arith.constant 0 : i32
    %c0_i32_0 = arith.constant 0 : i32
    %c0_i32_1 = arith.constant 0 : i32
    %c0_i32_2 = arith.constant 0 : i32
    return %c0_i32, %c0_i32_0, %c0_i32_1 : i32, i32, i32
  }
  func.func @transform_2(%arg0: i32) -> (i32, i32) {
    %c0_i32 = arith.constant 0 : i32
    %c0_i32_0 = arith.constant 0 : i32
    %c0_i32_1 = arith.constant 0 : i32
    return %c0_i32, %c0_i32_0 : i32, i32
  }
  func.func @transform_3(%arg0: i32) -> (i32, i32) {
    %c0_i32 = arith.constant 0 : i32
    %c0_i32_0 = arith.constant 0 : i32
    %c0_i32_1 = arith.constant 0 : i32
    return %c0_i32, %c0_i32_0 : i32, i32
  }
  func.func @transform_4(%arg0: i32) -> (i32, i32) {
    %c0_i32 = arith.constant 0 : i32
    %c0_i32_0 = arith.constant 0 : i32
    %c0_i32_1 = arith.constant 0 : i32
    return %c0_i32, %c0_i32_0 : i32, i32
  }
  func.func @transform_5(%arg0: i32) -> (i32, i32, i32) {
    %c0_i32 = arith.constant 0 : i32
    %c0_i32_0 = arith.constant 0 : i32
    %c0_i32_1 = arith.constant 0 : i32
    return %arg0, %c0_i32, %c0_i32_0 : i32, i32, i32
  }
}

</mosaic_0001>

<bundles_post_ra>
// kernel: tpu_custom_call.1
= control target key start
LH: loop header
LB: loop body
LE: loop exit
PB: predicated region body
PF: predicated region fallthrough
CT: control target
= control target key end

     0   :  { %10 = vsyncpa [#allocation3], 0  ;;  %s9110_s0 = inlined_call_operand.vmem [shape: bf16[2,18,18,4], index: 0, kind: input, shape index: {}]   ;;  %s9111_s1 = inlined_call_operand.vmem [shape: bf16[9,4,128], index: 1, kind: input, shape index: {}]   ;;  %s9112_s2 = inlined_call_operand.vmem [shape: f32[1,128], index: 2, kind: input, shape index: {}]   ;;  %s9113_s3 = inlined_call_operand.vmem [shape: bf16[128,128], index: 3, kind: input, shape index: {}]   ;;  %s9114_s4 = inlined_call_operand.vmem [shape: f32[1,128], index: 4, kind: input, shape index: {}]   ;;  %s9115_s5 = inlined_call_operand.hbm [shape: f32[2,1,128], index: 5, kind: output, shape index: {}]  }
   0x1   :  { %12 = vsyncpa [#allocation3 + $0x1], 0  ;;  %s6692_s18 = smov 0   ;;  %s6694_s19 = smov 0  }
   0x2   :  { %s6696_s20 = smov 0   ;;  %s6698_s21 = smov 0  }
   0x3 LB: > { %s6713_s22 = sadd.s32 4294967295, %s6657_s21   ;;  %s5373_s23 = sadd.s32 4294967294, %s6657_s21   ;;  %s6657_s21 = sphi %s6698_s21, %s9203_s21   ;;  %s6653_s20 = sphi %s6696_s20, %s9202_s20   ;;  %s6649_s19 = sphi %s6694_s19, %s9201_s19   ;;  %s6645_s18 = sphi %s6692_s18, %s9200_s18  }
   0x4   : > { %s6717_s24 = sadd.s32 1, %s6657_s21   ;;  %s135_s25 = sadd.s32 1, %s6653_s20 }
   0x5   : > { %s132_s26 = ssub.s32 %s6657_s21, %s6717_s24  ;;  %p145_p0 = scmp.ne.s32.totalorder %s6653_s20, %s6649_s19 }
   0x6   : > { %p133_p1 = scmp.eq.s32.totalorder %s132_s26, 0  ;;  %p146_p2 = scmp.eq.s32.totalorder %s6713_s22, 1 }
   0x7   : > { %p151_p3 = scmp.ne.s32.totalorder %s6649_s19, %s6645_s18  ;;  %p152_p4 = scmp.eq.s32.totalorder %s5373_s23, 1 }
   0x8   : > { %s6728_s27 = scalar_select %p133_p1, %s6653_s20, %s135_s25  }
   0x9   : > { %p6730_p5 = por %p146_p2, %p145_p0  ;;  %p6734_p6 = por %p152_p4, %p151_p3 }
   0xa   : > { %p5376_p7 = scmp.ge.s32.totalorder %s6657_s21, 1  ;;  %p190_p8 = scmp.lt.s32.totalorder %s6657_s21, 3 }
   0xc   : > { %p191_p9 = pnand %p5376_p7, %p190_p8 }
   0xe   : > { %194 = sbr.rel (%p191_p9) target bundleno = 781 (0x30d), region = 40 }
  0x13   : > { %v239_v0 = vld [vmem:[%s9111_s1] sm:$0x3]  ;;  %vm494_vm0 = vcmask 1041408   ;;  %v6746_v1 = vld [vmem:[%s9111_s1 + $0x2] sm:$0x3]  ;;  %p217_p10 = scmp.lt.s32.totalorder %s6713_s22, 1 }
  0x14   : > { %6474 = vmatprep.subr.msk.bf16.mxu1 %vm494_vm0, %v239_v0  ;;  %v6751_v2 = vsel %vm494_vm0, %v239_v0, 0  ;;  %6473 = vmatprep.subr.msk.bf16.mxu0 %vm494_vm0, %v6746_v1  ;;  %v6757_v3 = vsel %vm494_vm0, %v6746_v1, 0  ;;  %v5419_v4 = vld [vmem:[%s9111_s1 + $0x4] sm:$0x3]  ;;  %vm248_vm1 = vsmask.f32 3328 }
  0x15   : > { %6148 = vmatpush3.bf16.msra.mxu1 %v6751_v2  ;;  %s218_s9 = scalar_select %p217_p10, %s6713_s22, 1  ;;  %6130 = vmatpush3.bf16.msra.mxu0 %v6757_v3  ;;  %v5452_v5 = vld [vmem:[%s9111_s1 + $0x6] sm:$0x3]  ;;  %v6772_v6 = vld [vmem:[%s9111_s1 + $0x8] sm:$0x3]  ;;  %vm469_vm2 = vcmask 31744  }
  0x16   : > { %6475 = vmatprep.subr.msk.bf16.mxu0 %vm494_vm0, %v5419_v4  ;;  %vm249_vm3 = vsmask.f32 7440  ;;  %6476 = vmatprep.subr.msk.bf16.mxu1 %vm494_vm0, %v5452_v5  ;;  %v5526_v7 = vld [vmem:[%s9111_s1 + $0xa] sm:$0x3]  ;;  %v6779_v8 = vsel %vm494_vm0, %v5419_v4, 0  ;;  %v6782_v9 = vsel %vm494_vm0, %v5452_v5, 0 }
  0x17   : > { %s6491_s16 = smul.u32 216, %s218_s9  ;;  %v6787_v10 = vld [vmem:[%s9111_s1 + $0xc] sm:$0x3]  ;;  %v6792_v11 = vld [vmem:[%s9111_s1 + $0xe] sm:$0x3]  ;;  %v6801_v12 = vsel %vm494_vm0, %v6772_v6, 0  ;;  %vm6848_vm4 = vmor %vm248_vm1, %vm249_vm3 }
  0x18   : > { %v6804_v13 = vsel %vm494_vm0, %v5526_v7, 0  ;;  %v6808_v14 = vsel %vm494_vm0, %v6787_v10, 0  ;;  %v6812_v15 = vsel %vm494_vm0, %v6792_v11, 0  ;;  %vm783_vm5 = vcmask 1042432   ;;  %s215_s14 = sand.u32 1, %s6649_s19   ;;  %s5955_s17 = sshll.u32 %s6713_s22, 4 }
  0x19   : > { %s6797_s9 = scalar_lea.vmem %s9110_s0, %s6491_s16  ;;  %vm784_vm6 = vcmask 1046532   ;;  %vm6660_vm8 = vmmov 0   ;;  %s216_s23 = scalar_lea.vmem [#allocation2], %s215_s14 }
  0x1a   : > { %v223_v16 = vld [vmem:[%s6797_s9] sm:$0xf]  ;;  %v6816_v17 = vld [vmem:[%s6797_s9 + $0x4] sm:$0xf]  ;;  %v225_v18 = vld [vmem:[%s6797_s9 + $0xc] sm:$0xf]  ;;  %s9069_s6 = scalar_lea.hbm %s9115_s5, %s5955_s17 }
  0x1b   : > { %v252_v19 = vshrl.u32 %v223_v16, 16  ;;  %v255_v20 = vshll.u32 %v223_v16, 16  ;;  %v265_v21 = vshrl.u32 %v6816_v17, 16  ;;  %v5395_v22 = vcombine.low %v223_v16, %v6816_v17  ;;  %v6822_v23 = vld [vmem:[%s6797_s9 + $0x10] sm:$0xf]  ;;  %vm6962_vm7 = vmor %vm783_vm5, %vm784_vm6  ;;  %s5318_s25 = sshll.u32 %s216_s23, 4  ;;  %s9071_s25 = int_to_ptr.vmem [resolvable:$true] %s5318_s25 }
  0x1c   : > { %v788_v24 = vrot.slane %v6816_v17, 5  ;;  %v276_v25 = vshrl.u32 %v225_v18, 16  ;;  %v279_v26 = vshll.u32 %v225_v18, 16  ;;  %v289_v27 = vshrl.u32 %v6822_v23, 16  ;;  %v6827_v28 = vld [vmem:[%s6797_s9 + $0x8] sm:$0x1] }
  0x1d   : > { %v254_v29 = vrot.slane %v252_v19, 4  ;;  %v257_v30 = vrot.slane %v255_v20, 5  ;;  %6149 = vmatprep.mubr.msk.bf16.mxu1 %vm469_vm2, %v5395_v22  ;;  %v5396_v31 = vcombine.low %v225_v18, %v6822_v23  ;;  %v795_v32 = vrot.slane %v6822_v23, 5  ;;  %v6838_v37 = vld [vmem:[%s6797_s9 + $0x14] sm:$0x1]  ;;  %s5306_s7 = scalar_lea.sflag [#allocation3], %s215_s14 }
  0x1e   : > { %v6834_v33 = vrot.slane %v788_v24, 4  ;;  %v278_v34 = vrot.slane %v276_v25, 4  ;;  %v281_v35 = vrot.slane %v279_v26, 5  ;;  %v261_v36 = vshll.u32 %v6816_v17, 16  ;;  %v227_v47 = vld [vmem:[%s6797_s9 + $0x18] sm:$0xf] }
  0x1f   : > { %6150 = vmatmul.mubr.msk.bf16.vlgmr.msra.gmra.mxu1 %vm469_vm2, %v5396_v31  ;;  %v6843_v38 = vrot.slane %v795_v32, 4  ;;  %v258_v39 = vor.u32 %v257_v30, %v254_v29  ;;  %v267_v40 = vrot.slane %v265_v21, 4  ;;  %v271_v41 = vshll.u32 %v6827_v28, 16  ;;  %v6858_v52 = vld [vmem:[%s6797_s9 + $0x1c] sm:$0xf]  ;;  %s6597_s8 = scalar_lea.vmem %s9071_s25, 16 }
  0x20   : > { %v263_v43 = vrot.slane %v261_v36, 5  ;;  %v791_v44 = vrot.slane %v6827_v28, 5  ;;  %v282_v45 = vor.u32 %v281_v35, %v278_v34  ;;  %v285_v46 = vshll.u32 %v6822_v23, 16  ;;  %6184 = vmatpush3.bf16.msra.mxu1 %v6782_v9  ;;  %v229_v57 = vld [vmem:[%s6797_s9 + $0x24] sm:$0xf]  ;;  %p6598_p11 = scmp.ne.s32.totalorder %s9071_s25, %s6597_s8  ;;  %s6661_s22 = smov [#allocation2]  }
  0x21   : > { %v259_v48 = vrot.slane %v258_v39, 4  ;;  %v273_v49 = vrot.slane %v271_v41, 5  ;;  %v291_v50 = vrot.slane %v289_v27, 4  ;;  %v295_v51 = vshll.u32 %v6838_v37, 16  ;;  %6478 = vmatprep.subr.msk.bf16.mxu1 %vm494_vm0, %v5526_v7  ;;  %v6866_v62 = vld [vmem:[%s6797_s9 + $0x28] sm:$0xf] }
  0x22   : > { %v268_v53 = vor.u32 %v267_v40, %v263_v43  ;;  %v283_v54 = vrot.slane %v282_v45, 4  ;;  %v287_v55 = vrot.slane %v285_v46, 5  ;;  %v798_v56 = vrot.slane %v6838_v37, 5  ;;  %v6876_v26 = vld [vmem:[%s6797_s9 + $0x20] sm:$0x1]  ;;  %p6599_p12 = pnand %p6598_p11, %p6730_p5  ;;  %s6601_s10 = sshll.u32 %s6661_s22, 4  ;;  %s6602_s10 = int_to_ptr.vmem [resolvable:$false] %s6601_s10 }
  0x23   : > { %v264_v58 = vsel %vm6848_vm4, %v259_v48, %v263_v43  ;;  %v297_v59 = vrot.slane %v295_v51, 5  ;;  %v300_v60 = vshrl.u32 %v227_v47, 16  ;;  %v303_v61 = vshll.u32 %v227_v47, 16  ;;  %v6881_v34 = vld [vmem:[%s6797_s9 + $0x2c] sm:$0x1]  ;;  %s6603_s11 = scalar_lea.vmem %s6602_s10, 32  ;;  %p6604_p0 = scmp.lt.s32.totalorder %s9071_s25, %s6602_s10 }
  0x24   : > { %v269_v63 = vrot.slane %v268_v53, 4  ;;  %v288_v0 = vsel %vm6848_vm4, %v283_v54, %v287_v55  ;;  %v292_v4 = vor.u32 %v291_v50, %v287_v55  ;;  %v313_v5 = vshrl.u32 %v6858_v52, 16  ;;  %v231_v41 = vld [vmem:[%s6797_s9 + $0x30] sm:$0xf]  ;;  %v6893_v53 = vld [vmem:[%s6797_s9 + $0x34] sm:$0xf]  ;;  %p6600_p13 = pneg %p6599_p12  ;;  %p6605_p1 = scmp.lt.s32.totalorder %s6603_s11, %s6597_s8 }
  0x25   : > { %v302_v7 = vrot.slane %v300_v60, 4  ;;  %v305_v16 = vrot.slane %v303_v61, 5  ;;  %v5397_v18 = vcombine.low %v227_v47, %v6858_v52  ;;  %v324_v19 = vshrl.u32 %v229_v57, 16 }
  0x26   : > { %v274_v20 = vsel %vm6848_vm4, %v269_v63, %v273_v49  ;;  %v293_v21 = vrot.slane %v292_v4, 4  ;;  %v327_v22 = vshll.u32 %v229_v57, 16  ;;  %v337_v25 = vshrl.u32 %v6866_v62, 16  ;;  %v6901_v4 = vld [vmem:[%s6797_s9 + $0x40] sm:$0xf]  ;;  %p6606_p2 = por %p6605_p1, %p6604_p0 }
  0x27   : > { %v5379_v27 = vcombine.low %v264_v58, %v274_v20  ;;  %6153 = vmatprep.mubr.msk.bf16.mxu1 %vm469_vm2, %v5397_v18  ;;  %v326_v29 = vrot.slane %v324_v19, 4  ;;  %v5398_v30 = vcombine.low %v229_v57, %v6866_v62  ;;  %v306_v31 = vor.u32 %v305_v16, %v302_v7  ;;  %v6905_v19 = vld [vmem:[%s6797_s9 + $0x38] sm:$0x1] }
  0x28   : > { %v298_v35 = vsel %vm6848_vm4, %v293_v21, %v297_v59  ;;  %v329_v36 = vrot.slane %v327_v22, 5  ;;  %v309_v39 = vshll.u32 %v6858_v52, 16  ;;  %v315_v40 = vrot.slane %v313_v5, 4  ;;  %v233_v59 = vld [vmem:[%s6797_s9 + $0x3c] sm:$0xf]  ;;  %p6607_p3 = pnand %p6606_p2, %p6600_p13 }
  0x29   : > { %6131 = vmatprep.mubr.msk.bf16.mxu0 %vm469_vm2, %v5379_v27  ;;  %v5380_v43 = vcombine.low %v288_v0, %v298_v35  ;;  %6154 = vmatmul.mubr.msk.bf16.gmra.mxu1 %vm469_vm2, %v5398_v30  ;;  %v307_v45 = vrot.slane %v306_v31, 4  ;;  %v319_v46 = vshll.u32 %v6876_v26, 16  ;;  %v333_v47 = vshll.u32 %v6866_v62, 16 }
  0x2a   : > { %v311_v48 = vrot.slane %v309_v39, 5  ;;  %v330_v49 = vor.u32 %v329_v36, %v326_v29  ;;  %v339_v50 = vrot.slane %v337_v25, 4  ;;  %v343_v51 = vshll.u32 %v6881_v34, 16 }
  0x2b   : > { %6132 = vmatmul.mubr.msk.bf16.vlgmr.msra.gmra.mxu0 %vm469_vm2, %v5380_v43  ;;  %v321_v54 = vrot.slane %v319_v46, 5  ;;  %v335_v55 = vrot.slane %v333_v47, 5  ;;  %v348_v57 = vshrl.u32 %v231_v41, 16  ;;  %v351_v58 = vshll.u32 %v231_v41, 16 }
  0x2c   : > { %6166 = vmatpush3.bf16.msra.mxu0 %v6779_v8  ;;  %v312_v60 = vsel %vm6848_vm4, %v307_v45, %v311_v48  ;;  %v316_v61 = vor.u32 %v315_v40, %v311_v48  ;;  %v331_v63 = vrot.slane %v330_v49, 4  ;;  %v345_v0 = vrot.slane %v343_v51, 5  ;;  %v6919_v40 = vld [vmem:[%s6797_s9 + $0x44] sm:$0x1]  ;;  %v6926_v48 = vld [vmem:[%s6797_s9 + $0x4c] sm:$0xf] }
  0x2d   : > { %v340_v5 = vor.u32 %v339_v50, %v335_v55  ;;  %v350_v7 = vrot.slane %v348_v57, 4  ;;  %v353_v16 = vrot.slane %v351_v58, 5  ;;  %v361_v18 = vshrl.u32 %v6893_v53, 16  ;;  %6477 = vmatprep.subr.msk.bf16.mxu0 %vm494_vm0, %v6772_v6 }
  0x2e   : > { %v317_v20 = vrot.slane %v316_v61, 4  ;;  %v336_v21 = vsel %vm6848_vm4, %v331_v63, %v335_v55  ;;  %v5399_v22 = vcombine.low %v231_v41, %v6893_v53  ;;  %v372_v25 = vshrl.u32 %v233_v59, 16  ;;  %v235_v41 = vld [vmem:[%s6797_s9 + $0x48] sm:$0xf] }
  0x2f   : > { %v341_v27 = vrot.slane %v340_v5, 4  ;;  %v375_v29 = vshll.u32 %v233_v59, 16  ;;  %v385_v30 = vshrl.u32 %v6901_v4, 16  ;;  %v5400_v31 = vcombine.low %v233_v59, %v6901_v4  ;;  %v237_v5 = vld [vmem:[%s6797_s9 + $0x54] sm:$0xf] }
  0x30   : > { %v322_v6 = vsel %vm6848_vm4, %v317_v20, %v321_v54  ;;  %6157 = vmatprep.mubr.msk.bf16.mxu1 %vm469_vm2, %v5399_v22  ;;  %v374_v35 = vrot.slane %v372_v25, 4  ;;  %v354_v36 = vor.u32 %v353_v16, %v350_v7  ;;  %v357_v39 = vshll.u32 %v6893_v53, 16  ;;  %v6937_v7 = vld [vmem:[%s6797_s9 + $0x58] sm:$0xf]  ;;  %v6940_v22 = vld [vmem:[%s6797_s9 + $0x50] sm:$0x1] }
  0x31   : > { %v5381_v43 = vcombine.low %v312_v60, %v322_v6  ;;  %v346_v45 = vsel %vm6848_vm4, %v341_v27, %v345_v0  ;;  %v377_v46 = vrot.slane %v375_v29, 5  ;;  %6158 = vmatmul.mubr.msk.bf16.gmra.mxu1 %vm469_vm2, %v5400_v31  ;;  %v363_v47 = vrot.slane %v361_v18, 4  ;;  %v6541_v31 = vld [vmem:[%s6797_s9 + $0xc] sm:$0xff]  }
  0x32   : > { %v5382_v49 = vcombine.low %v336_v21, %v346_v45  ;;  %v355_v50 = vrot.slane %v354_v36, 4  ;;  %v359_v51 = vrot.slane %v357_v39, 5  ;;  %v367_v54 = vshll.u32 %v6905_v19, 16 }
  0x33   : > { %6135 = vmatprep.mubr.msk.bf16.mxu0 %vm469_vm2, %v5381_v43  ;;  %v378_v55 = vor.u32 %v377_v46, %v374_v35  ;;  %v381_v57 = vshll.u32 %v6901_v4, 16  ;;  %v387_v58 = vrot.slane %v385_v30, 4  ;;  %v391_v59 = vshll.u32 %v6919_v40, 16 }
  0x34   : > { %6136 = vmatmul.mubr.msk.bf16.gmra.mxu0 %vm469_vm2, %v5382_v49  ;;  %v360_v60 = vsel %vm6848_vm4, %v355_v50, %v359_v51  ;;  %v364_v61 = vor.u32 %v363_v47, %v359_v51  ;;  %v369_v63 = vrot.slane %v367_v54, 5  ;;  %v396_v0 = vshrl.u32 %v235_v41, 16  ;;  %v6953_v49 = vld [vmem:[%s6797_s9 + $0x5c] sm:$0x1] }
  0x35   : > { %v379_v16 = vrot.slane %v378_v55, 4  ;;  %v383_v18 = vrot.slane %v381_v57, 5  ;;  %v393_v20 = vrot.slane %v391_v59, 5  ;;  %v399_v21 = vshll.u32 %v235_v41, 16  ;;  %v760_v57 = vld [vmem:[%s6797_s9 + $0xc] sm:$0xe] }
  0x36   : > { %v365_v25 = vrot.slane %v364_v61, 4  ;;  %v398_v27 = vrot.slane %v396_v0, 4  ;;  %v409_v29 = vshrl.u32 %v6926_v48, 16  ;;  %v5401_v30 = vcombine.low %v235_v41, %v6926_v48  ;;  %v759_v41 = vld [vmem:[%s6797_s9] sm:$0xe] }
  0x37   : > { %v384_v6 = vsel %vm6848_vm4, %v379_v16, %v383_v18  ;;  %v388_v35 = vor.u32 %v387_v58, %v383_v18  ;;  %v401_v36 = vrot.slane %v399_v21, 5  ;;  %v420_v39 = vshrl.u32 %v237_v5, 16 }
  0x38   : > { %v370_v43 = vsel %vm6848_vm4, %v365_v25, %v369_v63  ;;  %6161 = vmatprep.mubr.msk.bf16.mxu1 %vm469_vm2, %v5401_v30  ;;  %v423_v45 = vshll.u32 %v237_v5, 16  ;;  %v433_v46 = vshrl.u32 %v6937_v7, 16  ;;  %v5402_v47 = vcombine.low %v237_v5, %v6937_v7 }
  0x39   : > { %v5383_v50 = vcombine.low %v360_v60, %v370_v43  ;;  %v389_v51 = vrot.slane %v388_v35, 4  ;;  %v422_v54 = vrot.slane %v420_v39, 4  ;;  %v402_v55 = vor.u32 %v401_v36, %v398_v27  ;;  %v6542_v43 = vld [vmem:[%s6797_s9 + $0x18] sm:$0xff]  }
  0x3a   : > { %v425_v58 = vrot.slane %v423_v45, 5  ;;  %6162 = vmatmul.mubr.msk.bf16.gmra.mxu1 %vm469_vm2, %v5402_v47  ;;  %v405_v59 = vshll.u32 %v6926_v48, 16  ;;  %v411_v61 = vrot.slane %v409_v29, 4  ;;  %v415_v63 = vshll.u32 %v6940_v22, 16 }
  0x3b   : > { %6139 = vmatprep.mubr.msk.bf16.mxu0 %vm469_vm2, %v5383_v50  ;;  %v394_v60 = vsel %vm6848_vm4, %v389_v51, %v393_v20  ;;  %v403_v5 = vrot.slane %v402_v55, 4  ;;  %v429_v16 = vshll.u32 %v6937_v7, 16  ;;  %v435_v18 = vrot.slane %v433_v46, 4  ;;  %6185 = vmatprep.mubr.msk.bf16.mxu1 %vm469_vm2, %v6541_v31  ;;  %v761_v46 = vld [vmem:[%s6797_s9 + $0x18] sm:$0xe] }
  0x3c   : > { %v5384_v21 = vcombine.low %v384_v6, %v394_v60  ;;  %v407_v25 = vrot.slane %v405_v59, 5  ;;  %v417_v27 = vrot.slane %v415_v63, 5  ;;  %v426_v29 = vor.u32 %v425_v58, %v422_v54 }
  0x3d   : > { %v431_v30 = vrot.slane %v429_v16, 5  ;;  %v439_v35 = vshll.u32 %v6953_v49, 16  ;;  %v5411_v36 = vrot.slane %v759_v41, 9  ;;  %v792_v20 = vsel %vm6962_vm7, %v6834_v33, %v791_v44  ;;  %v6543_v44 = vld [vmem:[%s6797_s9 + $0x24] sm:$0xff]  }
  0x3e   : > { %6140 = vmatmul.mubr.msk.bf16.gmra.mxu0 %vm469_vm2, %v5384_v21  ;;  %v408_v31 = vsel %vm6848_vm4, %v403_v5, %v407_v25  ;;  %v412_v6 = vor.u32 %v411_v61, %v407_v25  ;;  %v427_v39 = vrot.slane %v426_v29, 4  ;;  %v5412_v45 = vrot.slane %v760_v57, 9  ;;  %v762_v41 = vld [vmem:[%s6797_s9 + $0x24] sm:$0xe] }
  0x3f   : > { %v436_v47 = vor.u32 %v435_v18, %v431_v30  ;;  %v441_v50 = vrot.slane %v439_v35, 5  ;;  %v789_v28 = vsel %vm6962_vm7, %v5411_v36, %v788_v24  ;;  %v6991_v33 = vsel %vm6962_vm7, %v6843_v38, %v798_v56  ;;  %v6544_v35 = vld [vmem:[%s6797_s9 + $0x30] sm:$0xff]  }
  0x40   : > { %v413_v51 = vrot.slane %v412_v6, 4  ;;  %v432_v54 = vsel %vm6848_vm4, %v427_v39, %v431_v30  ;;  %v5420_v55 = vcombine.low %v789_v28, %v792_v20  ;;  %v7001_v17 = vsel %vm6962_vm7, %v5412_v45, %v795_v32  ;;  %v763_v32 = vld [vmem:[%s6797_s9 + $0x30] sm:$0xe]  ;;  %v765_v30 = vld [vmem:[%s6797_s9 + $0x48] sm:$0xe] }
  0x41   : > { %v437_v24 = vrot.slane %v436_v47, 4  ;;  %v5421_v37 = vcombine.low %v7001_v17, %v6991_v33  ;;  %v5413_v38 = vrot.slane %v761_v46, 9  ;;  %v802_v56 = vrot.slane %v6858_v52, 5  ;;  %v5470_v45 = vld [vmem:[%s6797_s9 + $0x10] sm:$0xf] }
  0x42   : > { %v418_v57 = vsel %vm6848_vm4, %v413_v51, %v417_v27  ;;  %6186 = vmatmul.mubr.msk.bf16.vlgmr.msra.gmra.mxu1 %vm469_vm2, %v6542_v43  ;;  %v805_v58 = vrot.slane %v6876_v26, 5  ;;  %v5414_v23 = vrot.slane %v762_v41, 9  ;;  %v809_v59 = vrot.slane %v6866_v62, 5  ;;  %v764_v26 = vld [vmem:[%s6797_s9 + $0x3c] sm:$0xe] }
  0x43   : > { %v5385_v61 = vcombine.low %v408_v31, %v418_v57  ;;  %v442_v63 = vsel %vm6848_vm4, %v437_v24, %v441_v50  ;;  %6220 = vmatpush3.bf16.msra.mxu1 %v6804_v13  ;;  %6189 = vmatprep.mubr.msk.bf16.mxu1 %vm469_vm2, %v6543_v44  ;;  %v7018_v52 = vsel %vm6962_vm7, %v5413_v38, %v802_v56  ;;  %v804_v60 = vrot.slane %v802_v56, 4  ;;  %v766_v31 = vld [vmem:[%s6797_s9 + $0x54] sm:$0xe]  ;;  %v5471_v28 = vld [vmem:[%s6797_s9 + $0x14] sm:$0x1] }
  0x44   : > { %v5386_v5 = vcombine.low %v432_v54, %v442_v63  ;;  %v7023_v62 = vsel %vm6962_vm7, %v5414_v23, %v809_v59  ;;  %v811_v16 = vrot.slane %v809_v59, 4  ;;  %v812_v18 = vrot.slane %v6881_v34, 5  ;;  %6480 = vmatprep.subr.msk.bf16.mxu1 %vm494_vm0, %v6792_v11  ;;  %v5510_v54 = vld [vmem:[%s6797_s9 + $0xc] sm:$0xe]  ;;  %v7078_v38 = vld [vmem:[%s6797_s9 + $0x1c] sm:$0xf] }
  0x45   : > { %6143 = vmatprep.mubr.msk.bf16.mxu0 %vm469_vm2, %v5385_v61  ;;  %v806_v21 = vsel %vm6962_vm7, %v804_v60, %v805_v58  ;;  %v5415_v25 = vrot.slane %v763_v32, 9  ;;  %v816_v27 = vrot.slane %v6893_v53, 5  ;;  %v819_v29 = vrot.slane %v6905_v19, 5  ;;  %v6545_v19 = vld [vmem:[%s6797_s9 + $0x3c] sm:$0xff]   ;;  %v5511_v56 = vld [vmem:[%s6797_s9 + $0x18] sm:$0xe] }
  0x46   : > { %6144 = vmatmul.mubr.msk.bf16.gmra.mxu0 %vm469_vm2, %v5386_v5  ;;  %v5422_v34 = vcombine.low %v7018_v52, %v806_v21  ;;  %v7039_v11 = vsel %vm6962_vm7, %v811_v16, %v812_v18  ;;  %v5416_v36 = vrot.slane %v764_v26, 9  ;;  %v823_v20 = vrot.slane %v6901_v4, 5  ;;  %v5474_v59 = vld [vmem:[%s6797_s9 + $0x20] sm:$0x1]  ;;  %v5469_v60 = vld [vmem:[%s6797_s9 + $0xc] sm:$0xf] }
  0x47   : > { %6167 = vmatprep.mubr.msk.bf16.mxu0 %vm469_vm2, %v5420_v55  ;;  %v5423_v53 = vcombine.low %v7023_v62, %v7039_v11  ;;  %v7049_v6 = vsel %vm6962_vm7, %v5415_v25, %v816_v27  ;;  %v818_v39 = vrot.slane %v816_v27, 4  ;;  %v826_v43 = vrot.slane %v6919_v40, 5  ;;  %v6546_v18 = vld [vmem:[%s6797_s9 + $0x48] sm:$0xff]  }
  0x48   : > { %v7055_v4 = vsel %vm6962_vm7, %v5416_v36, %v823_v20  ;;  %v825_v46 = vrot.slane %v823_v20, 4  ;;  %v5417_v47 = vrot.slane %v765_v30, 9  ;;  %v830_v50 = vrot.slane %v6926_v48, 5  ;;  %v6547_v30 = vld [vmem:[%s6797_s9 + $0x54] sm:$0xff]  }
  0x49   : > { %v7061_v44 = vsel %vm6962_vm7, %v818_v39, %v819_v29  ;;  %v833_v41 = vrot.slane %v6940_v22, 5  ;;  %v5418_v40 = vrot.slane %v766_v31, 9  ;;  %v837_v51 = vrot.slane %v6937_v7, 5 }
  0x4a   : > { %6190 = vmatmul.mubr.msk.bf16.gmra.mxu1 %vm469_vm2, %v6544_v35  ;;  %v5424_v55 = vcombine.low %v7049_v6, %v7061_v44  ;;  %v7071_v48 = vsel %vm6962_vm7, %v825_v46, %v826_v43  ;;  %v7075_v24 = vsel %vm6962_vm7, %v5417_v47, %v830_v50  ;;  %v832_v22 = vrot.slane %v830_v50, 4  ;;  %v5512_v50 = vld [vmem:[%s6797_s9 + $0x24] sm:$0xe] }
  0x4b   : > { %6193 = vmatprep.mubr.msk.bf16.mxu1 %vm469_vm2, %v6545_v19  ;;  %v5425_v7 = vcombine.low %v7055_v4, %v7071_v48  ;;  %v7086_v57 = vsel %vm6962_vm7, %v5418_v40, %v837_v51  ;;  %v839_v58 = vrot.slane %v837_v51, 4  ;;  %v840_v23 = vrot.slane %v6953_v49, 5  ;;  %v7135_v40 = vld [vmem:[%s6797_s9 + $0x28] sm:$0xf] }
  0x4c   : > { %v7092_v32 = vsel %vm6962_vm7, %v832_v22, %v833_v41  ;;  %v5518_v61 = vrot.slane %v5510_v54, 9  ;;  %v1623_v63 = vrot.slane %v5470_v45, 5  ;;  %v1626_v52 = vrot.slane %v5471_v28, 5 }
  0x4d   : > { %v5426_v26 = vcombine.low %v7075_v24, %v7092_v32  ;;  %v7099_v5 = vsel %vm6962_vm7, %v839_v58, %v840_v23  ;;  %v5519_v16 = vrot.slane %v5511_v56, 9  ;;  %v1630_v49 = vrot.slane %v7078_v38, 5  ;;  %v5477_v58 = vld [vmem:[%s6797_s9 + $0x2c] sm:$0x1]  ;;  %v6548_v23 = vld [vmem:[%s6797_s9 + $0x60] sm:$0xff]  }
  0x4e   : > { %6168 = vmatmul.mubr.msk.bf16.vlgmr.msra.gmra.mxu0 %vm469_vm2, %v5421_v37  ;;  %v5427_v21 = vcombine.low %v7086_v57, %v7099_v5  ;;  %v7111_v25 = vsel %vm6962_vm7, %v5518_v61, %v1623_v63  ;;  %v1625_v27 = vrot.slane %v1623_v63, 4  ;;  %v1633_v29 = vrot.slane %v5474_v59, 5 }
  0x4f   : > { %6202 = vmatpush3.bf16.msra.mxu0 %v6801_v12  ;;  %6171 = vmatprep.mubr.msk.bf16.mxu0 %vm469_vm2, %v5422_v34  ;;  %v7118_v33 = vsel %vm6962_vm7, %v5519_v16, %v1630_v49  ;;  %v1632_v17 = vrot.slane %v1630_v49, 4  ;;  %v1232_v37 = vshrl.u32 %v5469_v60, 16  ;;  %v1235_v35 = vshll.u32 %v5469_v60, 16  ;;  %v5472_v34 = vld [vmem:[%s6797_s9 + $0x18] sm:$0xf] }
  0x50   : > { %v1627_v36 = vsel %vm6962_vm7, %v1625_v27, %v1626_v52  ;;  %v1241_v20 = vshll.u32 %v5470_v45, 16  ;;  %v1245_v31 = vshrl.u32 %v5470_v45, 16  ;;  %v1251_v19 = vshll.u32 %v5471_v28, 16  ;;  %6479 = vmatprep.subr.msk.bf16.mxu0 %vm494_vm0, %v6787_v10  ;;  %v7143_v16 = vld [vmem:[%s6797_s9 + $0x34] sm:$0xf] }
  0x51   : > { %v5527_v39 = vcombine.low %v7111_v25, %v1627_v36  ;;  %v7128_v43 = vsel %vm6962_vm7, %v1632_v17, %v1633_v29  ;;  %v1234_v46 = vrot.slane %v1232_v37, 4  ;;  %v1237_v47 = vrot.slane %v1235_v35, 5  ;;  %v5513_v49 = vld [vmem:[%s6797_s9 + $0x30] sm:$0xe] }
  0x52   : > { %6194 = vmatmul.mubr.msk.bf16.gmra.mxu1 %vm469_vm2, %v6546_v18  ;;  %v5528_v45 = vcombine.low %v7118_v33, %v7128_v43  ;;  %v1243_v28 = vrot.slane %v1241_v20, 5  ;;  %v1247_v10 = vrot.slane %v1245_v31, 4  ;;  %v1253_v41 = vrot.slane %v1251_v19, 5 }
  0x53   : > { %6197 = vmatprep.mubr.msk.bf16.mxu1 %vm469_vm2, %v6547_v30  ;;  %v1238_v51 = vor.u32 %v1237_v47, %v1234_v46  ;;  %v1256_v54 = vshrl.u32 %v5472_v34, 16  ;;  %v1259_v22 = vshll.u32 %v5472_v34, 16  ;;  %v1265_v56 = vshll.u32 %v7078_v38, 16  ;;  %v7147_v30 = vld [vmem:[%s6797_s9 + $0x38] sm:$0x1] }
  0x54   : > { %v1248_v61 = vor.u32 %v1247_v10, %v1243_v28  ;;  %v1269_v63 = vshrl.u32 %v7078_v38, 16  ;;  %v1275_v52 = vshll.u32 %v5474_v59, 16  ;;  %v5520_v60 = vrot.slane %v5512_v50, 9  ;;  %v5475_v59 = vld [vmem:[%s6797_s9 + $0x24] sm:$0xf] }
  0x55   : > { %v1239_v18 = vrot.slane %v1238_v51, 4  ;;  %v1258_v25 = vrot.slane %v1256_v54, 4  ;;  %v1261_v27 = vrot.slane %v1259_v22, 5  ;;  %v1267_v29 = vrot.slane %v1265_v56, 5  ;;  %v5478_v56 = vld [vmem:[%s6797_s9 + $0x30] sm:$0xf] }
  0x56   : > { %6172 = vmatmul.mubr.msk.bf16.gmra.mxu0 %vm469_vm2, %v5423_v53  ;;  %v1249_v17 = vrot.slane %v1248_v61, 4  ;;  %v1271_v37 = vrot.slane %v1269_v63, 4  ;;  %v1277_v35 = vrot.slane %v1275_v52, 5  ;;  %v1637_v38 = vrot.slane %v7135_v40, 5 }
  0x57   : > { %6175 = vmatprep.mubr.msk.bf16.mxu0 %vm469_vm2, %v5424_v55  ;;  %v1244_v36 = vsel %vm6848_vm4, %v1239_v18, %v1243_v28  ;;  %v1262_v20 = vor.u32 %v1261_v27, %v1258_v25  ;;  %v1640_v31 = vrot.slane %v5477_v58, 5  ;;  %v5521_v19 = vrot.slane %v5513_v49, 9  ;;  %v7191_v25 = vld [vmem:[%s6797_s9 + $0x40] sm:$0xf]  ;;  %v5514_v27 = vld [vmem:[%s6797_s9 + $0x3c] sm:$0xe] }
  0x58   : > { %v1254_v62 = vsel %vm6848_vm4, %v1249_v17, %v1253_v41  ;;  %v1272_v11 = vor.u32 %v1271_v37, %v1267_v29  ;;  %v1638_v53 = vsel %vm6962_vm7, %v5520_v60, %v1637_v38  ;;  %v1639_v34 = vrot.slane %v1637_v38, 4  ;;  %v7201_v38 = vld [vmem:[%s6797_s9 + $0x44] sm:$0x1] }
  0x59   : > { %v7165_v46 = vcombine.low %v1244_v36, %v1254_v62  ;;  %v1263_v6 = vrot.slane %v1262_v20, 4  ;;  %v1644_v44 = vrot.slane %v7143_v16, 5  ;;  %v1647_v55 = vrot.slane %v7147_v30, 5 }
  0x5a   : > { %6198 = vmatmul.mubr.msk.bf16.gmra.mxu1 %vm469_vm2, %v6548_v23  ;;  %v1273_v47 = vrot.slane %v1272_v11, 4  ;;  %v1641_v50 = vsel %vm6962_vm7, %v1639_v34, %v1640_v31  ;;  %v1280_v28 = vshrl.u32 %v5475_v59, 16  ;;  %v1283_v10 = vshll.u32 %v5475_v59, 16 }
  0x5b   : > { %6221 = vmatprep.mubr.msk.bf16.mxu1 %vm469_vm2, %v5527_v39  ;;  %v1268_v41 = vsel %vm6848_vm4, %v1263_v6, %v1267_v29  ;;  %v5529_v51 = vcombine.low %v1638_v53, %v1641_v50  ;;  %v7177_v54 = vsel %vm6962_vm7, %v5521_v19, %v1644_v44  ;;  %v1646_v22 = vrot.slane %v1644_v44, 4  ;;  %v5515_v19 = vld [vmem:[%s6797_s9 + $0x48] sm:$0xe]  ;;  %v5481_v6 = vld [vmem:[%s6797_s9 + $0x3c] sm:$0xf] }
  0x5c   : > { %v1278_v23 = vsel %vm6848_vm4, %v1273_v47, %v1277_v35  ;;  %v1282_v61 = vrot.slane %v1280_v28, 4  ;;  %v1285_v63 = vrot.slane %v1283_v10, 5  ;;  %v1289_v52 = vshll.u32 %v7135_v40, 16  ;;  %v5484_v10 = vld [vmem:[%s6797_s9 + $0x48] sm:$0xf] }
  0x5d   : > { %v7183_v60 = vcombine.low %v1268_v41, %v1278_v23  ;;  %v7187_v39 = vsel %vm6962_vm7, %v1646_v22, %v1647_v55  ;;  %v1293_v49 = vshrl.u32 %v7135_v40, 16  ;;  %v1299_v18 = vshll.u32 %v5477_v58, 16 }
  0x5e   : > { %6176 = vmatmul.mubr.msk.bf16.gmra.mxu0 %vm469_vm2, %v5425_v7  ;;  %v5530_v29 = vcombine.low %v7177_v54, %v7187_v39  ;;  %v1286_v17 = vor.u32 %v1285_v63, %v1282_v61  ;;  %v1291_v37 = vrot.slane %v1289_v52, 5  ;;  %v1304_v35 = vshrl.u32 %v5478_v56, 16  ;;  %v7209_v7 = vld [vmem:[%s6797_s9 + $0x4c] sm:$0xf] }
  0x5f   : > { %6179 = vmatprep.mubr.msk.bf16.mxu0 %vm469_vm2, %v5426_v26  ;;  %v1295_v40 = vrot.slane %v1293_v49, 4  ;;  %v1301_v58 = vrot.slane %v1299_v18, 5  ;;  %v1307_v4 = vshll.u32 %v5478_v56, 16  ;;  %v1313_v48 = vshll.u32 %v7143_v16, 16  ;;  %v7215_v26 = vld [vmem:[%s6797_s9 + $0x50] sm:$0x1] }
  0x60   : > { %v1287_v59 = vrot.slane %v1286_v17, 4  ;;  %v1306_v36 = vrot.slane %v1304_v35, 4  ;;  %v1317_v20 = vshrl.u32 %v7143_v16, 16  ;;  %v1323_v31 = vshll.u32 %v7147_v30, 16  ;;  %v7259_v35 = vld [vmem:[%s6797_s9 + $0x58] sm:$0xf] }
  0x61   : > { %v1296_v62 = vor.u32 %v1295_v40, %v1291_v37  ;;  %v1309_v24 = vrot.slane %v1307_v4, 5  ;;  %v1315_v32 = vrot.slane %v1313_v48, 5  ;;  %v5522_v11 = vrot.slane %v5514_v27, 9 }
  0x62   : > { %6222 = vmatmul.mubr.msk.bf16.vlgmr.msra.gmra.mxu1 %vm469_vm2, %v5528_v45  ;;  %v1292_v53 = vsel %vm6848_vm4, %v1287_v59, %v1291_v37  ;;  %v1319_v34 = vrot.slane %v1317_v20, 4  ;;  %v1325_v16 = vrot.slane %v1323_v31, 5  ;;  %v1651_v30 = vrot.slane %v7191_v25, 5  ;;  %v7263_v59 = vld [vmem:[%s6797_s9 + $0x5c] sm:$0x1] }
  0x63   : > { %6256 = vmatpush3.bf16.msra.mxu1 %v6812_v15  ;;  %6225 = vmatprep.mubr.msk.bf16.mxu1 %vm469_vm2, %v5529_v51  ;;  %v1297_v44 = vrot.slane %v1296_v62, 4  ;;  %v1310_v55 = vor.u32 %v1309_v24, %v1306_v36  ;;  %v1654_v47 = vrot.slane %v7201_v38, 5  ;;  %v5523_v33 = vrot.slane %v5515_v19, 9  ;;  %v5517_v19 = vld [vmem:[%s6797_s9 + $0x60] sm:$0xe] }
  0x64   : > { %v1320_v43 = vor.u32 %v1319_v34, %v1315_v32  ;;  %v1652_v45 = vsel %vm6962_vm7, %v5522_v11, %v1651_v30  ;;  %v1653_v50 = vrot.slane %v1651_v30, 4  ;;  %v1658_v28 = vrot.slane %v7209_v7, 5  ;;  %6482 = vmatprep.subr.msk.bf16.mxu1 %vm494_vm0, %v6746_v1 }
  0x65   : > { %v1302_v41 = vsel %vm6848_vm4, %v1297_v44, %v1301_v58  ;;  %v1311_v51 = vrot.slane %v1310_v55, 4  ;;  %v1661_v54 = vrot.slane %v7215_v26, 5  ;;  %v1328_v22 = vshrl.u32 %v5481_v6, 16 }
  0x66   : > { %6180 = vmatmul.mubr.msk.bf16.gmra.mxu0 %vm469_vm2, %v5427_v21  ;;  %v5496_v56 = vcombine.low %v1292_v53, %v1302_v41  ;;  %v1321_v23 = vrot.slane %v1320_v43, 4  ;;  %v1655_v61 = vsel %vm6962_vm7, %v1653_v50, %v1654_v47  ;;  %v1659_v1 = vsel %vm6962_vm7, %v5523_v33, %v1658_v28  ;;  %v7277_v53 = vld [vmem:[%s6797_s9 + $0x64] sm:$0xf]  ;;  %v5492_v50 = vld [vmem:[%s6797_s9 + $0x68] sm:$0x1] }
  0x67   : > { %6203 = vmatprep.mubr.msk.bf16.mxu0 %vm469_vm2, %v7165_v46  ;;  %v1316_v63 = vsel %vm6848_vm4, %v1311_v51, %v1315_v32  ;;  %v5531_v52 = vcombine.low %v1652_v45, %v1655_v61  ;;  %v1660_v39 = vrot.slane %v1658_v28, 4  ;;  %v1330_v57 = vrot.slane %v1328_v22, 4  ;;  %v5487_v28 = vld [vmem:[%s6797_s9 + $0x54] sm:$0xf] }
  0x68   : > { %v1326_v5 = vsel %vm6848_vm4, %v1321_v23, %v1325_v16  ;;  %v1331_v21 = vshll.u32 %v5481_v6, 16  ;;  %v1337_v49 = vshll.u32 %v7191_v25, 16  ;;  %v1341_v18 = vshrl.u32 %v7191_v25, 16  ;;  %v5516_v25 = vld [vmem:[%s6797_s9 + $0x54] sm:$0xe] }
  0x69   : > { %v7253_v27 = vcombine.low %v1316_v63, %v1326_v5  ;;  %v1662_v46 = vsel %vm6962_vm7, %v1660_v39, %v1661_v54  ;;  %v1347_v17 = vshll.u32 %v7201_v38, 16  ;;  %v1352_v37 = vshrl.u32 %v5484_v10, 16 }
  0x6a   : > { %6226 = vmatmul.mubr.msk.bf16.gmra.mxu1 %vm469_vm2, %v5530_v29  ;;  %v5532_v40 = vcombine.low %v1659_v1, %v1662_v46  ;;  %v1333_v58 = vrot.slane %v1331_v21, 5  ;;  %v1339_v4 = vrot.slane %v1337_v49, 5  ;;  %v1343_v48 = vrot.slane %v1341_v18, 4  ;;  %v7272_v29 = vld [vmem:[%s9111_s1 + $0x10] sm:$0x3] }
  0x6b   : > { %6229 = vmatprep.mubr.msk.bf16.mxu1 %vm469_vm2, %v5531_v52  ;;  %v1349_v36 = vrot.slane %v1347_v17, 5  ;;  %v1354_v20 = vrot.slane %v1352_v37, 4  ;;  %v1355_v31 = vshll.u32 %v5484_v10, 16  ;;  %v1361_v38 = vshll.u32 %v7209_v7, 16  ;;  %v5490_v49 = vld [vmem:[%s6797_s9 + $0x60] sm:$0xf] }
  0x6c   : > { %v1334_v62 = vor.u32 %v1333_v58, %v1330_v57  ;;  %v1344_v24 = vor.u32 %v1343_v48, %v1339_v4  ;;  %v1365_v32 = vshrl.u32 %v7209_v7, 16  ;;  %v1371_v11 = vshll.u32 %v7215_v26, 16 }
  0x6d   : > { %v1357_v34 = vrot.slane %v1355_v31, 5  ;;  %v1363_v16 = vrot.slane %v1361_v38, 5  ;;  %v5524_v30 = vrot.slane %v5516_v25, 9  ;;  %v1665_v6 = vrot.slane %v7259_v35, 5  ;;  %v5576_v38 = vld [vmem:[%s6797_s9 + $0x18] sm:$0xf] }
  0x6e   : > { %6204 = vmatmul.mubr.msk.bf16.vlgmr.msra.gmra.mxu0 %vm469_vm2, %v7183_v60  ;;  %v1335_v44 = vrot.slane %v1334_v62, 4  ;;  %v1345_v55 = vrot.slane %v1344_v24, 4  ;;  %v1367_v47 = vrot.slane %v1365_v32, 4  ;;  %v1373_v33 = vrot.slane %v1371_v11, 5 }
  0x6f   : > { %6238 = vmatpush3.bf16.msra.mxu0 %v6808_v14  ;;  %6207 = vmatprep.mubr.msk.bf16.mxu0 %vm469_vm2, %v5496_v56  ;;  %v1358_v7 = vor.u32 %v1357_v34, %v1354_v20  ;;  %v1666_v26 = vsel %vm6962_vm7, %v5524_v30, %v1665_v6  ;;  %v1667_v43 = vrot.slane %v1665_v6, 4  ;;  %v1668_v45 = vrot.slane %v7263_v59, 5 }
  0x70   : > { %v1340_v60 = vsel %vm6848_vm4, %v1335_v44, %v1339_v4  ;;  %v1350_v10 = vsel %vm6848_vm4, %v1345_v55, %v1349_v36  ;;  %v1368_v41 = vor.u32 %v1367_v47, %v1363_v16  ;;  %v5525_v51 = vrot.slane %v5517_v19, 9  ;;  %6481 = vmatprep.subr.msk.bf16.mxu0 %vm494_vm0, %v7272_v29 }
  0x71   : > { %v5498_v54 = vcombine.low %v1340_v60, %v1350_v10  ;;  %v1359_v22 = vrot.slane %v1358_v7, 4  ;;  %v1669_v56 = vsel %vm6962_vm7, %v1667_v43, %v1668_v45  ;;  %v1672_v23 = vrot.slane %v7277_v53, 5  ;;  %v7323_v7 = vld [vmem:[%s6797_s9 + $0x20] sm:$0x1] }
  0x72   : > { %6230 = vmatmul.mubr.msk.bf16.gmra.mxu1 %vm469_vm2, %v5532_v40  ;;  %v1369_v61 = vrot.slane %v1368_v41, 4  ;;  %v5533_v1 = vcombine.low %v1666_v26, %v1669_v56  ;;  %v1675_v63 = vrot.slane %v5492_v50, 5  ;;  %v1376_v52 = vshrl.u32 %v5487_v28, 16 }
  0x73   : > { %v1364_v39 = vsel %vm6848_vm4, %v1359_v22, %v1363_v16  ;;  %v1673_v57 = vsel %vm6962_vm7, %v5525_v51, %v1672_v23  ;;  %v1674_v5 = vrot.slane %v1672_v23, 4  ;;  %v1379_v21 = vshll.u32 %v5487_v28, 16  ;;  %v5579_v28 = vld [vmem:[%s6797_s9 + $0x24] sm:$0xf] }
  0x74   : > { %v1374_v18 = vsel %vm6848_vm4, %v1369_v61, %v1373_v33  ;;  %6233 = vmatprep.mubr.msk.bf16.mxu1 %vm469_vm2, %v5533_v1  ;;  %v1378_v46 = vrot.slane %v1376_v52, 4  ;;  %v1385_v17 = vshll.u32 %v7259_v35, 16  ;;  %v1389_v37 = vshrl.u32 %v7259_v35, 16 }
  0x75   : > { %v5499_v40 = vcombine.low %v1364_v39, %v1374_v18  ;;  %v1676_v58 = vsel %vm6962_vm7, %v1674_v5, %v1675_v63  ;;  %v1381_v4 = vrot.slane %v1379_v21, 5  ;;  %v1395_v48 = vshll.u32 %v7263_v59, 16  ;;  %v7341_v21 = vld [vmem:[%s6797_s9 + $0x2c] sm:$0x1] }
  0x76   : > { %6208 = vmatmul.mubr.msk.bf16.gmra.mxu0 %vm469_vm2, %v7253_v27  ;;  %v5534_v25 = vcombine.low %v1673_v57, %v1676_v58  ;;  %v1387_v36 = vrot.slane %v1385_v17, 5  ;;  %v1391_v20 = vrot.slane %v1389_v37, 4  ;;  %v1400_v31 = vshrl.u32 %v5490_v49, 16  ;;  %v7319_v27 = vld [vmem:[%s6797_s9 + $0x1c] sm:$0xf] }
  0x77   : > { %6211 = vmatprep.mubr.msk.bf16.mxu0 %vm469_vm2, %v5498_v54  ;;  %v1382_v19 = vor.u32 %v1381_v4, %v1378_v46  ;;  %v1397_v35 = vrot.slane %v1395_v48, 5  ;;  %v1403_v62 = vshll.u32 %v5490_v49, 16  ;;  %v1409_v24 = vshll.u32 %v7277_v53, 16  ;;  %v7333_v54 = vld [vmem:[%s6797_s9 + $0x28] sm:$0xf] }
  0x78   : > { %v1392_v32 = vor.u32 %v1391_v20, %v1387_v36  ;;  %v1402_v11 = vrot.slane %v1400_v31, 4  ;;  %v1413_v59 = vshrl.u32 %v7277_v53, 16  ;;  %v1419_v34 = vshll.u32 %v5492_v50, 16  ;;  %v5582_v58 = vld [vmem:[%s6797_s9 + $0x30] sm:$0xf] }
  0x79   : > { %v1383_v16 = vrot.slane %v1382_v19, 4  ;;  %v1405_v30 = vrot.slane %v1403_v62, 5  ;;  %v1411_v6 = vrot.slane %v1409_v24, 5  ;;  %v2067_v44 = vshrl.u32 %v5576_v38, 16  ;;  %v7349_v20 = vld [vmem:[%s6797_s9 + $0x34] sm:$0xf] }
  0x7a   : > { %6234 = vmatmul.mubr.msk.bf16.gmra.mxu1 %vm469_vm2, %v5534_v25  ;;  %v1393_v55 = vrot.slane %v1392_v32, 4  ;;  %v1415_v47 = vrot.slane %v1413_v59, 4  ;;  %v1421_v33 = vrot.slane %v1419_v34, 5  ;;  %v2070_v26 = vshll.u32 %v5576_v38, 16  ;;  %v6549_v32 = vld [vmem:[%s6797_s9 + $0x18] sm:$0xff]  }
  0x7b   : > { %v1388_v53 = vsel %vm6848_vm4, %v1383_v16, %v1387_v36  ;;  %v1406_v43 = vor.u32 %v1405_v30, %v1402_v11  ;;  %v2069_v45 = vrot.slane %v2067_v44, 4  ;;  %v2076_v50 = vshll.u32 %v7319_v27, 16  ;;  %v7360_v11 = vld [vmem:[%s6797_s9 + $0x38] sm:$0x1] }
  0x7c   : > { %v1398_v60 = vsel %vm6848_vm4, %v1393_v55, %v1397_v35  ;;  %v1416_v10 = vor.u32 %v1415_v47, %v1411_v6  ;;  %v2072_v41 = vrot.slane %v2070_v26, 5  ;;  %v2080_v51 = vshrl.u32 %v7319_v27, 16  ;;  %v5585_v55 = vld [vmem:[%s6797_s9 + $0x3c] sm:$0xf] }
  0x7d   : > { %v5500_v22 = vcombine.low %v1388_v53, %v1398_v60  ;;  %v1407_v56 = vrot.slane %v1406_v43, 4  ;;  %v2078_v23 = vrot.slane %v2076_v50, 5  ;;  %v2086_v61 = vshll.u32 %v7323_v7, 16  ;;  %v7368_v53 = vld [vmem:[%s6797_s9 + $0x40] sm:$0xf] }
  0x7e   : > { %6212 = vmatmul.mubr.msk.bf16.gmra.mxu0 %vm469_vm2, %v5499_v40  ;;  %v1417_v1 = vrot.slane %v1416_v10, 4  ;;  %v2073_v63 = vor.u32 %v2072_v41, %v2069_v45  ;;  %v2082_v52 = vrot.slane %v2080_v51, 4  ;;  %v2091_v39 = vshrl.u32 %v5579_v28, 16 }
  0x7f   : > { %6215 = vmatprep.mubr.msk.bf16.mxu0 %vm469_vm2, %v5500_v22  ;;  %v1412_v57 = vsel %vm6848_vm4, %v1407_v56, %v1411_v6  ;;  %v2088_v5 = vrot.slane %v2086_v61, 5  ;;  %v2094_v49 = vshll.u32 %v5579_v28, 16  ;;  %v2100_v18 = vshll.u32 %v7333_v54, 16  ;;  %v7377_v61 = vld [vmem:[%s6797_s9 + $0x44] sm:$0x1] }
  0x80   : > { %v1422_v46 = vsel %vm6848_vm4, %v1417_v1, %v1421_v33  ;;  %v2074_v17 = vrot.slane %v2073_v63, 4  ;;  %v2083_v37 = vor.u32 %v2082_v52, %v2078_v23  ;;  %v2093_v40 = vrot.slane %v2091_v39, 4  ;;  %v5588_v63 = vld [vmem:[%s6797_s9 + $0x48] sm:$0xf] }
  0x81   : > { %v5501_v4 = vcombine.low %v1412_v57, %v1422_v46  ;;  %v2096_v48 = vrot.slane %v2094_v49, 5  ;;  %v2102_v25 = vrot.slane %v2100_v18, 5  ;;  %v2104_v36 = vshrl.u32 %v7333_v54, 16  ;;  %v7385_v49 = vld [vmem:[%s6797_s9 + $0x4c] sm:$0xf]  ;;  %v6550_v46 = vld [vmem:[%s6797_s9 + $0x24] sm:$0xff]  }
  0x82   : > { %v2079_v31 = vsel %vm6848_vm4, %v2074_v17, %v2078_v23  ;;  %v2084_v38 = vrot.slane %v2083_v37, 4  ;;  %v2110_v19 = vshll.u32 %v7341_v21, 16  ;;  %v7356_v35 = vsel %vm494_vm0, %v7272_v29, 0 }
  0x83   : > { %v2097_v62 = vor.u32 %v2096_v48, %v2093_v40  ;;  %v2106_v24 = vrot.slane %v2104_v36, 4  ;;  %v2115_v59 = vshrl.u32 %v5582_v58, 16  ;;  %v2118_v34 = vshll.u32 %v5582_v58, 16 }
  0x84   : > { %v2089_v16 = vsel %vm6848_vm4, %v2084_v38, %v2088_v5  ;;  %v2112_v30 = vrot.slane %v2110_v19, 5  ;;  %v2124_v6 = vshll.u32 %v7349_v20, 16  ;;  %v2128_v44 = vshrl.u32 %v7349_v20, 16  ;;  %v7396_v19 = vld [vmem:[%s6797_s9 + $0x50] sm:$0x1] }
  0x85   : > { %v5601_v47 = vcombine.low %v2079_v31, %v2089_v16  ;;  %v2098_v29 = vrot.slane %v2097_v62, 4  ;;  %v2107_v33 = vor.u32 %v2106_v24, %v2102_v25  ;;  %v2117_v26 = vrot.slane %v2115_v59, 4 }
  0x86   : > { %6216 = vmatmul.mubr.msk.bf16.gmra.mxu0 %vm469_vm2, %v5501_v4  ;;  %v2120_v43 = vrot.slane %v2118_v34, 5  ;;  %v2126_v45 = vrot.slane %v2124_v6, 5  ;;  %v2130_v50 = vrot.slane %v2128_v44, 4  ;;  %v2134_v28 = vshll.u32 %v7360_v11, 16  ;;  %v7402_v6 = vld [vmem:[%s6797_s9 + $0x58] sm:$0xf] }
  0x87   : > { %6257 = vmatprep.mubr.msk.bf16.mxu1 %vm469_vm2, %v5601_v47  ;;  %v2103_v60 = vsel %vm6848_vm4, %v2098_v29, %v2102_v25  ;;  %v2108_v10 = vrot.slane %v2107_v33, 4  ;;  %6239 = vmatprep.mubr.msk.bf16.mxu0 %vm469_vm2, %v6549_v32  ;;  %v2139_v41 = vshrl.u32 %v5585_v55, 16  ;;  %v2142_v51 = vshll.u32 %v5585_v55, 16  ;;  %v6551_v25 = vld [vmem:[%s6797_s9 + $0x30] sm:$0xff]   ;;  %v7407_v33 = vld [vmem:[%s6797_s9 + $0x5c] sm:$0x1] }
  0x88   : > { %v2121_v22 = vor.u32 %v2120_v43, %v2117_v26  ;;  %v2131_v56 = vor.u32 %v2130_v50, %v2126_v45  ;;  %v2136_v23 = vrot.slane %v2134_v28, 5  ;;  %v2148_v1 = vshll.u32 %v7368_v53, 16  ;;  %v5591_v32 = vld [vmem:[%s6797_s9 + $0x54] sm:$0xf]  ;;  %v5594_v28 = vld [vmem:[%s6797_s9 + $0x60] sm:$0xf] }
  0x89   : > { %v2113_v52 = vsel %vm6848_vm4, %v2108_v10, %v2112_v30  ;;  %v2141_v39 = vrot.slane %v2139_v41, 4  ;;  %v2144_v57 = vrot.slane %v2142_v51, 5  ;;  %v2152_v5 = vshrl.u32 %v7368_v53, 16 }
  0x8a   : > { %v5602_v18 = vcombine.low %v2103_v60, %v2113_v52  ;;  %v2122_v17 = vrot.slane %v2121_v22, 4  ;;  %v2132_v37 = vrot.slane %v2131_v56, 4  ;;  %v2150_v40 = vrot.slane %v2148_v1, 5  ;;  %v6552_v60 = vld [vmem:[%s6797_s9 + $0x3c] sm:$0xff]   ;;  %v7423_v56 = vld [vmem:[%s6797_s9 + $0x64] sm:$0xf] }
  0x8b   : > { %v2145_v58 = vor.u32 %v2144_v57, %v2141_v39  ;;  %v2154_v4 = vrot.slane %v2152_v5, 4  ;;  %v2158_v48 = vshll.u32 %v7377_v61, 16  ;;  %v2163_v36 = vshrl.u32 %v5588_v63, 16  ;;  %v6553_v57 = vld [vmem:[%s6797_s9 + $0x48] sm:$0xff]  }
  0x8c   : > { %6258 = vmatmul.mubr.msk.bf16.vlgmr.msra.gmra.mxu1 %vm469_vm2, %v5602_v18  ;;  %v2127_v31 = vsel %vm6848_vm4, %v2122_v17, %v2126_v45  ;;  %v2137_v38 = vsel %vm6848_vm4, %v2132_v37, %v2136_v23  ;;  %v2166_v62 = vshll.u32 %v5588_v63, 16  ;;  %v2172_v24 = vshll.u32 %v7385_v49, 16  ;;  %v6590_v23 = vld [vmem:[%s9111_s1] sm:$0x3] }
  0x8d   : > { %6292 = vmatpush3.bf16.msra.mxu1 %v6757_v3  ;;  %v5603_v59 = vcombine.low %v2127_v31, %v2137_v38  ;;  %v2146_v34 = vrot.slane %v2145_v58, 4  ;;  %v2155_v16 = vor.u32 %v2154_v4, %v2150_v40  ;;  %v2160_v30 = vrot.slane %v2158_v48, 5  ;;  %v6589_v3 = vld [vmem:[%s9111_s1 + $0x4] sm:$0x3]  ;;  %v7438_v31 = vld [vmem:[%s6797_s9 + $0x68] sm:$0x1] }
  0x8e   : > { %6240 = vmatmul.mubr.msk.bf16.vlgmr.msra.gmra.mxu0 %vm469_vm2, %v6550_v46  ;;  %v2165_v44 = vrot.slane %v2163_v36, 4  ;;  %v2168_v55 = vrot.slane %v2166_v62, 5  ;;  %v2174_v47 = vrot.slane %v2172_v24, 5  ;;  %v2176_v29 = vshrl.u32 %v7385_v49, 16  ;;  %6484 = vmatprep.subr.msk.bf16.mxu1 %vm494_vm0, %v6589_v3  ;;  %v5597_v62 = vld [vmem:[%s6797_s9 + $0x6c] sm:$0xf] }
  0x8f   : > { %6274 = vmatpush3.bf16.msra.mxu0 %v7356_v35  ;;  %6261 = vmatprep.mubr.msk.bf16.mxu1 %vm469_vm2, %v5603_v59  ;;  %v2151_v26 = vsel %vm6848_vm4, %v2146_v34, %v2150_v40  ;;  %v2156_v43 = vrot.slane %v2155_v16, 4  ;;  %v2182_v45 = vshll.u32 %v7396_v19, 16  ;;  %v2187_v50 = vshrl.u32 %v5591_v32, 16  ;;  %v7443_v16 = vld [vmem:[%s6797_s9 + $0x70] sm:$0xf] }
  0x90   : > { %6243 = vmatprep.mubr.msk.bf16.mxu0 %vm469_vm2, %v6551_v25  ;;  %v2169_v10 = vor.u32 %v2168_v55, %v2165_v44  ;;  %v2178_v41 = vrot.slane %v2176_v29, 4  ;;  %v2190_v51 = vshll.u32 %v5591_v32, 16  ;;  %v2196_v22 = vshll.u32 %v7402_v6, 16  ;;  %6483 = vmatprep.subr.msk.bf16.mxu0 %vm494_vm0, %v6590_v23  ;;  %v7450_v29 = vld [vmem:[%s6797_s9 + $0x74] sm:$0x1] }
  0x91   : > { %v2161_v1 = vsel %vm6848_vm4, %v2156_v43, %v2160_v30  ;;  %v2184_v63 = vrot.slane %v2182_v45, 5  ;;  %v2189_v52 = vrot.slane %v2187_v50, 4  ;;  %v2200_v39 = vshrl.u32 %v7402_v6, 16  ;;  %v7455_v50 = vld [vmem:[%s6797_s9 + $0x60] sm:$0xf]  ;;  %v6554_v23 = vld [vmem:[%s6797_s9 + $0x54] sm:$0xff]  }
  0x92   : > { %v5604_v5 = vcombine.low %v2151_v26, %v2161_v1  ;;  %v2170_v18 = vrot.slane %v2169_v10, 4  ;;  %v2179_v46 = vor.u32 %v2178_v41, %v2174_v47  ;;  %v2192_v17 = vrot.slane %v2190_v51, 5  ;;  %v7460_v51 = vld [vmem:[%s6797_s9 + $0x64] sm:$0xf] }
  0x93   : > { %v2198_v37 = vrot.slane %v2196_v22, 5  ;;  %v2202_v40 = vrot.slane %v2200_v39, 4  ;;  %v2206_v58 = vshll.u32 %v7407_v33, 16  ;;  %v2211_v4 = vshrl.u32 %v5594_v28, 16 }
  0x94   : > { %6262 = vmatmul.mubr.msk.bf16.gmra.mxu1 %vm469_vm2, %v5604_v5  ;;  %v2175_v48 = vsel %vm6848_vm4, %v2170_v18, %v2174_v47  ;;  %v2180_v25 = vrot.slane %v2179_v46, 4  ;;  %v2193_v36 = vor.u32 %v2192_v17, %v2189_v52  ;;  %v2214_v38 = vshll.u32 %v5594_v28, 16 }
  0x95   : > { %v2203_v24 = vor.u32 %v2202_v40, %v2198_v37  ;;  %v2208_v32 = vrot.slane %v2206_v58, 5  ;;  %v2213_v59 = vrot.slane %v2211_v4, 4  ;;  %v2220_v34 = vshll.u32 %v7423_v56, 16  ;;  %v6555_v58 = vld [vmem:[%s6797_s9 + $0x60] sm:$0xff]  }
  0x96   : > { %6244 = vmatmul.mubr.msk.bf16.gmra.mxu0 %vm469_vm2, %v6552_v60  ;;  %v2185_v30 = vsel %vm6848_vm4, %v2180_v25, %v2184_v63  ;;  %v2194_v44 = vrot.slane %v2193_v36, 4  ;;  %v2216_v55 = vrot.slane %v2214_v38, 5  ;;  %v2224_v47 = vshrl.u32 %v7423_v56, 16  ;;  %v7474_v25 = vld [vmem:[%s6797_s9 + $0x68] sm:$0x1] }
  0x97   : > { %v5605_v3 = vcombine.low %v2175_v48, %v2185_v30  ;;  %v2204_v26 = vrot.slane %v2203_v24, 4  ;;  %6247 = vmatprep.mubr.msk.bf16.mxu0 %vm469_vm2, %v6553_v57  ;;  %v2222_v43 = vrot.slane %v2220_v34, 5  ;;  %v2230_v45 = vshll.u32 %v7438_v31, 16  ;;  %v7480_v34 = vld [vmem:[%s6797_s9 + $0x6c] sm:$0xf] }
  0x98   : > { %v2199_v28 = vsel %vm6848_vm4, %v2194_v44, %v2198_v37  ;;  %v2217_v60 = vor.u32 %v2216_v55, %v2213_v59  ;;  %v2226_v10 = vrot.slane %v2224_v47, 4  ;;  %v2235_v41 = vshrl.u32 %v5597_v62, 16 }
  0x99   : > { %6265 = vmatprep.mubr.msk.bf16.mxu1 %vm469_vm2, %v5605_v3  ;;  %v2209_v22 = vsel %vm6848_vm4, %v2204_v26, %v2208_v32  ;;  %v2232_v1 = vrot.slane %v2230_v45, 5  ;;  %v2238_v63 = vshll.u32 %v5597_v62, 16  ;;  %v2244_v52 = vshll.u32 %v7443_v16, 16  ;;  %v7487_v3 = vld [vmem:[%s6797_s9 + $0x70] sm:$0xf] }
  0x9a   : > { %v5606_v39 = vcombine.low %v2199_v28, %v2209_v22  ;;  %v2218_v57 = vrot.slane %v2217_v60, 4  ;;  %v2227_v5 = vor.u32 %v2226_v10, %v2222_v43  ;;  %v2237_v18 = vrot.slane %v2235_v41, 4  ;;  %v7491_v60 = vld [vmem:[%s6797_s9 + $0x74] sm:$0x1] }
  0x9b   : > { %v2240_v46 = vrot.slane %v2238_v63, 5  ;;  %v2246_v17 = vrot.slane %v2244_v52, 5  ;;  %v2248_v37 = vshrl.u32 %v7443_v16, 16  ;;  %v2254_v40 = vshll.u32 %v7450_v29, 16 }
  0x9c   : > { %6266 = vmatmul.mubr.msk.bf16.gmra.mxu1 %vm469_vm2, %v5606_v39  ;;  %v2223_v4 = vsel %vm6848_vm4, %v2218_v57, %v2222_v43  ;;  %v2228_v48 = vrot.slane %v2227_v5, 4  ;;  %v2765_v36 = vshrl.u32 %v7455_v50, 16  ;;  %v2768_v38 = vshll.u32 %v7455_v50, 16  ;;  %v5618_v5 = vld [vmem:[%s6797_s9 + $0x24] sm:$0xe] }
  0x9d   : > { %v2241_v62 = vor.u32 %v2240_v46, %v2237_v18  ;;  %v2250_v24 = vrot.slane %v2248_v37, 4  ;;  %v2256_v32 = vrot.slane %v2254_v40, 5  ;;  %v2774_v59 = vshll.u32 %v7460_v51, 16  ;;  %v6556_v18 = vld [vmem:[%s6797_s9 + $0x6c] sm:$0xff]  }
  0x9e   : > { %6248 = vmatmul.mubr.msk.bf16.gmra.mxu0 %vm469_vm2, %v6554_v23  ;;  %v2233_v30 = vsel %vm6848_vm4, %v2228_v48, %v2232_v1  ;;  %v2767_v44 = vrot.slane %v2765_v36, 4  ;;  %v2770_v55 = vrot.slane %v2768_v38, 5  ;;  %v2778_v47 = vshrl.u32 %v7460_v51, 16  ;;  %v5617_v1 = vld [vmem:[%s6797_s9 + $0x18] sm:$0xe] }
  0x9f   : > { %v5607_v26 = vcombine.low %v2223_v4, %v2233_v30  ;;  %v2242_v43 = vrot.slane %v2241_v62, 4  ;;  %v2251_v45 = vor.u32 %v2250_v24, %v2246_v17  ;;  %6251 = vmatprep.mubr.msk.bf16.mxu0 %vm469_vm2, %v6555_v58  ;;  %v2776_v28 = vrot.slane %v2774_v59, 5 }
  0xa0   : > { %v2771_v10 = vor.u32 %v2770_v55, %v2767_v44  ;;  %v2780_v41 = vrot.slane %v2778_v47, 4  ;;  %v2784_v22 = vshll.u32 %v7474_v25, 16  ;;  %v2789_v23 = vshrl.u32 %v7480_v34, 16 }
  0xa1   : > { %6269 = vmatprep.mubr.msk.bf16.mxu1 %vm469_vm2, %v5607_v26  ;;  %v2247_v63 = vsel %vm6848_vm4, %v2242_v43, %v2246_v17  ;;  %v2252_v52 = vrot.slane %v2251_v45, 4  ;;  %v2792_v39 = vshll.u32 %v7480_v34, 16  ;;  %v2798_v57 = vshll.u32 %v7487_v3, 16  ;;  %v7511_v26 = vld [vmem:[%s6797_s9 + $0x78] sm:$0xf] }
  0xa2   : > { %v2772_v46 = vrot.slane %v2771_v10, 4  ;;  %v2781_v37 = vor.u32 %v2780_v41, %v2776_v28  ;;  %v2786_v40 = vrot.slane %v2784_v22, 5  ;;  %v2791_v58 = vrot.slane %v2789_v23, 4  ;;  %v7519_v10 = vld [vmem:[%s6797_s9 + $0x7c] sm:$0xf] }
  0xa3   : > { %v2257_v4 = vsel %vm6848_vm4, %v2252_v52, %v2256_v32  ;;  %v2794_v48 = vrot.slane %v2792_v39, 5  ;;  %v2800_v36 = vrot.slane %v2798_v57, 5  ;;  %v2802_v38 = vshrl.u32 %v7487_v3, 16  ;;  %v7530_v57 = vld [vmem:[%s6797_s9 + $0x84] sm:$0xf] }
  0xa4   : > { %v5608_v17 = vcombine.low %v2247_v63, %v2257_v4  ;;  %v2777_v62 = vsel %vm6848_vm4, %v2772_v46, %v2776_v28  ;;  %v2782_v24 = vrot.slane %v2781_v37, 4  ;;  %v2808_v59 = vshll.u32 %v7491_v60, 16 }
  0xa5   : > { %v2795_v30 = vor.u32 %v2794_v48, %v2791_v58  ;;  %v2804_v44 = vrot.slane %v2802_v38, 4  ;;  %v5625_v55 = vrot.slane %v5617_v1, 9  ;;  %v2458_v47 = vrot.slane %v7319_v27, 5  ;;  %v7524_v1 = vld [vmem:[%s6797_s9 + $0x80] sm:$0x1] }
  0xa6   : > { %6270 = vmatmul.mubr.msk.bf16.gmra.mxu1 %vm469_vm2, %v5608_v17  ;;  %6252 = vmatmul.mubr.msk.bf16.gmra.mxu0 %vm469_vm2, %v6556_v18  ;;  %v2787_v32 = vsel %vm6848_vm4, %v2782_v24, %v2786_v40  ;;  %v2810_v43 = vrot.slane %v2808_v59, 5  ;;  %v2461_v45 = vrot.slane %v7323_v7, 5  ;;  %v5626_v28 = vrot.slane %v5618_v5, 9  ;;  %v7538_v40 = vld [vmem:[%s6797_s9 + $0x88] sm:$0xf] }
  0xa7   : > { %v5675_v41 = vcombine.low %v2777_v62, %v2787_v32  ;;  %v2796_v22 = vrot.slane %v2795_v30, 4  ;;  %v2805_v27 = vor.u32 %v2804_v44, %v2800_v36  ;;  %v2459_v23 = vsel %vm6962_vm7, %v5625_v55, %v2458_v47  ;;  %v7545_v48 = vld [vmem:[%s6797_s9 + $0x8c] sm:$0x1] }
  0xa8   : > { %v2460_v63 = vrot.slane %v2458_v47, 4  ;;  %v2465_v52 = vrot.slane %v7333_v54, 5  ;;  %v2468_v39 = vrot.slane %v7341_v21, 5  ;;  %v2813_v7 = vshrl.u32 %v7511_v26, 16 }
  0xa9   : > { %6293 = vmatprep.mubr.msk.bf16.mxu1 %vm469_vm2, %v5675_v41  ;;  %v2801_v5 = vsel %vm6848_vm4, %v2796_v22, %v2800_v36  ;;  %v2806_v18 = vrot.slane %v2805_v27, 4  ;;  %v2816_v46 = vshll.u32 %v7511_v26, 16  ;;  %v2822_v37 = vshll.u32 %v7519_v10, 16 }
  0xaa   : > { %v2462_v54 = vsel %vm6962_vm7, %v2460_v63, %v2461_v45  ;;  %v2466_v21 = vsel %vm6962_vm7, %v5626_v28, %v2465_v52  ;;  %v2467_v58 = vrot.slane %v2465_v52, 4  ;;  %v2815_v4 = vrot.slane %v2813_v7, 4  ;;  %v5620_v28 = vld [vmem:[%s6797_s9 + $0x3c] sm:$0xe] }
  0xab   : > { %v2811_v36 = vsel %vm6848_vm4, %v2806_v18, %v2810_v43  ;;  %v5634_v38 = vcombine.low %v2459_v23, %v2462_v54  ;;  %v2818_v17 = vrot.slane %v2816_v46, 5  ;;  %v2824_v62 = vrot.slane %v2822_v37, 5  ;;  %v5619_v43 = vld [vmem:[%s6797_s9 + $0x30] sm:$0xe]  ;;  %v6591_v54 = vld [vmem:[%s9111_s1 + $0x8] sm:$0x3] }
  0xac   : > { %v5676_v24 = vcombine.low %v2801_v5, %v2811_v36  ;;  %v2469_v59 = vsel %vm6962_vm7, %v2467_v58, %v2468_v39  ;;  %v2826_v30 = vshrl.u32 %v7519_v10, 16  ;;  %v2832_v44 = vshll.u32 %v7524_v1, 16  ;;  %v6592_v36 = vld [vmem:[%s9111_s1 + $0x6] sm:$0x3] }
  0xad   : > { %6275 = vmatprep.mubr.msk.bf16.mxu0 %vm469_vm2, %v5634_v38  ;;  %v5635_v55 = vcombine.low %v2466_v21, %v2469_v59  ;;  %v2819_v47 = vor.u32 %v2818_v17, %v2815_v4  ;;  %v2837_v32 = vshrl.u32 %v7530_v57, 16  ;;  %v2840_v45 = vshll.u32 %v7530_v57, 16  ;;  %v7573_v4 = vld [vmem:[%s6797_s9 + $0x90] sm:$0xf] }
  0xae   : > { %6294 = vmatmul.mubr.msk.bf16.vlgmr.msra.gmra.mxu1 %vm469_vm2, %v5676_v24  ;;  %v2828_v41 = vrot.slane %v2826_v30, 4  ;;  %v2834_v22 = vrot.slane %v2832_v44, 5  ;;  %v2846_v27 = vshll.u32 %v7538_v40, 16  ;;  %v2850_v23 = vshrl.u32 %v7538_v40, 16 }
  0xaf   : > { %6276 = vmatmul.mubr.msk.bf16.vlgmr.msra.gmra.mxu0 %vm469_vm2, %v5635_v55  ;;  %6328 = vmatpush3.bf16.msra.mxu1 %v6779_v8  ;;  %v2820_v63 = vrot.slane %v2819_v47, 4  ;;  %v2839_v52 = vrot.slane %v2837_v32, 4  ;;  %v2842_v39 = vrot.slane %v2840_v45, 5  ;;  %v2856_v7 = vshll.u32 %v7545_v48, 16  ;;  %v7587_v47 = vld [vmem:[%s6797_s9 + $0x98] sm:$0x1] }
  0xb0   : > { %6310 = vmatpush3.bf16.msra.mxu0 %v6751_v2  ;;  %v2829_v5 = vor.u32 %v2828_v41, %v2824_v62  ;;  %v2848_v18 = vrot.slane %v2846_v27, 5  ;;  %v2852_v46 = vrot.slane %v2850_v23, 4  ;;  %v5627_v37 = vrot.slane %v5619_v43, 9  ;;  %6486 = vmatprep.subr.msk.bf16.mxu1 %vm494_vm0, %v6591_v54  ;;  %v7590_v32 = vld [vmem:[%s6797_s9 + $0x9c] sm:$0xf] }
  0xb1   : > { %v2825_v8 = vsel %vm6848_vm4, %v2820_v63, %v2824_v62  ;;  %v2843_v21 = vor.u32 %v2842_v39, %v2839_v52  ;;  %v2858_v58 = vrot.slane %v2856_v7, 5  ;;  %v2472_v2 = vrot.slane %v7349_v20, 5  ;;  %6485 = vmatprep.subr.msk.bf16.mxu0 %vm494_vm0, %v6592_v36  ;;  %v7581_v62 = vld [vmem:[%s6797_s9 + $0x94] sm:$0xf]  ;;  %v7603_v63 = vld [vmem:[%s6797_s9 + $0xa0] sm:$0xf] }
  0xb2   : > { %v2830_v38 = vrot.slane %v2829_v5, 4  ;;  %v2853_v17 = vor.u32 %v2852_v46, %v2848_v18  ;;  %v2475_v24 = vrot.slane %v7360_v11, 5  ;;  %v5628_v59 = vrot.slane %v5620_v28, 9  ;;  %v7608_v7 = vld [vmem:[%s6797_s9 + $0xa4] sm:$0x1] }
  0xb3   : > { %v2844_v30 = vrot.slane %v2843_v21, 4  ;;  %v2473_v20 = vsel %vm6962_vm7, %v5627_v37, %v2472_v2  ;;  %v2474_v44 = vrot.slane %v2472_v2, 4  ;;  %v2479_v55 = vrot.slane %v7368_v53, 5  ;;  %v5621_v54 = vld [vmem:[%s6797_s9 + $0x48] sm:$0xe] }
  0xb4   : > { %v2835_v45 = vsel %vm6848_vm4, %v2830_v38, %v2834_v22  ;;  %v2854_v11 = vrot.slane %v2853_v17, 4  ;;  %v2482_v43 = vrot.slane %v7377_v61, 5  ;;  %v2861_v28 = vshrl.u32 %v7573_v4, 16 }
  0xb5   : > { %v5677_v41 = vcombine.low %v2825_v8, %v2835_v45  ;;  %v2849_v27 = vsel %vm6848_vm4, %v2844_v30, %v2848_v18  ;;  %v2476_v53 = vsel %vm6962_vm7, %v2474_v44, %v2475_v24  ;;  %v2480_v23 = vsel %vm6962_vm7, %v5628_v59, %v2479_v55 }
  0xb6   : > { %v2859_v22 = vsel %vm6848_vm4, %v2854_v11, %v2858_v58  ;;  %v5636_v52 = vcombine.low %v2473_v20, %v2476_v53  ;;  %v2481_v61 = vrot.slane %v2479_v55, 4  ;;  %v2863_v39 = vrot.slane %v2861_v28, 4 }
  0xb7   : > { %6297 = vmatprep.mubr.msk.bf16.mxu1 %vm469_vm2, %v5677_v41  ;;  %v5678_v5 = vcombine.low %v2849_v27, %v2859_v22  ;;  %v2864_v18 = vshll.u32 %v7573_v4, 16  ;;  %v2870_v46 = vshll.u32 %v7581_v62, 16  ;;  %v2874_v37 = vshrl.u32 %v7581_v62, 16 }
  0xb8   : > { %6279 = vmatprep.mubr.msk.bf16.mxu0 %vm469_vm2, %v5636_v52  ;;  %v2483_v8 = vsel %vm6962_vm7, %v2481_v61, %v2482_v43  ;;  %v2880_v21 = vshll.u32 %v7587_v47, 16  ;;  %v2885_v58 = vshrl.u32 %v7590_v32, 16  ;;  %v2888_v2 = vshll.u32 %v7590_v32, 16 }
  0xb9   : > { %6298 = vmatmul.mubr.msk.bf16.gmra.mxu1 %vm469_vm2, %v5678_v5  ;;  %v5637_v36 = vcombine.low %v2480_v23, %v2483_v8  ;;  %v2866_v38 = vrot.slane %v2864_v18, 5  ;;  %v2872_v17 = vrot.slane %v2870_v46, 5  ;;  %v2876_v24 = vrot.slane %v2874_v37, 4  ;;  %v5622_v23 = vld [vmem:[%s6797_s9 + $0x54] sm:$0xe] }
  0xba   : > { %v2882_v59 = vrot.slane %v2880_v21, 5  ;;  %v2887_v30 = vrot.slane %v2885_v58, 4  ;;  %v2890_v20 = vrot.slane %v2888_v2, 5  ;;  %v2894_v44 = vshll.u32 %v7603_v63, 16  ;;  %v7632_v8 = vld [vmem:[%s6797_s9 + $0xa8] sm:$0xf] }
  0xbb   : > { %6280 = vmatmul.mubr.msk.bf16.gmra.mxu0 %vm469_vm2, %v5637_v36  ;;  %v2867_v55 = vor.u32 %v2866_v38, %v2863_v39  ;;  %v2877_v45 = vor.u32 %v2876_v24, %v2872_v17  ;;  %v2898_v11 = vshrl.u32 %v7603_v63, 16  ;;  %v2904_v43 = vshll.u32 %v7608_v7, 16  ;;  %v7639_v2 = vld [vmem:[%s6797_s9 + $0xac] sm:$0xf] }
  0xbc   : > { %v2891_v28 = vor.u32 %v2890_v20, %v2887_v30  ;;  %v2896_v41 = vrot.slane %v2894_v44, 5  ;;  %v5629_v27 = vrot.slane %v5621_v54, 9  ;;  %v2486_v53 = vrot.slane %v7385_v49, 5  ;;  %v7647_v30 = vld [vmem:[%s6797_s9 + $0xb0] sm:$0x1] }
  0xbd   : > { %v2868_v22 = vrot.slane %v2867_v55, 4  ;;  %v2878_v52 = vrot.slane %v2877_v45, 4  ;;  %v2900_v61 = vrot.slane %v2898_v11, 4  ;;  %v2906_v5 = vrot.slane %v2904_v43, 5  ;;  %v7657_v43 = vld [vmem:[%s6797_s9 + $0xb4] sm:$0xf] }
  0xbe   : > { %v2892_v18 = vrot.slane %v2891_v28, 4  ;;  %v2487_v39 = vsel %vm6962_vm7, %v5629_v27, %v2486_v53  ;;  %v2488_v46 = vrot.slane %v2486_v53, 4  ;;  %v2489_v37 = vrot.slane %v7396_v19, 5  ;;  %v7665_v53 = vld [vmem:[%s6797_s9 + $0xb8] sm:$0xf] }
  0xbf   : > { %v2873_v54 = vsel %vm6848_vm4, %v2868_v22, %v2872_v17  ;;  %v2883_v49 = vsel %vm6848_vm4, %v2878_v52, %v2882_v59  ;;  %v2901_v21 = vor.u32 %v2900_v61, %v2896_v41  ;;  %v5630_v58 = vrot.slane %v5622_v23, 9 }
  0xc0   : > { %v5679_v36 = vcombine.low %v2873_v54, %v2883_v49  ;;  %v2897_v38 = vsel %vm6848_vm4, %v2892_v18, %v2896_v41  ;;  %v2490_v19 = vsel %vm6962_vm7, %v2488_v46, %v2489_v37  ;;  %v2493_v24 = vrot.slane %v7402_v6, 5  ;;  %v7670_v18 = vld [vmem:[%s6797_s9 + $0xbc] sm:$0x1] }
  0xc1   : > { %v2902_v17 = vrot.slane %v2901_v21, 4  ;;  %v5638_v20 = vcombine.low %v2487_v39, %v2490_v19  ;;  %v2496_v59 = vrot.slane %v7407_v33, 5  ;;  %v2909_v44 = vshrl.u32 %v7632_v8, 16  ;;  %v5623_v39 = vld [vmem:[%s6797_s9 + $0x60] sm:$0xe] }
  0xc2   : > { %6301 = vmatprep.mubr.msk.bf16.mxu1 %vm469_vm2, %v5679_v36  ;;  %v2494_v55 = vsel %vm6962_vm7, %v5630_v58, %v2493_v24  ;;  %v2495_v45 = vrot.slane %v2493_v24, 4  ;;  %v2912_v11 = vshll.u32 %v7632_v8, 16  ;;  %v2918_v6 = vshll.u32 %v7639_v2, 16 }
  0xc3   : > { %v2907_v28 = vsel %vm6848_vm4, %v2902_v17, %v2906_v5  ;;  %6283 = vmatprep.mubr.msk.bf16.mxu0 %vm469_vm2, %v5638_v20  ;;  %v2911_v33 = vrot.slane %v2909_v44, 4  ;;  %v2922_v41 = vshrl.u32 %v7639_v2, 16  ;;  %v2928_v27 = vshll.u32 %v7647_v30, 16  ;;  %v5624_v20 = vld [vmem:[%s6797_s9 + $0x6c] sm:$0xe] }
  0xc4   : > { %v5680_v23 = vcombine.low %v2897_v38, %v2907_v28  ;;  %v2497_v22 = vsel %vm6962_vm7, %v2495_v45, %v2496_v59  ;;  %v2914_v52 = vrot.slane %v2912_v11, 5  ;;  %v2920_v61 = vrot.slane %v2918_v6, 5 }
  0xc5   : > { %v5639_v5 = vcombine.low %v2494_v55, %v2497_v22  ;;  %v2924_v46 = vrot.slane %v2922_v41, 4  ;;  %v2930_v37 = vrot.slane %v2928_v27, 5  ;;  %v2933_v54 = vshrl.u32 %v7657_v43, 16 }
  0xc6   : > { %6302 = vmatmul.mubr.msk.bf16.gmra.mxu1 %vm469_vm2, %v5680_v23  ;;  %v2915_v49 = vor.u32 %v2914_v52, %v2911_v33  ;;  %v2936_v21 = vshll.u32 %v7657_v43, 16  ;;  %v2942_v58 = vshll.u32 %v7665_v53, 16  ;;  %v2946_v36 = vshrl.u32 %v7665_v53, 16  ;;  %v5707_v52 = vld [vmem:[%s6797_s9 + $0x60] sm:$0xe] }
  0xc7   : > { %6284 = vmatmul.mubr.msk.bf16.gmra.mxu0 %vm469_vm2, %v5639_v5  ;;  %v2925_v38 = vor.u32 %v2924_v46, %v2920_v61  ;;  %v2935_v19 = vrot.slane %v2933_v54, 4  ;;  %v2952_v24 = vshll.u32 %v7670_v18, 16  ;;  %v5631_v17 = vrot.slane %v5623_v39, 9 }
  0xc8   : > { %v2916_v59 = vrot.slane %v2915_v49, 4  ;;  %v2938_v44 = vrot.slane %v2936_v21, 5  ;;  %v2944_v55 = vrot.slane %v2942_v58, 5  ;;  %v2948_v45 = vrot.slane %v2946_v36, 4 }
  0xc9   : > { %v2926_v11 = vrot.slane %v2925_v38, 4  ;;  %v2954_v6 = vrot.slane %v2952_v24, 5  ;;  %v2500_v28 = vrot.slane %v7423_v56, 5  ;;  %v2503_v33 = vrot.slane %v7438_v31, 5 }
  0xca   : > { %v2921_v41 = vsel %vm6848_vm4, %v2916_v59, %v2920_v61  ;;  %v2939_v27 = vor.u32 %v2938_v44, %v2935_v19  ;;  %v2949_v23 = vor.u32 %v2948_v45, %v2944_v55  ;;  %v5632_v22 = vrot.slane %v5624_v20, 9  ;;  %v5708_v61 = vld [vmem:[%s6797_s9 + $0x6c] sm:$0xe] }
  0xcb   : > { %v2931_v39 = vsel %vm6848_vm4, %v2926_v11, %v2930_v37  ;;  %v2501_v5 = vsel %vm6962_vm7, %v5631_v17, %v2500_v28  ;;  %v2502_v46 = vrot.slane %v2500_v28, 4  ;;  %v2507_v54 = vrot.slane %v7443_v16, 5  ;;  %v5709_v17 = vld [vmem:[%s6797_s9 + $0x78] sm:$0xe] }
  0xcc   : > { %v5681_v56 = vcombine.low %v2921_v41, %v2931_v39  ;;  %v2940_v49 = vrot.slane %v2939_v27, 4  ;;  %v2950_v31 = vrot.slane %v2949_v23, 4  ;;  %v2510_v21 = vrot.slane %v7450_v29, 5 }
  0xcd   : > { %v2504_v58 = vsel %vm6962_vm7, %v2502_v46, %v2503_v33  ;;  %v2508_v36 = vsel %vm6962_vm7, %v5632_v22, %v2507_v54  ;;  %v2509_v37 = vrot.slane %v2507_v54, 4  ;;  %v5715_v38 = vrot.slane %v5707_v52, 9  ;;  %v5710_v33 = vld [vmem:[%s6797_s9 + $0x84] sm:$0xe]  ;;  %v5711_v22 = vld [vmem:[%s6797_s9 + $0x90] sm:$0xe] }
  0xce   : > { %6305 = vmatprep.mubr.msk.bf16.mxu1 %vm469_vm2, %v5681_v56  ;;  %v2945_v16 = vsel %vm6848_vm4, %v2940_v49, %v2944_v55  ;;  %v2955_v19 = vsel %vm6848_vm4, %v2950_v31, %v2954_v6  ;;  %v5640_v24 = vcombine.low %v2501_v5, %v2504_v58  ;;  %v3288_v29 = vrot.slane %v7460_v51, 5  ;;  %v5712_v46 = vld [vmem:[%s6797_s9 + $0x9c] sm:$0xe] }
  0xcf   : > { %v5682_v20 = vcombine.low %v2945_v16, %v2955_v19  ;;  %v2511_v59 = vsel %vm6962_vm7, %v2509_v37, %v2510_v21  ;;  %v3291_v44 = vrot.slane %v7474_v25, 5  ;;  %v5716_v45 = vrot.slane %v5708_v61, 9  ;;  %v5713_v21 = vld [vmem:[%s6797_s9 + $0xa8] sm:$0xe]  ;;  %v5714_v19 = vld [vmem:[%s6797_s9 + $0xb4] sm:$0xe] }
  0xd0   : > { %6287 = vmatprep.mubr.msk.bf16.mxu0 %vm469_vm2, %v5640_v24  ;;  %v5641_v11 = vcombine.low %v2508_v36, %v2511_v59  ;;  %v3289_v55 = vsel %vm6962_vm7, %v5715_v38, %v3288_v29  ;;  %v3290_v6 = vrot.slane %v3288_v29, 4  ;;  %v3295_v28 = vrot.slane %v7487_v3, 5 }
  0xd1   : > { %6306 = vmatmul.mubr.msk.bf16.gmra.mxu1 %vm469_vm2, %v5682_v20  ;;  %v3298_v41 = vrot.slane %v7491_v60, 5  ;;  %v5691_v27 = vcombine.low %v7455_v50, %v7460_v51  ;;  %v5692_v25 = vcombine.low %v7480_v34, %v7487_v3  ;;  %v5717_v23 = vrot.slane %v5709_v17, 9 }
  0xd2   : > { %6288 = vmatmul.mubr.msk.bf16.gmra.mxu0 %vm469_vm2, %v5641_v11  ;;  %v3292_v52 = vsel %vm6962_vm7, %v3290_v6, %v3291_v44  ;;  %v3296_v39 = vsel %vm6962_vm7, %v5716_v45, %v3295_v28  ;;  %v3297_v5 = vrot.slane %v3295_v28, 4  ;;  %v3302_v60 = vrot.slane %v7519_v10, 5 }
  0xd3   : > { %v5723_v54 = vcombine.low %v3289_v55, %v3292_v52  ;;  %6311 = vmatprep.mubr.msk.bf16.mxu0 %vm469_vm2, %v5691_v27  ;;  %v3305_v50 = vrot.slane %v7524_v1, 5  ;;  %v5718_v51 = vrot.slane %v5710_v33, 9  ;;  %v3309_v34 = vrot.slane %v7538_v40, 5  ;;  %v5771_v27 = vld [vmem:[%s6797_s9 + $0x6c] sm:$0xf] }
  0xd4   : > { %v3299_v3 = vsel %vm6962_vm7, %v3297_v5, %v3298_v41  ;;  %v3303_v56 = vsel %vm6962_vm7, %v5717_v23, %v3302_v60  ;;  %v3304_v49 = vrot.slane %v3302_v60, 4  ;;  %v3312_v31 = vrot.slane %v7545_v48, 5  ;;  %v6593_v52 = vld [vmem:[%s9111_s1 + $0xa] sm:$0x3] }
  0xd5   : > { %6329 = vmatprep.mubr.msk.bf16.mxu1 %vm469_vm2, %v5723_v54  ;;  %v5724_v61 = vcombine.low %v3296_v39, %v3299_v3  ;;  %v7738_v1 = vsel %vm6962_vm7, %v5718_v51, %v3309_v34  ;;  %v3311_v58 = vrot.slane %v3309_v34, 4  ;;  %v5693_v36 = vcombine.low %v7511_v26, %v7519_v10  ;;  %v6594_v54 = vld [vmem:[%s9111_s1 + $0xc] sm:$0x3] }
  0xd6   : > { %v3306_v37 = vsel %vm6962_vm7, %v3304_v49, %v3305_v50  ;;  %v5694_v38 = vcombine.low %v7530_v57, %v7538_v40  ;;  %v5719_v16 = vrot.slane %v5711_v22, 9  ;;  %v3316_v48 = vrot.slane %v7581_v62, 5  ;;  %v5777_v40 = vld [vmem:[%s6797_s9 + $0x84] sm:$0xf] }
  0xd7   : > { %v5725_v24 = vcombine.low %v3303_v56, %v3306_v37  ;;  %v3313_v29 = vsel %vm6962_vm7, %v3311_v58, %v3312_v31  ;;  %v3319_v17 = vrot.slane %v7587_v47, 5  ;;  %v5720_v20 = vrot.slane %v5712_v46, 9  ;;  %v7801_v46 = vld [vmem:[%s6797_s9 + $0x74] sm:$0x1]  ;;  %v5774_v56 = vld [vmem:[%s6797_s9 + $0x78] sm:$0xf] }
  0xd8   : > { %v5726_v59 = vcombine.low %v7738_v1, %v3313_v29  ;;  %v3317_v26 = vsel %vm6962_vm7, %v5719_v16, %v3316_v48  ;;  %v3318_v10 = vrot.slane %v3316_v48, 4  ;;  %v3323_v44 = vrot.slane %v7603_v63, 5  ;;  %v7825_v58 = vld [vmem:[%s6797_s9 + $0x7c] sm:$0xf] }
  0xd9   : > { %6330 = vmatmul.mubr.msk.bf16.vlgmr.msra.gmra.mxu1 %vm469_vm2, %v5724_v61  ;;  %v3326_v45 = vrot.slane %v7608_v7, 5  ;;  %v5695_v11 = vcombine.low %v7573_v4, %v7581_v62  ;;  %v5696_v47 = vcombine.low %v7590_v32, %v7603_v63  ;;  %v5721_v55 = vrot.slane %v5713_v21, 9 }
  0xda   : > { %6312 = vmatmul.mubr.msk.bf16.vlgmr.msra.gmra.mxu0 %vm469_vm2, %v5692_v25  ;;  %6364 = vmatpush3.bf16.msra.mxu1 %v6801_v12  ;;  %v3320_v6 = vsel %vm6962_vm7, %v3318_v10, %v3319_v17  ;;  %v7767_v28 = vsel %vm6962_vm7, %v5720_v20, %v3323_v44  ;;  %v3325_v7 = vrot.slane %v3323_v44, 4  ;;  %v3330_v33 = vrot.slane %v7639_v2, 5 }
  0xdb   : > { %6346 = vmatpush3.bf16.msra.mxu0 %v6782_v9  ;;  %6333 = vmatprep.mubr.msk.bf16.mxu1 %vm469_vm2, %v5725_v24  ;;  %v5727_v4 = vcombine.low %v3317_v26, %v3320_v6  ;;  %v3333_v62 = vrot.slane %v7647_v30, 5  ;;  %v5722_v12 = vrot.slane %v5714_v19, 9  ;;  %v3337_v41 = vrot.slane %v7665_v53, 5  ;;  %v7786_v30 = vld [vmem:[%s6797_s9 + $0x70] sm:$0xf] }
  0xdc   : > { %6315 = vmatprep.mubr.msk.bf16.mxu0 %vm469_vm2, %v5693_v36  ;;  %v7778_v25 = vsel %vm6962_vm7, %v3325_v7, %v3326_v45  ;;  %v7782_v23 = vsel %vm6962_vm7, %v5721_v55, %v3330_v33  ;;  %v3332_v9 = vrot.slane %v3330_v33, 4  ;;  %v3340_v22 = vrot.slane %v7670_v18, 5  ;;  %6487 = vmatprep.subr.msk.bf16.mxu0 %vm494_vm0, %v6593_v52  ;;  %v7831_v19 = vld [vmem:[%s6797_s9 + $0x80] sm:$0x1] }
  0xdd   : > { %v5728_v39 = vcombine.low %v7767_v28, %v7778_v25  ;;  %v7796_v5 = vsel %vm6962_vm7, %v5722_v12, %v3337_v41  ;;  %v3339_v60 = vrot.slane %v3337_v41, 4  ;;  %v5697_v18 = vcombine.low %v7632_v8, %v7639_v2  ;;  %6488 = vmatprep.subr.msk.bf16.mxu1 %vm494_vm0, %v6594_v54  ;;  %v7850_v41 = vld [vmem:[%s6797_s9 + $0x88] sm:$0xf]  ;;  %v7858_v54 = vld [vmem:[%s6797_s9 + $0x8c] sm:$0x1] }
  0xde   : > { %v7809_v50 = vsel %vm6962_vm7, %v3332_v9, %v3333_v62  ;;  %v5698_v51 = vcombine.low %v7657_v43, %v7665_v53  ;;  %v3722_v34 = vshrl.u32 %v5771_v27, 16  ;;  %v3725_v3 = vshll.u32 %v5771_v27, 16  ;;  %v5783_v8 = vld [vmem:[%s6797_s9 + $0x9c] sm:$0xf] }
  0xdf   : > { %v5729_v49 = vcombine.low %v7782_v23, %v7809_v50  ;;  %v7818_v31 = vsel %vm6962_vm7, %v3339_v60, %v3340_v22  ;;  %v3731_v21 = vshll.u32 %v7786_v30, 16  ;;  %v3735_v61 = vshrl.u32 %v7786_v30, 16  ;;  %v7822_v1 = vpop.f32.mrf.mxu1 }
  0xe0   : > { %v5730_v36 = vcombine.low %v7796_v5, %v7818_v31  ;;  %v3724_v37 = vrot.slane %v3722_v34, 4  ;;  %v3727_v16 = vrot.slane %v3725_v3, 5  ;;  %v3741_v48 = vshll.u32 %v7801_v46, 16 }
  0xe1   : > { %6334 = vmatmul.mubr.msk.bf16.gmra.mxu1 %vm469_vm2, %v5726_v59  ;;  %v3733_v24 = vrot.slane %v3731_v21, 5  ;;  %v3737_v29 = vrot.slane %v3735_v61, 4  ;;  %v3746_v17 = vshrl.u32 %v5774_v56, 16  ;;  %v3749_v20 = vshll.u32 %v5774_v56, 16  ;;  %v7834_v26 = vpop.f32.mrf.mxu1 }
  0xe2   : > { %6316 = vmatmul.mubr.msk.bf16.gmra.mxu0 %vm469_vm2, %v5694_v38  ;;  %6337 = vmatprep.mubr.msk.bf16.mxu1 %vm469_vm2, %v5727_v4  ;;  %v3728_v10 = vor.u32 %v3727_v16, %v3724_v37  ;;  %v3743_v44 = vrot.slane %v3741_v48, 5  ;;  %v3755_v45 = vshll.u32 %v7825_v58, 16  ;;  %v3759_v59 = vshrl.u32 %v7825_v58, 16  ;;  %v5780_v37 = vld [vmem:[%s6797_s9 + $0x90] sm:$0xf] }
  0xe3   : > { %6319 = vmatprep.mubr.msk.bf16.mxu0 %vm469_vm2, %v5695_v11  ;;  %v3738_v55 = vor.u32 %v3737_v29, %v3733_v24  ;;  %v3748_v6 = vrot.slane %v3746_v17, 4  ;;  %v3751_v7 = vrot.slane %v3749_v20, 5  ;;  %v3765_v33 = vshll.u32 %v7831_v19, 16  ;;  %v7845_v57 = vpop.f32.mrf.mxu1  ;;  %v7868_v17 = vld [vmem:[%s6797_s9 + $0x94] sm:$0xf] }
  0xe4   : > { %v3729_v38 = vrot.slane %v3728_v10, 4  ;;  %v3757_v4 = vrot.slane %v3755_v45, 5  ;;  %v3761_v62 = vrot.slane %v3759_v59, 4  ;;  %v4115_v12 = vrot.slane %v7825_v58, 5 }
  0xe5   : > { %v3739_v27 = vrot.slane %v3738_v55, 4  ;;  %v3752_v23 = vor.u32 %v3751_v7, %v3748_v6  ;;  %v3767_v11 = vrot.slane %v3765_v33, 5  ;;  %v4118_v9 = vrot.slane %v7831_v19, 5  ;;  %v7853_v22 = vpop.f32.mrf.mxu1 }
  0xe6   : > { %v3734_v52 = vsel %vm6848_vm4, %v3729_v38, %v3733_v24  ;;  %v3762_v60 = vor.u32 %v3761_v62, %v3757_v4  ;;  %v3770_v50 = vshrl.u32 %v5777_v40, 16  ;;  %v3773_v34 = vshll.u32 %v5777_v40, 16 }
  0xe7   : > { %v3744_v3 = vsel %vm6848_vm4, %v3739_v27, %v3743_v44  ;;  %v3753_v56 = vrot.slane %v3752_v23, 4  ;;  %v3779_v21 = vshll.u32 %v7850_v41, 16  ;;  %v3783_v61 = vshrl.u32 %v7850_v41, 16 }
  0xe8   : > { %v7865_v16 = vcombine.low %v3734_v52, %v3744_v3  ;;  %v3763_v48 = vrot.slane %v3762_v60, 4  ;;  %v3772_v29 = vrot.slane %v3770_v50, 4  ;;  %v3775_v24 = vrot.slane %v3773_v34, 5  ;;  %v7913_v3 = vld [vmem:[%s6797_s9 + $0xa0] sm:$0xf] }
  0xe9   : > { %6338 = vmatmul.mubr.msk.bf16.gmra.mxu1 %vm469_vm2, %v5728_v39  ;;  %v3758_v20 = vsel %vm6848_vm4, %v3753_v56, %v3757_v4  ;;  %v3781_v10 = vrot.slane %v3779_v21, 5  ;;  %v3785_v44 = vrot.slane %v3783_v61, 4  ;;  %v3789_v45 = vshll.u32 %v7858_v54, 16  ;;  %v7877_v59 = vpop.f32.mrf.mxu1  ;;  %v7887_v39 = vld [vmem:[%s6797_s9 + $0x98] sm:$0x1]  ;;  %v6565_v56 = vld [vmem:[%s6797_s9 + $0x6c] sm:$0xff]  }
  0xea   : > { %6320 = vmatmul.mubr.msk.bf16.gmra.mxu0 %vm469_vm2, %v5696_v47  ;;  %6341 = vmatprep.mubr.msk.bf16.mxu1 %vm469_vm2, %v5729_v49  ;;  %v3768_v28 = vsel %vm6848_vm4, %v3763_v48, %v3767_v11  ;;  %v3776_v25 = vor.u32 %v3775_v24, %v3772_v29  ;;  %v3794_v55 = vshrl.u32 %v5780_v37, 16  ;;  %v3797_v6 = vshll.u32 %v5780_v37, 16 }
  0xeb   : > { %6323 = vmatprep.mubr.msk.bf16.mxu0 %vm469_vm2, %v5697_v18  ;;  %v7893_v7 = vcombine.low %v3758_v20, %v3768_v28  ;;  %v6133_v32 = vpop.f32.mrf.mxu0  ;;  %v3786_v63 = vor.u32 %v3785_v44, %v3781_v10  ;;  %v3791_v47 = vrot.slane %v3789_v45, 5  ;;  %v3803_v49 = vshll.u32 %v7868_v17, 16  ;;  %v7896_v33 = vpop.f32.mrf.mxu1  ;;  %v5786_v28 = vld [vmem:[%s6797_s9 + $0xa8] sm:$0xf] }
  0xec   : > { %v7899_v40 = vadd.f32 %v7822_v1, %v6133_v32  ;;  %v3777_v38 = vrot.slane %v3776_v25, 4  ;;  %v3796_v4 = vrot.slane %v3794_v55, 4  ;;  %v3799_v62 = vrot.slane %v3797_v6, 5 }
  0xed   : > { %v532_v2 = vpop.f32.mrf.mxu0  ;;  %v3787_v18 = vrot.slane %v3786_v63, 4  ;;  %v3805_v27 = vrot.slane %v3803_v49, 5  ;;  %v3807_v23 = vshrl.u32 %v7868_v17, 16  ;;  %v3813_v11 = vshll.u32 %v7887_v39, 16  ;;  %v7904_v52 = vpop.f32.mrf.mxu1  ;;  %v7938_v49 = vld [vmem:[%s6797_s9 + $0xac] sm:$0xf] }
  0xee   : > { %v7907_v60 = vadd.f32 %v7834_v26, %v532_v2  ;;  %v3782_v1 = vsel %vm6848_vm4, %v3777_v38, %v3781_v10  ;;  %v3800_v50 = vor.u32 %v3799_v62, %v3796_v4  ;;  %v4132_v34 = vrot.slane %v7887_v39, 5  ;;  %v7921_v26 = vld [vmem:[%s6797_s9 + $0xa4] sm:$0x1]  ;;  %v7956_v2 = vld [vmem:[%s6797_s9 + $0xb0] sm:$0x1] }
  0xef   : > { %v3792_v21 = vsel %vm6848_vm4, %v3787_v18, %v3791_v47  ;;  %v6134_v61 = vpop.f32.mrf.mxu0  ;;  %v3809_v37 = vrot.slane %v3807_v23, 4  ;;  %v3815_v48 = vrot.slane %v3813_v11, 5  ;;  %v7918_v29 = vpop.f32.mrf.mxu1  ;;  %v3818_v24 = vshrl.u32 %v5783_v8, 16  ;;  %v8201_v39 = vld [vmem:[%s6797_s9 + $0x88] sm:$0xf] }
  0xf0   : > { %v7923_v20 = vcombine.low %v3782_v1, %v3792_v21  ;;  %v7926_v10 = vadd.f32 %v7845_v57, %v6134_v61  ;;  %v3801_v44 = vrot.slane %v3800_v50, 4  ;;  %v3821_v45 = vshll.u32 %v5783_v8, 16  ;;  %v6566_v21 = vld [vmem:[%s6797_s9 + $0x78] sm:$0xff]  }
  0xf1   : > { %6342 = vmatmul.mubr.msk.bf16.gmra.mxu1 %vm469_vm2, %v5730_v36  ;;  %v3810_v25 = vor.u32 %v3809_v37, %v3805_v27  ;;  %v535_v55 = vpop.f32.mrf.mxu0  ;;  %v3820_v6 = vrot.slane %v3818_v24, 4  ;;  %v3827_v32 = vshll.u32 %v7913_v3, 16  ;;  %v3831_v63 = vshrl.u32 %v7913_v3, 16  ;;  %v7935_v47 = vpop.f32.mrf.mxu1 }
  0xf2   : > { %6324 = vmatmul.mubr.msk.bf16.gmra.mxu0 %vm469_vm2, %v5698_v51  ;;  %6365 = vmatprep.mubr.msk.bf16.mxu1 %vm469_vm2, %v7865_v16  ;;  %v3806_v5 = vsel %vm6848_vm4, %v3801_v44, %v3805_v27  ;;  %v7949_v31 = vadd.f32 %v7853_v22, %v535_v55  ;;  %v3823_v36 = vrot.slane %v3821_v45, 5  ;;  %v3837_v57 = vshll.u32 %v7921_v26, 16 }
  0xf3   : > { %6347 = vmatprep.mubr.msk.bf16.mxu0 %vm469_vm2, %v6565_v56  ;;  %v3811_v38 = vrot.slane %v3810_v25, 4  ;;  %v3829_v43 = vrot.slane %v3827_v32, 5  ;;  %v3833_v53 = vrot.slane %v3831_v63, 4  ;;  %v3842_v51 = vshrl.u32 %v5786_v28, 16  ;;  %v7953_v4 = vpop.f32.mrf.mxu1  ;;  %v5789_v56 = vld [vmem:[%s6797_s9 + $0xb4] sm:$0xf] }
  0xf4   : > { %v6137_v16 = vpop.f32.mrf.mxu0  ;;  %v3824_v62 = vor.u32 %v3823_v36, %v3820_v6  ;;  %v3839_v8 = vrot.slane %v3837_v57, 5  ;;  %v3845_v22 = vshll.u32 %v5786_v28, 16  ;;  %v3851_v18 = vshll.u32 %v7938_v49, 16  ;;  %v6567_v6 = vld [vmem:[%s6797_s9 + $0x84] sm:$0xff]   ;;  %v7984_v57 = vld [vmem:[%s6797_s9 + $0xb8] sm:$0xf] }
  0xf5   : > { %v3816_v27 = vsel %vm6848_vm4, %v3811_v38, %v3815_v48  ;;  %v7962_v23 = vadd.f32 %v7877_v59, %v6137_v16  ;;  %v3834_v11 = vor.u32 %v3833_v53, %v3829_v43  ;;  %v3844_v1 = vrot.slane %v3842_v51, 4  ;;  %v7964_v50 = vpop.f32.mrf.mxu1 }
  0xf6   : > { %v7968_v61 = vcombine.low %v3806_v5, %v3816_v27  ;;  %v548_v37 = vpop.f32.mrf.mxu0  ;;  %v3825_v24 = vrot.slane %v3824_v62, 4  ;;  %v3847_v44 = vrot.slane %v3845_v22, 5  ;;  %v7970_v45 = vrot.slane %v3851_v18, 5  ;;  %v7994_v62 = vld [vmem:[%s6797_s9 + $0xbc] sm:$0x1] }
  0xf7   : > { %v7973_v48 = vadd.f32 %v7896_v33, %v548_v37  ;;  %v3835_v59 = vrot.slane %v3834_v11, 4  ;;  %v3855_v28 = vshrl.u32 %v7938_v49, 16  ;;  %v3861_v25 = vshll.u32 %v7956_v2, 16  ;;  %v7977_v55 = vpop.f32.mrf.mxu1  ;;  %v8011_v37 = vld [vmem:[%s6797_s9 + $0xc4] sm:$0xf] }
  0xf8   : > { %v3830_v32 = vsel %vm6848_vm4, %v3825_v24, %v3829_v43  ;;  %v6138_v63 = vpop.f32.mrf.mxu0  ;;  %v3848_v5 = vor.u32 %v3847_v44, %v3844_v1  ;;  %v3866_v33 = vshrl.u32 %v5789_v56, 16  ;;  %v5792_v43 = vld [vmem:[%s6797_s9 + $0xc0] sm:$0xf]  ;;  %v3869_v11 = vshll.u32 %v5789_v56, 16  ;;  %v6595_v44 = vld [vmem:[%s9111_s1 + $0xe] sm:$0x3] }
  0xf9   : > { %6366 = vmatmul.mubr.msk.bf16.vlgmr.msra.gmra.mxu1 %vm469_vm2, %v7893_v7  ;;  %v3840_v38 = vsel %vm6848_vm4, %v3835_v59, %v3839_v8  ;;  %v7991_v53 = vadd.f32 %v7904_v52, %v6138_v63  ;;  %v3857_v51 = vrot.slane %v3855_v28, 4  ;;  %v3863_v16 = vrot.slane %v3861_v25, 5 }
  0xfa   : > { %6348 = vmatmul.mubr.msk.bf16.vlgmr.msra.gmra.mxu0 %vm469_vm2, %v6566_v21  ;;  %6400 = vmatpush3.bf16.msra.mxu1 %v6808_v14  ;;  %v5799_v22 = vcombine.low %v3830_v32, %v3840_v38  ;;  %v3849_v18 = vrot.slane %v3848_v5, 4  ;;  %v551_v27 = vpop.f32.mrf.mxu0  ;;  %v3868_v7 = vrot.slane %v3866_v33, 4  ;;  %v7999_v1 = vpop.f32.mrf.mxu1  ;;  %v3875_v21 = vshll.u32 %v7984_v57, 16  ;;  %v6568_v32 = vld [vmem:[%s6797_s9 + $0x90] sm:$0xff]   ;;  %v8030_v38 = vld [vmem:[%s6797_s9 + $0xc8] sm:$0x1] }
  0xfb   : > { %6382 = vmatpush3.bf16.msra.mxu0 %v6804_v13  ;;  %6369 = vmatprep.mubr.msk.bf16.mxu1 %vm469_vm2, %v7923_v20  ;;  %v3858_v52 = vor.u32 %v3857_v51, %v7970_v45  ;;  %v8006_v8 = vadd.f32 %v7918_v29, %v551_v27  ;;  %v3879_v14 = vshrl.u32 %v7984_v57, 16  ;;  %v3871_v56 = vrot.slane %v3869_v11, 5  ;;  %v6569_v11 = vld [vmem:[%s6797_s9 + $0x9c] sm:$0xff]  }
  0xfc   : > { %6351 = vmatprep.mubr.msk.bf16.mxu0 %vm469_vm2, %v6567_v6  ;;  %v3854_v13 = vsel %vm6848_vm4, %v3849_v18, %v7970_v45  ;;  %v3885_v20 = vshll.u32 %v7994_v62, 16  ;;  %v3890_v24 = vshrl.u32 %v5792_v43, 16  ;;  %v8018_v29 = vpop.f32.mrf.mxu1  ;;  %6489 = vmatprep.subr.msk.bf16.mxu0 %vm494_vm0, %v6595_v44  ;;  %v3877_v28 = vrot.slane %v3875_v21, 5  ;;  %v6596_v45 = vld [vmem:[%s9111_s1 + $0x10] sm:$0x3] }
  0xfd   : > { %v3859_v59 = vrot.slane %v3858_v52, 4  ;;  %v3881_v25 = vrot.slane %v3879_v14, 4  ;;  %v3893_v6 = vshll.u32 %v5792_v43, 16  ;;  %6490 = vmatprep.subr.msk.bf16.mxu1 %vm494_vm0, %v6596_v45  ;;  %v3872_v5 = vor.u32 %v3871_v56, %v3868_v7  ;;  %v5811_v44 = vld [vmem:[%s6797_s9 + $0x6c] sm:$0xe] }
  0xfe   : > { %v6141_v63 = vpop.f32.mrf.mxu0  ;;  %v3887_v33 = vrot.slane %v3885_v20, 5  ;;  %v3892_v51 = vrot.slane %v3890_v24, 4  ;;  %v3899_v18 = vshll.u32 %v8011_v37, 16  ;;  %v8033_v27 = vpop.f32.mrf.mxu1  ;;  %v3903_v24 = vshrl.u32 %v8011_v37, 16 }
  0xff   : > { %v3864_v43 = vsel %vm6848_vm4, %v3859_v59, %v3863_v16  ;;  %v8039_v52 = vadd.f32 %v7935_v47, %v6141_v63  ;;  %v3882_v21 = vor.u32 %v3881_v25, %v3877_v28  ;;  %v3895_v14 = vrot.slane %v3893_v6, 5 }
 0x100   : > { %v5800_v45 = vcombine.low %v3854_v13, %v3864_v43  ;;  %v564_v7 = vpop.f32.mrf.mxu0  ;;  %v3873_v56 = vrot.slane %v3872_v5, 4  ;;  %v3901_v20 = vrot.slane %v3899_v18, 5  ;;  %v8043_v36 = vpop.f32.mrf.mxu1  ;;  %v3909_v25 = vshll.u32 %v8030_v38, 16  ;;  %v5812_v18 = vld [vmem:[%s6797_s9 + $0x78] sm:$0xe] }
 0x101   : > { %6370 = vmatmul.mubr.msk.bf16.gmra.mxu1 %vm469_vm2, %v7968_v61  ;;  %v8048_v16 = vadd.f32 %v7953_v4, %v564_v7  ;;  %v3883_v47 = vrot.slane %v3882_v21, 4  ;;  %v3896_v59 = vor.u32 %v3895_v14, %v3892_v51  ;;  %v3905_v63 = vrot.slane %v3903_v24, 4 }
 0x102   : > { %6352 = vmatmul.mubr.msk.bf16.gmra.mxu0 %vm469_vm2, %v6568_v32  ;;  %6373 = vmatprep.mubr.msk.bf16.mxu1 %vm469_vm2, %v5799_v22  ;;  %v3878_v13 = vsel %vm6848_vm4, %v3873_v56, %v3877_v28  ;;  %v6142_v6 = vpop.f32.mrf.mxu0  ;;  %v8056_v61 = vpop.f32.mrf.mxu1  ;;  %v5819_v4 = vrot.slane %v5811_v44, 9  ;;  %v3911_v43 = vrot.slane %v3909_v25, 5  ;;  %v5813_v28 = vld [vmem:[%s6797_s9 + $0x84] sm:$0xe]  ;;  %v4108_v44 = vrot.slane %v7786_v30, 5 }
 0x103   : > { %6355 = vmatprep.mubr.msk.bf16.mxu0 %vm469_vm2, %v6569_v11  ;;  %v3888_v51 = vsel %vm6848_vm4, %v3883_v47, %v3887_v33  ;;  %v8063_v32 = vadd.f32 %v7964_v50, %v6142_v6  ;;  %v3897_v22 = vrot.slane %v3896_v59, 4  ;;  %v3906_v14 = vor.u32 %v3905_v63, %v3901_v20  ;;  %v6570_v59 = vld [vmem:[%s6797_s9 + $0xa8] sm:$0xff]   ;;  %v6571_v63 = vld [vmem:[%s6797_s9 + $0xb4] sm:$0xff]  }
 0x104   : > { %v5801_v21 = vcombine.low %v3878_v13, %v3888_v51  ;;  %v567_v7 = vpop.f32.mrf.mxu0  ;;  %v8066_v56 = vpop.f32.mrf.mxu1  ;;  %v4111_v11 = vrot.slane %v7801_v46, 5  ;;  %v5820_v33 = vrot.slane %v5812_v18, 9  ;;  %v4117_v47 = vrot.slane %v4115_v12, 4 }
 0x105   : > { %v3902_v24 = vsel %vm6848_vm4, %v3897_v22, %v3901_v20  ;;  %v8073_v50 = vadd.f32 %v7977_v55, %v567_v7  ;;  %v3907_v25 = vrot.slane %v3906_v14, 4  ;;  %v8080_v30 = vsel %vm6962_vm7, %v5819_v4, %v4108_v44  ;;  %v5814_v22 = vld [vmem:[%s6797_s9 + $0x90] sm:$0xe]  ;;  %v5816_v7 = vld [vmem:[%s6797_s9 + $0xa8] sm:$0xe] }
 0x106   : > { %v6145_v13 = vpop.f32.mrf.mxu0  ;;  %v4110_v46 = vrot.slane %v4108_v44, 4  ;;  %v8082_v6 = vpop.f32.mrf.mxu1  ;;  %v5821_v20 = vrot.slane %v5813_v28, 9  ;;  %v8092_v18 = vsel %vm6962_vm7, %v5820_v33, %v4115_v12  ;;  %v8098_v4 = vsel %vm6962_vm7, %v4117_v47, %v4118_v9  ;;  %v5815_v28 = vld [vmem:[%s6797_s9 + $0x9c] sm:$0xe] }
 0x107   : > { %v8086_v55 = vadd.f32 %v7999_v1, %v6145_v13  ;;  %v4122_v51 = vrot.slane %v7850_v41, 5  ;;  %v3912_v1 = vsel %vm6848_vm4, %v3907_v25, %v3911_v43  ;;  %v4125_v9 = vrot.slane %v7858_v54, 5 }
 0x108   : > { %v580_v14 = vpop.f32.mrf.mxu0  ;;  %v8107_v58 = vsel %vm6962_vm7, %v4110_v46, %v4111_v11  ;;  %v8111_v19 = vpop.f32.mrf.mxu1  ;;  %v5802_v41 = vcombine.low %v3902_v24, %v3912_v1  ;;  %v5822_v24 = vrot.slane %v5814_v22, 9  ;;  %v5823_v47 = vrot.slane %v5815_v28, 9  ;;  %v5817_v46 = vld [vmem:[%s6797_s9 + $0xb4] sm:$0xe] }
 0x109   : > { %6374 = vmatmul.mubr.msk.bf16.gmra.mxu1 %vm469_vm2, %v5800_v45  ;;  %v8117_v44 = vadd.f32 %v8018_v29, %v580_v14  ;;  %v5827_v43 = vcombine.low %v8080_v30, %v8107_v58  ;;  %v8123_v11 = vsel %vm6962_vm7, %v5821_v20, %v4122_v51  ;;  %v4124_v45 = vrot.slane %v4122_v51, 4  ;;  %v5818_v14 = vld [vmem:[%s6797_s9 + $0xc0] sm:$0xe] }
 0x10a   : > { %6356 = vmatmul.mubr.msk.bf16.gmra.mxu0 %vm469_vm2, %v6570_v59  ;;  %6377 = vmatprep.mubr.msk.bf16.mxu1 %vm469_vm2, %v5801_v21  ;;  %v6146_v54 = vpop.f32.mrf.mxu0  ;;  %v8127_v33 = vpop.f32.mrf.mxu1  ;;  %v4129_v29 = vrot.slane %v7868_v17, 5  ;;  %v4136_v13 = vrot.slane %v7913_v3, 5  ;;  %v4139_v21 = vrot.slane %v7921_v26, 5  ;;  %v5824_v59 = vrot.slane %v5816_v7, 9  ;;  %v6573_v7 = vld [vmem:[%s6797_s9 + $0x78] sm:$0xff]  }
 0x10b   : > { %6359 = vmatprep.mubr.msk.bf16.mxu0 %vm469_vm2, %v6571_v63  ;;  %v8132_v25 = vadd.f32 %v8033_v27, %v6146_v54  ;;  %v8141_v17 = vsel %vm6962_vm7, %v4124_v45, %v4125_v9  ;;  %v4143_v3 = vrot.slane %v7938_v49, 5  ;;  %v6572_v9 = vld [vmem:[%s6797_s9 + $0xc0] sm:$0xff]  }
 0x10c   : > { %v583_v20 = vpop.f32.mrf.mxu0  ;;  %v8137_v51 = vpop.f32.mrf.mxu1  ;;  %v8145_v63 = vsel %vm6962_vm7, %v5822_v24, %v4129_v29  ;;  %v4131_v27 = vrot.slane %v4129_v29, 4  ;;  %v8155_v28 = vsel %vm6962_vm7, %v5823_v47, %v4136_v13  ;;  %v4138_v1 = vrot.slane %v4136_v13, 4  ;;  %v8173_v47 = vld [vmem:[%s6797_s9 + $0x7c] sm:$0xf] }
 0x10d   : > { %v8149_v22 = vadd.f32 %v8043_v36, %v583_v20  ;;  %v8170_v36 = vsel %vm6962_vm7, %v5824_v59, %v4143_v3  ;;  %v4145_v24 = vrot.slane %v4143_v3, 4  ;;  %v5825_v29 = vrot.slane %v5817_v46, 9  ;;  %v8186_v59 = vld [vmem:[%s6797_s9 + $0x80] sm:$0x1] }
 0x10e   : > { %v6169_v54 = vpop.f32.mrf.mxu0  ;;  %v8160_v45 = vpop.f32.mrf.mxu1  ;;  %v8166_v49 = vsel %vm6962_vm7, %v4131_v27, %v4132_v34  ;;  %v8182_v34 = vsel %vm6962_vm7, %v4138_v1, %v4139_v21  ;;  %v4150_v20 = vrot.slane %v7984_v57, 5  ;;  %v5915_v27 = vld [vmem:[%s6797_s9 + $0x78] sm:$0xe]  ;;  %v4153_v21 = vrot.slane %v7994_v62, 5  ;;  %v5916_v57 = vld [vmem:[%s6797_s9 + $0x84] sm:$0xe] }
 0x10f   : > { %9123 = vst [vmem:[#allocation5_spill] sm:$0xff] %v8160_v45  ;;  %v8176_v13 = vadd.f32 %v6169_v54, %v7899_v40  ;;  %v9125_v40 = vrot.slane %v7956_v2, 5  ;;  %v5826_v1 = vrot.slane %v5818_v14, 9 }
 0x110   : > { %v929_v3 = vpop.f32.mrf.mxu0  ;;  %v8189_v26 = vpop.f32.mrf.mxu1  ;;  %v8212_v2 = vsel %vm6962_vm7, %v5825_v29, %v4150_v20  ;;  %v8233_v29 = vld [vmem:[%s6797_s9 + $0x8c] sm:$0x1] }
 0x111   : > { %9124 = vst [vmem:[#allocation6_spill] sm:$0xff] %v8189_v26  ;;  %v8197_v54 = vsel %vm6962_vm7, %v4145_v24, %v9125_v40  ;;  %6378 = vmatmul.mubr.msk.bf16.gmra.mxu1 %vm469_vm2, %v5802_v41  ;;  %v8206_v12 = vadd.f32 %v929_v3, %v7907_v60  ;;  %v4152_v24 = vrot.slane %v4150_v20, 4  ;;  %v4157_v41 = vrot.slane %v8011_v37, 5 }
 0x112   : > { %6360 = vmatmul.mubr.msk.bf16.gmra.mxu0 %vm469_vm2, %v6572_v9  ;;  %6401 = vmatprep.mubr.msk.bf16.mxu1 %vm469_vm2, %v6573_v7  ;;  %v6170_v62 = vpop.f32.mrf.mxu0  ;;  %v8216_v14 = vpop.f32.mrf.mxu1  ;;  %v5923_v60 = vrot.slane %v5915_v27, 9  ;;  %v4928_v3 = vrot.slane %v8173_v47, 5  ;;  %v4931_v40 = vrot.slane %v8186_v59, 5  ;;  %v5924_v37 = vrot.slane %v5916_v57, 9  ;;  %v5875_v27 = vld [vmem:[%s6797_s9 + $0x78] sm:$0xf] }
 0x113   : > { %9126 = vst [vmem:[#allocation7_spill] sm:$0xff] %v8216_v14  ;;  %6383 = vmatprep.mubr.msk.bf16.mxu0 %vm469_vm2, %v5827_v43  ;;  %v8226_v9 = vadd.f32 %v6170_v62, %v7926_v10  ;;  %v8230_v7 = vsel %vm6962_vm7, %v4152_v24, %v4153_v21  ;;  %v4935_v20 = vrot.slane %v8201_v39, 5  ;;  %v8243_v10 = vsel %vm6962_vm7, %v5826_v1, %v4157_v41  ;;  %v6574_v21 = vld [vmem:[%s6797_s9 + $0x84] sm:$0xff]  }
 0x114   : > { %v932_v46 = vpop.f32.mrf.mxu0  ;;  %v8237_v5 = vpop.f32.mrf.mxu1  ;;  %v4159_v58 = vrot.slane %v4157_v41, 4  ;;  %v8247_v43 = vsel %vm6962_vm7, %v5923_v60, %v4928_v3  ;;  %v4930_v24 = vrot.slane %v4928_v3, 4  ;;  %v9129_v1 = vrot.slane %v8030_v38, 5 }
 0x115   : > { %9127 = vst [vmem:[#allocation8_spill] sm:$0xff] %v8237_v5  ;;  %v8251_v57 = vadd.f32 %v932_v46, %v7949_v31  ;;  %v8255_v62 = vsel %vm6962_vm7, %v5924_v37, %v4935_v20  ;;  %v4937_v30 = vrot.slane %v4935_v20, 4  ;;  %v4938_v60 = vrot.slane %v8233_v29, 5  ;;  %v6575_v46 = vld [vmem:[%s6797_s9 + $0x90] sm:$0xff]  }
 0x116   : > { %v6173_v5 = vpop.f32.mrf.mxu0  ;;  %v8257_v14 = vpop.f32.mrf.mxu1  ;;  %v8263_v41 = vsel %vm6962_vm7, %v4159_v58, %v9129_v1  ;;  %v4542_v26 = vshrl.u32 %v5875_v27, 16  ;;  %v4545_v31 = vshll.u32 %v5875_v27, 16  ;;  %v8274_v20 = vsel %vm6962_vm7, %v4930_v24, %v4931_v40 }
 0x117   : > { %9128 = vst [vmem:[#allocation9_spill] sm:$0xff] %v8257_v14  ;;  %v8268_v3 = vadd.f32 %v6173_v5, %v7962_v23  ;;  %v4551_v38 = vshll.u32 %v8173_v47, 16  ;;  %v5878_v14 = vld [vmem:[%s6797_s9 + $0x84] sm:$0xf]  ;;  %v8284_v23 = vsel %vm6962_vm7, %v4937_v30, %v4938_v60  ;;  %v9131_v27 = vcombine.low %v8092_v18, %v8098_v4  ;;  %v6576_v18 = vld [vmem:[%s6797_s9 + $0x9c] sm:$0xff]  }
 0x118   : > { %v945_v58 = vpop.f32.mrf.mxu0  ;;  %v8278_v1 = vpop.f32.mrf.mxu1  ;;  %v4544_v5 = vrot.slane %v4542_v26, 4  ;;  %v4547_v45 = vrot.slane %v4545_v31, 5  ;;  %v8303_v60 = vadd.f32 %v8056_v61, %v8176_v13  ;;  %v4566_v31 = vshrl.u32 %v5878_v14, 16 }
 0x119   : > { %9130 = vst [vmem:[#allocation10_spill] sm:$0xff] %v8278_v1  ;;  %6402 = vmatmul.mubr.msk.bf16.vlgmr.msra.gmra.mxu1 %vm469_vm2, %v6574_v21  ;;  %v8288_v40 = vadd.f32 %v945_v58, %v7973_v48  ;;  %v4553_v37 = vrot.slane %v4551_v38, 5  ;;  %v4555_v1 = vshrl.u32 %v8173_v47, 16  ;;  %v4561_v48 = vshll.u32 %v8186_v59, 16  ;;  %v5917_v58 = vld [vmem:[%s6797_s9 + $0x90] sm:$0xe] }
 0x11a   : > { %6384 = vmatmul.mubr.msk.bf16.vlgmr.msra.gmra.mxu0 %vm469_vm2, %v9131_v27  ;;  %6436 = vmatpush3.bf16.msra.mxu1 %v7356_v35  ;;  %v6174_v26 = vpop.f32.mrf.mxu0  ;;  %v8298_v30 = vpop.f32.mrf.mxu1  ;;  %v4548_v21 = vor.u32 %v4547_v45, %v4544_v5  ;;  %v4569_v45 = vshll.u32 %v5878_v14, 16  ;;  %v4575_v47 = vshll.u32 %v8201_v39, 16  ;;  %v9132_v61 = vcombine.low %v8123_v11, %v8141_v17  ;;  %v8327_v11 = vld [vmem:[%s6797_s9 + $0x98] sm:$0x1]  ;;  %v6577_v17 = vld [vmem:[%s6797_s9 + $0xa8] sm:$0xff]  }
 0x11b   : > { %6418 = vmatpush3.bf16.msra.mxu0 %v6812_v15  ;;  %6405 = vmatprep.mubr.msk.bf16.mxu1 %vm469_vm2, %v6575_v46  ;;  %v8309_v4 = vadd.f32 %v6174_v26, %v7991_v53  ;;  %v4557_v35 = vrot.slane %v4555_v1, 4  ;;  %v4563_v46 = vrot.slane %v4561_v48, 5  ;;  %v4568_v38 = vrot.slane %v4566_v31, 4  ;;  %v8324_v26 = vld [vmem:[%s6797_s9 + $0x94] sm:$0xf] }
 0x11c   : > { %6387 = vmatprep.mubr.msk.bf16.mxu0 %vm469_vm2, %v9132_v61  ;;  %v948_v13 = vpop.f32.mrf.mxu0  ;;  %v8316_v15 = vpop.f32.mrf.mxu1  ;;  %v4549_v59 = vrot.slane %v4548_v21, 4  ;;  %v4579_v53 = vshrl.u32 %v8201_v39, 16  ;;  %v4571_v27 = vrot.slane %v4569_v45, 5  ;;  %v4577_v5 = vrot.slane %v4575_v47, 5 }
 0x11d   : > { %9133 = vst [vmem:[#allocation11_spill] sm:$0xff] %v8316_v15  ;;  %v8321_v1 = vadd.f32 %v948_v13, %v8006_v8  ;;  %v4558_v14 = vor.u32 %v4557_v35, %v4553_v37  ;;  %v4585_v8 = vshll.u32 %v8233_v29, 16  ;;  %v8337_v48 = vadd.f32 %v8066_v56, %v8206_v12  ;;  %v8343_v13 = vld [vmem:[%s6797_s9 + $0xa0] sm:$0xf]  ;;  %v5918_v56 = vld [vmem:[%s6797_s9 + $0x9c] sm:$0xe] }
 0x11e   : > { %v6177_v61 = vpop.f32.mrf.mxu0  ;;  %v8330_v24 = vpop.f32.mrf.mxu1  ;;  %v4554_v39 = vsel %vm6848_vm4, %v4549_v59, %v4553_v37  ;;  %v4581_v21 = vrot.slane %v4579_v53, 4  ;;  %v4572_v45 = vor.u32 %v4571_v27, %v4568_v38  ;;  %v5925_v47 = vrot.slane %v5917_v58, 9 }
 0x11f   : > { %9134 = vst [vmem:[#allocation12_spill] sm:$0xff] %v8330_v24  ;;  %v8340_v31 = vadd.f32 %v6177_v61, %v8039_v52  ;;  %v4559_v35 = vrot.slane %v4558_v14, 4  ;;  %v4587_v59 = vrot.slane %v4585_v8, 5  ;;  %v4942_v29 = vrot.slane %v8324_v26, 5  ;;  %v8361_v14 = vld [vmem:[%s6797_s9 + $0xa4] sm:$0x1] }
 0x120   : > { %v961_v24 = vpop.f32.mrf.mxu0  ;;  %v8345_v15 = vpop.f32.mrf.mxu1  ;;  %v4582_v37 = vor.u32 %v4581_v21, %v4577_v5  ;;  %v4945_v53 = vrot.slane %v8327_v11, 5  ;;  %v4573_v38 = vrot.slane %v4572_v45, 4  ;;  %v8358_v58 = vadd.f32 %v8082_v6, %v8226_v9  ;;  %v5881_v21 = vld [vmem:[%s6797_s9 + $0x90] sm:$0xf] }
 0x121   : > { %6406 = vmatmul.mubr.msk.bf16.gmra.mxu1 %vm469_vm2, %v6576_v18  ;;  %v8352_v52 = vadd.f32 %v961_v24, %v8048_v16  ;;  %v4564_v12 = vsel %vm6848_vm4, %v4559_v35, %v4563_v46  ;;  %v9135_v27 = vcombine.low %v8145_v63, %v8166_v49  ;;  %v8374_v6 = vsel %vm6962_vm7, %v5925_v47, %v4942_v29 }
 0x122   : > { %6409 = vmatprep.mubr.msk.bf16.mxu1 %vm469_vm2, %v6577_v17  ;;  %v6178_v16 = vpop.f32.mrf.mxu0  ;;  %v8368_v24 = vpop.f32.mrf.mxu1  ;;  %v8370_v18 = vcombine.low %v4554_v39, %v4564_v12  ;;  %v4583_v46 = vrot.slane %v4582_v37, 4  ;;  %v4944_v9 = vrot.slane %v4942_v29, 4  ;;  %v9136_v61 = vcombine.low %v8155_v28, %v8182_v34 }
 0x123   : > { %6388 = vmatmul.mubr.msk.bf16.gmra.mxu0 %vm469_vm2, %v9135_v27  ;;  %v8381_v63 = vadd.f32 %v6178_v16, %v8063_v32  ;;  %v4578_v49 = vsel %vm6848_vm4, %v4573_v38, %v4577_v5  ;;  %v5926_v17 = vrot.slane %v5918_v56, 9  ;;  %v4949_v39 = vrot.slane %v8343_v13, 5  ;;  %v6578_v5 = vld [vmem:[%s6797_s9 + $0xb4] sm:$0xff]  }
 0x124   : > { %6391 = vmatprep.mubr.msk.bf16.mxu0 %vm469_vm2, %v9136_v61  ;;  %v964_v8 = vpop.f32.mrf.mxu0  ;;  %v8387_v35 = vpop.f32.mrf.mxu1  ;;  %v4588_v45 = vsel %vm6848_vm4, %v4583_v46, %v4587_v59  ;;  %v8393_v28 = vsel %vm6962_vm7, %v4944_v9, %v4945_v53  ;;  %v4952_v32 = vrot.slane %v8361_v14, 5  ;;  %v8398_v34 = vadd.f32 %v8111_v19, %v8251_v57  ;;  %v6579_v53 = vld [vmem:[%s6797_s9 + $0xc0] sm:$0xff]   ;;  %v5884_v61 = vld [vmem:[%s6797_s9 + $0x9c] sm:$0xf] }
 0x125   : > { %v8402_v47 = vadd.f32 %v964_v8, %v8073_v50  ;;  %v8404_v37 = vcombine.low %v4578_v49, %v4588_v45  ;;  %v8410_v29 = vsel %vm6962_vm7, %v5926_v17, %v4949_v39  ;;  %v4951_v19 = vrot.slane %v4949_v39, 4  ;;  %v8484_v59 = vld [vmem:[%s6797_s9 + $0xbc] sm:$0x1] }
 0x126   : > { %v6181_v56 = vpop.f32.mrf.mxu0  ;;  %v8413_v12 = vpop.f32.mrf.mxu1  ;;  %v4590_v57 = vshrl.u32 %v5881_v21, 16  ;;  %v4593_v38 = vshll.u32 %v5881_v21, 16  ;;  %v4599_v27 = vshll.u32 %v8324_v26, 16  ;;  %v4603_v16 = vshrl.u32 %v8324_v26, 16 }
 0x127   : > { %v8417_v50 = vadd.f32 %v6181_v56, %v8086_v55  ;;  %v4609_v46 = vshll.u32 %v8327_v11, 16  ;;  %v8423_v9 = vadd.f32 %v8127_v33, %v8268_v3  ;;  %v8430_v39 = vsel %vm6962_vm7, %v4951_v19, %v4952_v32 }
 0x128   : > { %v977_v49 = vpop.f32.mrf.mxu0  ;;  %v8426_v17 = vpop.f32.mrf.mxu1  ;;  %v4592_v21 = vrot.slane %v4590_v57, 4  ;;  %v4595_v8 = vrot.slane %v4593_v38, 5  ;;  %v4601_v55 = vrot.slane %v4599_v27, 5  ;;  %v4605_v3 = vrot.slane %v4603_v16, 4  ;;  %v5919_v16 = vld [vmem:[%s6797_s9 + $0xa8] sm:$0xe] }
 0x129   : > { %6410 = vmatmul.mubr.msk.bf16.gmra.mxu1 %vm469_vm2, %v6578_v5  ;;  %v8434_v26 = vadd.f32 %v977_v49, %v8117_v44  ;;  %v4611_v11 = vrot.slane %v4609_v46, 5  ;;  %v9137_v45 = vcombine.low %v8170_v36, %v8197_v54  ;;  %v4614_v44 = vshrl.u32 %v5884_v61, 16 }
 0x12a   : > { %6413 = vmatprep.mubr.msk.bf16.mxu1 %vm469_vm2, %v6579_v53  ;;  %v6182_v32 = vpop.f32.mrf.mxu0  ;;  %v8443_v56 = vpop.f32.mrf.mxu1  ;;  %v4596_v5 = vor.u32 %v4595_v8, %v4592_v21  ;;  %v4617_v19 = vshll.u32 %v5884_v61, 16  ;;  %v4623_v57 = vshll.u32 %v8343_v13, 16  ;;  %v9138_v38 = vcombine.low %v8212_v2, %v8230_v7  ;;  %v8459_v7 = vld [vmem:[%s6797_s9 + $0xac] sm:$0xf] }
 0x12b   : > { %6392 = vmatmul.mubr.msk.bf16.gmra.mxu0 %vm469_vm2, %v9137_v45  ;;  %v8451_v36 = vadd.f32 %v6182_v32, %v8132_v25  ;;  %v4606_v54 = vor.u32 %v4605_v3, %v4601_v55  ;;  %v4627_v53 = vshrl.u32 %v8343_v13, 16  ;;  %v4633_v27 = vshll.u32 %v8361_v14, 16  ;;  %v6580_v45 = vld [vmem:[%s6797_s9 + $0xcc] sm:$0xff]  }
 0x12c   : > { %6395 = vmatprep.mubr.msk.bf16.mxu0 %vm469_vm2, %v9138_v38  ;;  %v980_v46 = vpop.f32.mrf.mxu0  ;;  %v8456_v49 = vpop.f32.mrf.mxu1  ;;  %v4597_v61 = vrot.slane %v4596_v5, 4  ;;  %v4616_v21 = vrot.slane %v4614_v44, 4  ;;  %v4619_v8 = vrot.slane %v4617_v19, 5  ;;  %v4625_v2 = vrot.slane %v4623_v57, 5  ;;  %v8466_v32 = vld [vmem:[%s6797_s9 + $0xb0] sm:$0x1] }
 0x12d   : > { %v8463_v25 = vadd.f32 %v980_v46, %v8149_v22  ;;  %v4607_v3 = vrot.slane %v4606_v54, 4  ;;  %v4629_v13 = vrot.slane %v4627_v53, 4  ;;  %v4635_v14 = vrot.slane %v4633_v27, 5  ;;  %v8475_v22 = vld [vmem:[%s6797_s9 + $0xb8] sm:$0xf] }
 0x12e   : > { %v6205_v38 = vpop.f32.mrf.mxu0  ;;  %v4602_v5 = vsel %vm6848_vm4, %v4597_v61, %v4601_v55  ;;  %v8470_v44 = vpop.f32.mrf.mxu1  ;;  %v4620_v19 = vor.u32 %v4619_v8, %v4616_v21  ;;  %v1195_v57 = vadd.f32 %v8137_v51, %v8288_v40  ;;  %v5927_v33 = vrot.slane %v5919_v16, 9  ;;  %v5920_v55 = vld [vmem:[%s6797_s9 + $0xb4] sm:$0xe] }
 0x12f   : > { %v8478_v54 = vadd.f32 %v6205_v38, %v8303_v60  ;;  %v4612_v53 = vsel %vm6848_vm4, %v4607_v3, %v4611_v11  ;;  %v4630_v27 = vor.u32 %v4629_v13, %v4625_v2  ;;  %v4956_v46 = vrot.slane %v8459_v7, 5  ;;  %v9139_v60 = vld [vmem:[#allocation5_spill] sm:$0xff] }
 0x130   : > { %v1510_v61 = vpop.f32.mrf.mxu0  ;;  %v8487_v21 = vcombine.low %v4602_v5, %v4612_v53  ;;  %v4621_v8 = vrot.slane %v4620_v19, 4  ;;  %v8489_v51 = vpop.f32.mrf.mxu1  ;;  %v4959_v40 = vrot.slane %v8466_v32, 5  ;;  %v1198_v16 = vadd.f32 %v9139_v60, %v8309_v4 }
 0x131   : > { %6414 = vmatmul.mubr.msk.bf16.gmra.mxu1 %vm469_vm2, %v6580_v45  ;;  %v8496_v11 = vadd.f32 %v1510_v61, %v8337_v48  ;;  %v4631_v3 = vrot.slane %v4630_v27, 4  ;;  %v8500_v13 = vsel %vm6962_vm7, %v5927_v33, %v4956_v46  ;;  %v4958_v38 = vrot.slane %v4956_v46, 4  ;;  %v5887_v46 = vld [vmem:[%s6797_s9 + $0xa8] sm:$0xf] }
 0x132   : > { %v9140_v5 = vcombine.low %v8243_v10, %v8263_v41  ;;  %v9141_v19 = vcombine.low %v8247_v43, %v8274_v20  ;;  %v6206_v4 = vpop.f32.mrf.mxu0  ;;  %v4626_v48 = vsel %vm6848_vm4, %v4621_v8, %v4625_v2  ;;  %v8512_v45 = vpop.f32.mrf.mxu1  ;;  %v5928_v53 = vrot.slane %v5920_v55, 9  ;;  %v9142_v20 = vld [vmem:[#allocation6_spill] sm:$0xff] }
 0x133   : > { %v4963_v33 = vrot.slane %v8475_v22, 5  ;;  %v4966_v27 = vrot.slane %v8484_v59, 5  ;;  %v8520_v10 = vadd.f32 %v6206_v4, %v8358_v58  ;;  %v4636_v43 = vsel %vm6848_vm4, %v4631_v3, %v4635_v14 }
 0x134   : > { %6396 = vmatmul.mubr.msk.bf16.gmra.mxu0 %vm469_vm2, %v9140_v5  ;;  %6437 = vmatprep.mubr.msk.bf16.mxu1 %vm469_vm2, %v9141_v19  ;;  %v8526_v41 = vsel %vm6962_vm7, %v4958_v38, %v4959_v40  ;;  %v1196_v2 = vadd.f32 %v9142_v20, %v8321_v1  ;;  %v1513_v55 = vpop.f32.mrf.mxu0  ;;  %v8530_v61 = vcombine.low %v4626_v48, %v4636_v43  ;;  %v8538_v60 = vpop.f32.mrf.mxu1  ;;  %v4638_v40 = vshrl.u32 %v5887_v46, 16  ;;  %v5890_v38 = vld [vmem:[%s6797_s9 + $0xb4] sm:$0xf] }
 0x135   : > { %6419 = vmatprep.mubr.msk.bf16.mxu0 %vm469_vm2, %v8370_v18  ;;  %v8536_v58 = vsel %vm6962_vm7, %v5928_v53, %v4963_v33  ;;  %v4965_v18 = vrot.slane %v4963_v33, 4  ;;  %9143 = vst [vmem:[#allocation5_spill] sm:$0xff] %v8538_v60  ;;  %v8541_v14 = vadd.f32 %v1513_v55, %v8398_v34  ;;  %v4641_v3 = vshll.u32 %v5887_v46, 16  ;;  %v9144_v53 = vld [vmem:[#allocation7_spill] sm:$0xff] }
 0x136   : > { %v4647_v1 = vshll.u32 %v8459_v7, 16  ;;  %v6209_v5 = vpop.f32.mrf.mxu0  ;;  %v4651_v4 = vshrl.u32 %v8459_v7, 16  ;;  %v4657_v48 = vshll.u32 %v8466_v32, 16  ;;  %v1201_v33 = vadd.f32 %v9144_v53, %v8340_v31  ;;  %v8553_v43 = vpop.f32.mrf.mxu1 }
 0x137   : > { %v8547_v19 = vsel %vm6962_vm7, %v4965_v18, %v4966_v27  ;;  %9145 = vst [vmem:[#allocation6_spill] sm:$0xff] %v8553_v43  ;;  %v8556_v34 = vadd.f32 %v6209_v5, %v8423_v9  ;;  %v4640_v20 = vrot.slane %v4638_v40, 4  ;;  %v4643_v55 = vrot.slane %v4641_v3, 5  ;;  %v8570_v3 = vld [vmem:[%s6797_s9 + $0xc4] sm:$0xf] }
 0x138   : > { %v1526_v27 = vpop.f32.mrf.mxu0  ;;  %v4649_v18 = vrot.slane %v4647_v1, 5  ;;  %v4653_v8 = vrot.slane %v4651_v4, 4  ;;  %v4659_v7 = vrot.slane %v4657_v48, 5  ;;  %v4662_v32 = vshrl.u32 %v5890_v38, 16  ;;  %v8560_v60 = vpop.f32.mrf.mxu1  ;;  %v5921_v48 = vld [vmem:[%s6797_s9 + $0xc0] sm:$0xe] }
 0x139   : > { %9146 = vst [vmem:[#allocation7_spill] sm:$0xff] %v8560_v60  ;;  %v9147_v31 = vcombine.low %v8255_v62, %v8284_v23  ;;  %v8566_v9 = vadd.f32 %v1526_v27, %v1195_v57  ;;  %v4644_v5 = vor.u32 %v4643_v55, %v4640_v20  ;;  %v4665_v53 = vshll.u32 %v5890_v38, 16 }
 0x13a   : > { %v4671_v40 = vshll.u32 %v8475_v22, 16  ;;  %v9148_v1 = vcombine.low %v8374_v6, %v8393_v28  ;;  %v6210_v62 = vpop.f32.mrf.mxu0  ;;  %v4654_v23 = vor.u32 %v4653_v8, %v4649_v18  ;;  %v4664_v4 = vrot.slane %v4662_v32, 4  ;;  %v8586_v6 = vld [vmem:[%s6797_s9 + $0xc8] sm:$0x1] }
 0x13b   : > { %6438 = vmatmul.mubr.msk.bf16.vlgmr.msra.gmra.mxu1 %vm469_vm2, %v9147_v31  ;;  %v4675_v57 = vshrl.u32 %v8475_v22, 16  ;;  %v4681_v38 = vshll.u32 %v8484_v59, 16  ;;  %v8583_v20 = vadd.f32 %v6210_v62, %v1198_v16  ;;  %v4667_v55 = vrot.slane %v4665_v53, 5  ;;  %v9149_v59 = vld [vmem:[#allocation8_spill] sm:$0xff] }
 0x13c   : > { %6420 = vmatmul.mubr.msk.bf16.vlgmr.msra.gmra.mxu0 %vm469_vm2, %v8404_v37  ;;  %6441 = vmatprep.mubr.msk.bf16.mxu1 %vm469_vm2, %v9148_v1  ;;  %v4645_v37 = vrot.slane %v4644_v5, 4  ;;  %v4673_v27 = vrot.slane %v4671_v40, 5  ;;  %v1529_v28 = vpop.f32.mrf.mxu0  ;;  %v4655_v8 = vrot.slane %v4654_v23, 4  ;;  %v1199_v31 = vadd.f32 %v9149_v59, %v8352_v52  ;;  %v8590_v1 = vpop.f32.mrf.mxu1  ;;  %v5922_v40 = vld [vmem:[%s6797_s9 + $0xcc] sm:$0xe] }
 0x13d   : > { %6423 = vmatprep.mubr.msk.bf16.mxu0 %vm469_vm2, %v8487_v21  ;;  %v4677_v32 = vrot.slane %v4675_v57, 4  ;;  %v4683_v22 = vrot.slane %v4681_v38, 5  ;;  %9150 = vst [vmem:[#allocation8_spill] sm:$0xff] %v8590_v1  ;;  %v8592_v21 = vadd.f32 %v1529_v28, %v1196_v2  ;;  %v4668_v5 = vor.u32 %v4667_v55, %v4664_v4  ;;  %v8602_v59 = vld [vmem:[%s6797_s9 + $0xd0] sm:$0xf]  ;;  %v9151_v4 = vld [vmem:[#allocation9_spill] sm:$0xff] }
 0x13e   : > { %v4650_v16 = vsel %vm6848_vm4, %v4645_v37, %v4649_v18  ;;  %v5929_v53 = vrot.slane %v5921_v48, 9  ;;  %v4660_v62 = vsel %vm6848_vm4, %v4655_v8, %v4659_v7  ;;  %v6213_v23 = vpop.f32.mrf.mxu0  ;;  %v4970_v38 = vrot.slane %v8570_v3, 5  ;;  %v8605_v2 = vld [vmem:[%s6797_s9 + $0xd4] sm:$0x1]  ;;  %v5893_v37 = vld [vmem:[%s6797_s9 + $0xc0] sm:$0xf]  ;;  %v8614_v60 = vpop.f32.mrf.mxu1 }
 0x13f   : > { %v4678_v57 = vor.u32 %v4677_v32, %v4673_v27  ;;  %v4973_v52 = vrot.slane %v8586_v6, 5  ;;  %v5903_v28 = vcombine.low %v4650_v16, %v4660_v62  ;;  %v8607_v46 = vadd.f32 %v6213_v23, %v1201_v33 }
 0x140   : > { %v4669_v18 = vrot.slane %v4668_v5, 4  ;;  %v1202_v48 = vadd.f32 %v9151_v4, %v8381_v63  ;;  %v1542_v7 = vpop.f32.mrf.mxu0  ;;  %v4971_v8 = vsel %vm6962_vm7, %v5929_v53, %v4970_v38  ;;  %v4972_v32 = vrot.slane %v4970_v38, 4  ;;  %v8647_v4 = vpop.f32.mrf.mxu1 }
 0x141   : > { %v4679_v55 = vrot.slane %v4678_v57, 4  ;;  %v5930_v1 = vrot.slane %v5922_v40, 9  ;;  %v9152_v43 = vcombine.low %v8410_v29, %v8430_v39  ;;  %v8622_v63 = vadd.f32 %v1542_v7, %v1199_v31 }
 0x142   : > { %v4674_v33 = vsel %vm6848_vm4, %v4669_v18, %v4673_v27  ;;  %v4977_v16 = vrot.slane %v8602_v59, 5  ;;  %v4980_v5 = vrot.slane %v8605_v2, 5  ;;  %v9153_v53 = vcombine.low %v8500_v13, %v8526_v41  ;;  %v9154_v27 = vld [vmem:[#allocation10_spill] sm:$0xff] }
 0x143   : > { %6442 = vmatmul.mubr.msk.bf16.gmra.mxu1 %vm469_vm2, %v9152_v43  ;;  %v4684_v29 = vsel %vm6848_vm4, %v4679_v55, %v4683_v22  ;;  %v4974_v39 = vsel %vm6962_vm7, %v4972_v32, %v4973_v52  ;;  %v6214_v43 = vpop.f32.mrf.mxu0  ;;  %v1200_v31 = vadd.f32 %v9154_v27, %v8402_v47  ;;  %v4686_v40 = vshrl.u32 %v5893_v37, 16  ;;  %v5896_v41 = vld [vmem:[%s6797_s9 + $0xcc] sm:$0xf] }
 0x144   : > { %6424 = vmatmul.mubr.msk.bf16.gmra.mxu0 %vm469_vm2, %v8530_v61  ;;  %6445 = vmatprep.mubr.msk.bf16.mxu1 %vm469_vm2, %v9153_v53  ;;  %v5904_v62 = vcombine.low %v4674_v33, %v4684_v29  ;;  %v5937_v61 = vcombine.low %v4971_v8, %v4974_v39  ;;  %v8639_v23 = vadd.f32 %v6214_v43, %v1202_v48  ;;  %v4979_v22 = vrot.slane %v4977_v16, 4 }
 0x145   : > { %6427 = vmatprep.mubr.msk.bf16.mxu0 %vm469_vm2, %v5903_v28  ;;  %v8643_v13 = vsel %vm6962_vm7, %v5930_v1, %v4977_v16  ;;  %v1545_v57 = vpop.f32.mrf.mxu0  ;;  %v4688_v38 = vrot.slane %v4686_v40, 4  ;;  %v4689_v52 = vshll.u32 %v5893_v37, 16  ;;  %v4695_v18 = vshll.u32 %v8570_v3, 16  ;;  %v9156_v40 = vld [vmem:[#allocation11_spill] sm:$0xff] }
 0x146   : > { %v8649_v47 = vadd.f32 %v1545_v57, %v1200_v31  ;;  %v4699_v28 = vshrl.u32 %v8570_v3, 16  ;;  %v4705_v48 = vshll.u32 %v8586_v6, 16  ;;  %v1205_v55 = vadd.f32 %v8298_v30, %v8417_v50  ;;  %v1815_v31 = vpop.f32.mrf.mxu1 }
 0x147   : > { %v4981_v1 = vsel %vm6962_vm7, %v4979_v22, %v4980_v5  ;;  %v4691_v7 = vrot.slane %v4689_v52, 5  ;;  %v4697_v8 = vrot.slane %v4695_v18, 5  ;;  %v6217_v32 = vpop.f32.mrf.mxu0  ;;  %v4710_v37 = vshrl.u32 %v5896_v41, 16 }
 0x148   : > { %v5938_v33 = vcombine.low %v8643_v13, %v4981_v1  ;;  %v4701_v16 = vrot.slane %v4699_v28, 4  ;;  %v4707_v53 = vrot.slane %v4705_v48, 5  ;;  %v1587_v29 = vadd.f32 %v6217_v32, %v1205_v55 }
 0x149   : > { %v4692_v39 = vor.u32 %v4691_v7, %v4688_v38  ;;  %v4712_v43 = vrot.slane %v4710_v37, 4  ;;  %v4713_v3 = vshll.u32 %v5896_v41, 16  ;;  %v4719_v6 = vshll.u32 %v8602_v59, 16  ;;  %v1558_v27 = vpop.f32.mrf.mxu0  ;;  %v9157_v38 = vld [vmem:[#allocation12_spill] sm:$0xff] }
 0x14a   : > { %v9155_v0 = vcombine.low %v8536_v58, %v8547_v19  ;;  %v4702_v30 = vor.u32 %v4701_v16, %v4697_v8  ;;  %v4723_v50 = vshrl.u32 %v8602_v59, 16  ;;  %v4729_v5 = vshll.u32 %v8605_v2, 16 }
 0x14b   : > { %v1203_v13 = vadd.f32 %v9156_v40, %v8434_v26  ;;  %v4693_v41 = vrot.slane %v4692_v39, 4  ;;  %v4715_v22 = vrot.slane %v4713_v3, 5  ;;  %v4721_v57 = vrot.slane %v4719_v6, 5  ;;  %v6218_v19 = vpop.f32.mrf.mxu0 }
 0x14c   : > { %6446 = vmatmul.mubr.msk.bf16.gmra.mxu1 %vm469_vm2, %v9155_v0  ;;  %6428 = vmatmul.mubr.msk.bf16.gmra.mxu0 %vm469_vm2, %v5904_v62  ;;  %v1206_v58 = vadd.f32 %v9157_v38, %v8451_v36  ;;  %v4703_v52 = vrot.slane %v4702_v30, 4  ;;  %v4725_v18 = vrot.slane %v4723_v50, 4  ;;  %v4731_v28 = vrot.slane %v4729_v5, 5  ;;  %v6259_v55 = vpop.f32.mrf.mxu1 }
 0x14d   : > { %6449 = vmatprep.mubr.msk.bf16.mxu1 %vm469_vm2, %v5937_v61  ;;  %v1585_v59 = vadd.f32 %v1558_v27, %v1203_v13  ;;  %v4698_v2 = vsel %vm6848_vm4, %v4693_v41, %v4697_v8  ;;  %v4716_v48 = vor.u32 %v4715_v22, %v4712_v43  ;;  %v1204_v62 = vadd.f32 %v8345_v15, %v8463_v25  ;;  %v1561_v61 = vpop.f32.mrf.mxu0 }
 0x14e   : > { %v1588_v26 = vadd.f32 %v6218_v19, %v1206_v58  ;;  %v4708_v1 = vsel %vm6848_vm4, %v4703_v52, %v4707_v53  ;;  %v4726_v7 = vor.u32 %v4725_v18, %v4721_v57  ;;  %v1829_v36 = vadd.f32 %v8368_v24, %v8478_v54  ;;  %v2345_v39 = vpop.f32.mrf.mxu1 }
 0x14f   : > { %v1827_v32 = vadd.f32 %v8387_v35, %v8496_v11  ;;  %v5905_v37 = vcombine.low %v4698_v2, %v4708_v1  ;;  %v4717_v16 = vrot.slane %v4716_v48, 4  ;;  %v1586_v8 = vadd.f32 %v1561_v61, %v1204_v62  ;;  %v6241_v43 = vpop.f32.mrf.mxu0 }
 0x150   : > { %v1830_v3 = vadd.f32 %v8413_v12, %v8520_v10  ;;  %v4727_v15 = vrot.slane %v4726_v7, 4  ;;  %v2028_v25 = vadd.f32 %v6241_v43, %v1829_v36  ;;  %v1828_v53 = vadd.f32 %v8426_v17, %v8541_v14  ;;  %v6260_v35 = vpop.f32.mrf.mxu1 }
 0x151   : > { %v1833_v6 = vadd.f32 %v8443_v56, %v8556_v34  ;;  %6431 = vmatprep.mubr.msk.bf16.mxu0 %vm469_vm2, %v5905_v37  ;;  %v4722_v24 = vsel %vm6848_vm4, %v4717_v16, %v4721_v57  ;;  %v1963_v54 = vpop.f32.mrf.mxu0  ;;  %v1831_v11 = vadd.f32 %v8456_v49, %v8566_v9  ;;  %v1834_v12 = vadd.f32 %v8470_v44, %v8583_v20  ;;  %v9158_v34 = vld [vmem:[#allocation5_spill] sm:$0xff]  ;;  %v9159_v44 = vld [vmem:[#allocation6_spill] sm:$0xff] }
 0x152   : > { %v1832_v10 = vadd.f32 %v8489_v51, %v8592_v21  ;;  %v4732_v17 = vsel %vm6848_vm4, %v4727_v15, %v4731_v28  ;;  %v2026_v56 = vadd.f32 %v1963_v54, %v1827_v32  ;;  %v1837_v14 = vadd.f32 %v8512_v45, %v8607_v46  ;;  %v2348_v49 = vpop.f32.mrf.mxu1  ;;  %v9160_v51 = vld [vmem:[#allocation7_spill] sm:$0xff] }
 0x153   : > { %v1835_v27 = vadd.f32 %v9158_v34, %v8622_v63  ;;  %v5906_v0 = vcombine.low %v4722_v24, %v4732_v17  ;;  %v6242_v9 = vpop.f32.mrf.mxu0  ;;  %v1838_v20 = vadd.f32 %v9159_v44, %v8639_v23  ;;  %v1836_v21 = vadd.f32 %v9160_v51, %v8649_v47 }
 0x154   : > { %6450 = vmatmul.mubr.msk.bf16.gmra.mxu1 %vm469_vm2, %v5938_v33  ;;  %v9161_v33 = vld [vmem:[#allocation8_spill] sm:$0xff]  ;;  %v2029_v42 = vadd.f32 %v6242_v9, %v1830_v3  ;;  %v1839_v50 = vadd.f32 %v8614_v60, %v1585_v59  ;;  %v1842_v5 = vadd.f32 %v8647_v4, %v1588_v26  ;;  %v1840_v45 = vadd.f32 %v1815_v31, %v1586_v8  ;;  %v6263_v46 = vpop.f32.mrf.mxu1 }
 0x155   : > { %v1841_v30 = vadd.f32 %v9161_v33, %v1587_v29  ;;  %6432 = vmatmul.mubr.msk.bf16.gmra.mxu0 %vm469_vm2, %v5906_v0  ;;  %v1966_v63 = vpop.f32.mrf.mxu0  ;;  %v2410_v40 = vadd.f32 %v6259_v55, %v2028_v25  ;;  %v2408_v13 = vadd.f32 %v2345_v39, %v2026_v56 }
 0x156   : > { %v2027_v41 = vadd.f32 %v1966_v63, %v1828_v53  ;;  %v2411_v22 = vadd.f32 %v6260_v35, %v2029_v42  ;;  %v2361_v23 = vpop.f32.mrf.mxu1 }
 0x157   : > { %v6245_v57 = vpop.f32.mrf.mxu0 }
 0x158   : > { %v2032_v38 = vadd.f32 %v6245_v57, %v1833_v6  ;;  %v2409_v47 = vadd.f32 %v2348_v49, %v2027_v41  ;;  %v6264_v58 = vpop.f32.mrf.mxu1 }
 0x159   : > { %v1979_v29 = vpop.f32.mrf.mxu0 }
 0x15a   : > { %v2030_v19 = vadd.f32 %v1979_v29, %v1831_v11  ;;  %v8711_v52 = vadd.f32 %v6263_v46, %v2032_v38  ;;  %v2364_v60 = vpop.f32.mrf.mxu1 }
 0x15b   : > { %v6246_v4 = vpop.f32.mrf.mxu0 }
 0x15c   : > { %v2033_v31 = vadd.f32 %v6246_v4, %v1834_v12  ;;  %v8713_v18 = vadd.f32 %v2361_v23, %v2030_v19  ;;  %v6267_v28 = vpop.f32.mrf.mxu1 }
 0x15d   : > { %v1982_v59 = vpop.f32.mrf.mxu0 }
 0x15e   : > { %v2031_v2 = vadd.f32 %v1982_v59, %v1832_v10  ;;  %v8715_v48 = vadd.f32 %v6264_v58, %v2033_v31  ;;  %v2377_v26 = vpop.f32.mrf.mxu1 }
 0x15f   : > { %v6249_v55 = vpop.f32.mrf.mxu0 }
 0x160   : > { %v2036_v62 = vadd.f32 %v6249_v55, %v1837_v14  ;;  %v8717_v61 = vadd.f32 %v2364_v60, %v2031_v2  ;;  %v6268_v1 = vpop.f32.mrf.mxu1 }
 0x161   : > { %v1995_v7 = vpop.f32.mrf.mxu0 }
 0x162   : > { %v2034_v36 = vadd.f32 %v1995_v7, %v1835_v27  ;;  %v8719_v32 = vadd.f32 %v6267_v28, %v2036_v62  ;;  %v2380_v37 = vpop.f32.mrf.mxu1 }
 0x163   : > { %v6250_v16 = vpop.f32.mrf.mxu0 }
 0x164   : > { %v2037_v8 = vadd.f32 %v6250_v16, %v1838_v20  ;;  %v8721_v39 = vadd.f32 %v2377_v26, %v2034_v36 }
 0x165   : > { %v1998_v43 = vpop.f32.mrf.mxu0 }
 0x166   : > { %v2035_v3 = vadd.f32 %v1998_v43, %v1836_v21  ;;  %v8723_v15 = vadd.f32 %v6268_v1, %v2037_v8  ;;  %v6271_v25 = vpop.f32.mrf.mxu1 }
 0x167   : > { %v6253_v53 = vpop.f32.mrf.mxu0 }
 0x168   : > { %v2040_v6 = vadd.f32 %v6253_v53, %v1841_v30  ;;  %v8725_v24 = vadd.f32 %v2380_v37, %v2035_v3  ;;  %v2393_v35 = vpop.f32.mrf.mxu1 }
 0x169   : > { %v2011_v54 = vpop.f32.mrf.mxu0 }
 0x16a   : > { %v2038_v11 = vadd.f32 %v2011_v54, %v1839_v50  ;;  %v8727_v12 = vadd.f32 %v6271_v25, %v2040_v6  ;;  %v6272_v10 = vpop.f32.mrf.mxu1 }
 0x16b   : > { %v6254_v17 = vpop.f32.mrf.mxu0 }
 0x16c   : > { %v2041_v56 = vadd.f32 %v6254_v17, %v1842_v5  ;;  %v8729_v14 = vadd.f32 %v2393_v35, %v2038_v11  ;;  %v2396_v34 = vpop.f32.mrf.mxu1 }
 0x16d   : > { %v2014_v27 = vpop.f32.mrf.mxu0 }
 0x16e   : > { %v2039_v0 = vadd.f32 %v2014_v27, %v1840_v45  ;;  %v8731_v49 = vadd.f32 %v6272_v10, %v2041_v56  ;;  %v8733_v9 = vpop.f32.mrf.mxu1  ;;  %v8744_v45 = vld [vmem:[%s9112_s2] ss:$0 sm:$0xff] }
 0x16f   : > { %v6277_v44 = vpop.f32.mrf.mxu0 }
 0x170   : > { %v8735_v20 = vadd.f32 %v2396_v34, %v2039_v0  ;;  %v8737_v51 = vpop.f32.mrf.mxu1  ;;  %v2664_v21 = vadd.f32 %v6277_v44, %v2410_v40 }
 0x171   : > { %v2599_v33 = vpop.f32.mrf.mxu0 }
 0x172   : > { %v8739_v30 = vpop.f32.mrf.mxu1  ;;  %v2662_v42 = vadd.f32 %v2599_v33, %v2408_v13  ;;  %v2687_v57 = vadd.f32 %v8744_v45, %v2664_v21 }
 0x173   : > { %v6278_v50 = vpop.f32.mrf.mxu0 }
 0x174   : > { %v2665_v5 = vadd.f32 %v6278_v50, %v2411_v22  ;;  %v8746_v46 = vpop.f32.mrf.mxu1  ;;  %v2685_v41 = vadd.f32 %v8744_v45, %v2662_v42  ;;  %v2703_v60 = vmax.f32 %v2687_v57, 0.0 }
 0x175   : > { %v2602_v63 = vpop.f32.mrf.mxu0 }
 0x176   : > { %v2663_v23 = vadd.f32 %v2602_v63, %v2409_v47  ;;  %v2701_v13 = vmax.f32 %v2685_v41, 0.0  ;;  %v2688_v22 = vadd.f32 %v8744_v45, %v2665_v5 }
 0x178   : > { %v2686_v40 = vadd.f32 %v8744_v45, %v2663_v23  ;;  %v2704_v59 = vmax.f32 %v2688_v22, 0.0 }
 0x179   : > { %v8751_v38 = vpop.f32.mrf.mxu1 }
 0x17a   : > { %v2702_v58 = vmax.f32 %v2686_v40, 0.0 }
 0x17b   : > { %v8754_v29 = vpop.f32.mrf.mxu1  ;;  %v6281_v19 = vpop.f32.mrf.mxu0 }
 0x17c   : > { %v2717_v4 = vadd.f32 %v2702_v58, %v2701_v13  ;;  %v2668_v31 = vadd.f32 %v6281_v19, %v8711_v52 }
 0x17d   : > { %v2615_v28 = vpop.f32.mrf.mxu0  ;;  %v8757_v2 = vpop.f32.mrf.mxu1 }
 0x17e   : > { %v2718_v47 = vadd.f32 %v2717_v4, %v2703_v60  ;;  %v2666_v26 = vadd.f32 %v2615_v28, %v8713_v18  ;;  %v2691_v52 = vadd.f32 %v8744_v45, %v2668_v31 }
 0x17f   : > { %v6282_v55 = vpop.f32.mrf.mxu0  ;;  %v8762_v16 = vpop.f32.mrf.mxu1 }
 0x180   : > { %v2689_v62 = vadd.f32 %v8744_v45, %v2666_v26  ;;  %v2719_v1 = vadd.f32 %v2718_v47, %v2704_v59  ;;  %v2669_v7 = vadd.f32 %v6282_v55, %v8715_v48  ;;  %v2707_v35 = vmax.f32 %v2691_v52, 0.0 }
 0x181   : > { %v2618_v36 = vpop.f32.mrf.mxu0 }
 0x182   : > { %v2705_v37 = vmax.f32 %v2689_v62, 0.0  ;;  %v2667_v8 = vadd.f32 %v2618_v36, %v8717_v61  ;;  %v2692_v25 = vadd.f32 %v8744_v45, %v2669_v7 }
 0x184   : > { %v2720_v43 = vadd.f32 %v2719_v1, %v2705_v37  ;;  %v2690_v3 = vadd.f32 %v8744_v45, %v2667_v8  ;;  %v2708_v17 = vmax.f32 %v2692_v25, 0.0 }
 0x186   : > { %v8768_v18 = vpop.f32.mrf.mxu1  ;;  %v2706_v53 = vmax.f32 %v2690_v3, 0.0 }
 0x187   : > { %v6285_v6 = vpop.f32.mrf.mxu0 }
 0x188   : > { %v2721_v54 = vadd.f32 %v2720_v43, %v2706_v53  ;;  %v8770_v48 = vpop.f32.mrf.mxu1  ;;  %v2672_v11 = vadd.f32 %v6285_v6, %v8719_v32 }
 0x189   : > { %v2631_v10 = vpop.f32.mrf.mxu0 }
 0x18a   : > { %v2722_v61 = vadd.f32 %v2721_v54, %v2707_v35  ;;  %v8773_v56 = vpop.f32.mrf.mxu1  ;;  %v2670_v34 = vadd.f32 %v2631_v10, %v8721_v39  ;;  %v2695_v32 = vadd.f32 %v8744_v45, %v2672_v11 }
 0x18b   : > { %v6286_v27 = vpop.f32.mrf.mxu0 }
 0x18c   : > { %v2693_v0 = vadd.f32 %v8744_v45, %v2670_v34  ;;  %v2723_v44 = vadd.f32 %v2722_v61, %v2708_v17  ;;  %v2673_v21 = vadd.f32 %v6286_v27, %v8723_v15  ;;  %v8778_v33 = vpop.f32.mrf.mxu1  ;;  %v2711_v22 = vmax.f32 %v2695_v32, 0.0 }
 0x18d   : > { %v2634_v42 = vpop.f32.mrf.mxu0 }
 0x18e   : > { %v2709_v50 = vmax.f32 %v2693_v0, 0.0  ;;  %v2671_v5 = vadd.f32 %v2634_v42, %v8725_v24  ;;  %v2696_v39 = vadd.f32 %v8744_v45, %v2673_v21 }
 0x190   : > { %v2724_v63 = vadd.f32 %v2723_v44, %v2709_v50  ;;  %v2694_v41 = vadd.f32 %v8744_v45, %v2671_v5  ;;  %v2712_v4 = vmax.f32 %v2696_v39, 0.0 }
 0x191   : > { %v8783_v23 = vpop.f32.mrf.mxu1 }
 0x192   : > { %v2710_v57 = vmax.f32 %v2694_v41, 0.0  ;;  %v6289_v40 = vpop.f32.mrf.mxu0 }
 0x193   : > { %v8786_v13 = vpop.f32.mrf.mxu1  ;;  %v2676_v15 = vadd.f32 %v6289_v40, %v8727_v12 }
 0x194   : > { %v2725_v58 = vadd.f32 %v2724_v63, %v2710_v57  ;;  %v2647_v19 = vpop.f32.mrf.mxu0 }
 0x195   : > { %v8789_v60 = vpop.f32.mrf.mxu1  ;;  %v2674_v24 = vadd.f32 %v2647_v19, %v8729_v14  ;;  %v2699_v37 = vadd.f32 %v8744_v45, %v2676_v15 }
 0x196   : > { %v2726_v31 = vadd.f32 %v2725_v58, %v2711_v22  ;;  %v6290_v28 = vpop.f32.mrf.mxu0 }
 0x197   : > { %v2697_v59 = vadd.f32 %v8744_v45, %v2674_v24  ;;  %v8793_v47 = vpop.f32.mrf.mxu1  ;;  %v2677_v26 = vadd.f32 %v6290_v28, %v8731_v49 }
 0x198   : > { %v2727_v55 = vadd.f32 %v2726_v31, %v2712_v4  ;;  %v2650_v62 = vpop.f32.mrf.mxu0  ;;  %v6581_v4 = vld [vmem:[%s9113_s3 + $0x38] sm:$0xff]  }
 0x199   : > { %v2713_v1 = vmax.f32 %v2697_v59, 0.0  ;;  %v6331_v12 = vpop.f32.mrf.mxu1  ;;  %v2675_v7 = vadd.f32 %v2650_v62, %v8735_v20  ;;  %v2700_v25 = vadd.f32 %v8744_v45, %v2677_v26  ;;  %v2715_v20 = vmax.f32 %v2699_v37, 0.0 }
 0x19a   : > { %v6313_v36 = vpop.f32.mrf.mxu0  ;;  %v6659_v59 = vmov 0.0  }
 0x19b   : > { %v2728_v8 = vadd.f32 %v2727_v55, %v2713_v1  ;;  %v2698_v14 = vadd.f32 %v8744_v45, %v2675_v7  ;;  %v3424_v52 = vpop.f32.mrf.mxu1  ;;  %v3208_v43 = vadd.f32 %v6313_v36, %v8733_v9  ;;  %v2716_v27 = vmax.f32 %v2700_v25, 0.0  ;;  %6453 = vmatprep.subr.bf16.mxu0 %v6659_v59  ;;  %v6582_v1 = vld [vmem:[%s9113_s3 + $0x30] sm:$0xff]   ;;  %6469 = vmatprep.mubr.msk.bf16.mxu0 %vm6660_vm8, %v6659_v59 }
 0x19c   : > { %v3199_v3 = vpop.f32.mrf.mxu0  ;;  %6454 = vmatpush3.bf16.msra.mxu0 %v6581_v4 }
 0x19d   : > { %v2714_v53 = vmax.f32 %v2698_v14, 0.0  ;;  %v6332_v49 = vpop.f32.mrf.mxu1  ;;  %v3200_v6 = vadd.f32 %v3199_v3, %v8737_v51  ;;  %v8802_v35 = vadd.f32 %v6331_v12, %v3208_v43  ;;  %6455 = vmatprep.subr.bf16.mxu0 %v6659_v59 }
 0x19e   : > { %v6314_v54 = vpop.f32.mrf.mxu0 }
 0x19f   : > { %v2729_v11 = vadd.f32 %v2728_v8, %v2714_v53  ;;  %v3427_v10 = vpop.f32.mrf.mxu1  ;;  %v3211_v17 = vadd.f32 %v6314_v54, %v8739_v30  ;;  %v8805_v61 = vadd.f32 %v3424_v52, %v3200_v6  ;;  %v6583_v52 = vld [vmem:[%s9113_s3 + $0x28] sm:$0xff]  }
 0x1a0   : > { %v3202_v34 = vpop.f32.mrf.mxu0  ;;  %6456 = vmatpush3.bf16.msra.mxu0 %v6582_v1 }
 0x1a1   : > { %v2730_v9 = vadd.f32 %v2729_v11, %v2715_v20  ;;  %v6335_v0 = vpop.f32.mrf.mxu1  ;;  %v3203_v44 = vadd.f32 %v3202_v34, %v8746_v46  ;;  %v8808_v21 = vadd.f32 %v6332_v49, %v3211_v17  ;;  %6457 = vmatprep.subr.bf16.mxu0 %v6659_v59  ;;  %v6585_v17 = vld [vmem:[%s9113_s3 + $0x18] sm:$0xff]  }
 0x1a2   : > { %v6317_v42 = vpop.f32.mrf.mxu0 }
 0x1a3   : > { %v8810_v51 = vadd.f32 %v2730_v9, %v2716_v27  ;;  %v3440_v50 = vpop.f32.mrf.mxu1  ;;  %v3224_v5 = vadd.f32 %v6317_v42, %v8751_v38  ;;  %v8813_v32 = vadd.f32 %v3427_v10, %v3203_v44 }
 0x1a4   : > { %v3215_v63 = vpop.f32.mrf.mxu0  ;;  %6458 = vmatpush3.bf16.msra.mxu0 %v6583_v52 }
 0x1a5   : > { %9162 = vst [vmem:[#allocation9_spill] sm:$0xff] %v8810_v51  ;;  %v6336_v30 = vpop.f32.mrf.mxu1  ;;  %v3216_v41 = vadd.f32 %v3215_v63, %v8754_v29  ;;  %v8816_v39 = vadd.f32 %v6335_v0, %v3224_v5  ;;  %6459 = vmatprep.subr.bf16.mxu0 %v6659_v59 }
 0x1a6   : > { %v6318_v57 = vpop.f32.mrf.mxu0 }
 0x1a7   : > { %v3443_v40 = vpop.f32.mrf.mxu1  ;;  %v3227_v46 = vadd.f32 %v6318_v57, %v8757_v2  ;;  %v8819_v15 = vadd.f32 %v3440_v50, %v3216_v41  ;;  %v6586_v50 = vld [vmem:[%s9113_s3 + $0x10] sm:$0xff]   ;;  %v6587_v41 = vld [vmem:[%s9113_s3 + $0x8] sm:$0xff]  }
 0x1a8   : > { %v3218_v22 = vpop.f32.mrf.mxu0 }
 0x1a9   : > { %v6339_v58 = vpop.f32.mrf.mxu1  ;;  %v3219_v19 = vadd.f32 %v3218_v22, %v8762_v16  ;;  %v8822_v24 = vadd.f32 %v6336_v30, %v3227_v46 }
 0x1aa   : > { %v6321_v38 = vpop.f32.mrf.mxu0 }
 0x1ab   : > { %v3456_v29 = vpop.f32.mrf.mxu1  ;;  %v3240_v31 = vadd.f32 %v6321_v38, %v8768_v18  ;;  %v8828_v28 = vadd.f32 %v3443_v40, %v3219_v19  ;;  %v6588_v19 = vld [vmem:[%s9113_s3] sm:$0xff]  }
 0x1ac   : > { %v3231_v2 = vpop.f32.mrf.mxu0 }
 0x1ad   : > { %v6340_v26 = vpop.f32.mrf.mxu1  ;;  %v3232_v16 = vadd.f32 %v3231_v2, %v8770_v48  ;;  %v8832_v55 = vadd.f32 %v6339_v58, %v3240_v31 }
 0x1ae   : > { %v6322_v62 = vpop.f32.mrf.mxu0 }
 0x1af   : > { %v3459_v18 = vpop.f32.mrf.mxu1  ;;  %v3243_v12 = vadd.f32 %v6322_v62, %v8773_v56  ;;  %v8839_v7 = vadd.f32 %v3456_v29, %v3232_v16 }
 0x1b0   : > { %v3234_v36 = vpop.f32.mrf.mxu0 }
 0x1b1   : > { %v6343_v37 = vpop.f32.mrf.mxu1  ;;  %v3235_v8 = vadd.f32 %v3234_v36, %v8778_v33  ;;  %v8842_v48 = vadd.f32 %v6340_v26, %v3243_v12  ;;  %v6584_v33 = vld [vmem:[%s9113_s3 + $0x20] sm:$0xff]  }
 0x1b2   : > { %v6325_v14 = vpop.f32.mrf.mxu0  ;;  %6460 = vmatpush3.bf16.msra.mxu0 %v6584_v33 }
 0x1b3   : > { %v3472_v43 = vpop.f32.mrf.mxu1  ;;  %v3256_v3 = vadd.f32 %v6325_v14, %v8783_v23  ;;  %v8849_v56 = vadd.f32 %v3459_v18, %v3235_v8  ;;  %6461 = vmatprep.subr.bf16.mxu0 %v6659_v59 }
 0x1b4   : > { %v3247_v25 = vpop.f32.mrf.mxu0 }
 0x1b5   : > { %v6344_v53 = vpop.f32.mrf.mxu1  ;;  %v3248_v49 = vadd.f32 %v3247_v25, %v8786_v13  ;;  %v3501_v6 = vadd.f32 %v6343_v37, %v3256_v3 }
 0x1b6   : > { %v6326_v54 = vpop.f32.mrf.mxu0  ;;  %6462 = vmatpush3.bf16.msra.mxu0 %v6585_v17 }
 0x1b7   : > { %v3475_v20 = vpop.f32.mrf.mxu1  ;;  %v3259_v23 = vadd.f32 %v6326_v54, %v8789_v60  ;;  %v8858_v11 = vadd.f32 %v3472_v43, %v3248_v49  ;;  %6463 = vmatprep.subr.bf16.mxu0 %v6659_v59 }
 0x1b8   : > { %v3250_v10 = vpop.f32.mrf.mxu0 }
 0x1b9   : > { %v6367_v34 = vpop.f32.mrf.mxu1  ;;  %v3251_v27 = vadd.f32 %v3250_v10, %v8793_v47  ;;  %v8864_v9 = vadd.f32 %v6344_v53, %v3259_v23 }
 0x1ba   : > { %v6349_v13 = vpop.f32.mrf.mxu0  ;;  %6464 = vmatpush3.bf16.msra.mxu0 %v6586_v50 }
 0x1bb   : > { %9163 = vst [vmem:[#allocation10_spill] sm:$0xff] %v8864_v9  ;;  %v8867_v0 = vpop.f32.mrf.mxu1  ;;  %v3683_v60 = vadd.f32 %v6349_v13, %v8802_v35  ;;  %v8870_v44 = vadd.f32 %v3475_v20, %v3251_v27  ;;  %6465 = vmatprep.subr.bf16.mxu0 %v6659_v59 }
 0x1bc   : > { %v8872_v42 = vpop.f32.mrf.mxu0 }
 0x1bd   : > { %9164 = vst [vmem:[#allocation11_spill] sm:$0xff] %v8870_v44  ;;  %v8877_v5 = vpop.f32.mrf.mxu1  ;;  %v8879_v47 = vadd.f32 %v6367_v34, %v3683_v60 }
 0x1be   : > { %v8882_v63 = vpop.f32.mrf.mxu0  ;;  %6466 = vmatpush3.bf16.msra.mxu0 %v6587_v41 }
 0x1bf   : > { %v8884_v30 = vpop.f32.mrf.mxu1  ;;  %6467 = vmatprep.subr.bf16.mxu0 %v6659_v59  ;;  %v3684_v44 = vadd.f32 %v8882_v63, %v8808_v21 }
 0x1c0   : > { %v8886_v35 = vpop.f32.mrf.mxu0 }
 0x1c1   : > { %v6371_v57 = vpop.f32.mrf.mxu1 }
 0x1c2   : > { %v6353_v40 = vpop.f32.mrf.mxu0  ;;  %6468 = vmatpush3.bf16.msra.mxu0 %v6588_v19 }
 0x1c3   : > { %v8892_v46 = vpop.f32.mrf.mxu1  ;;  %v3687_v22 = vadd.f32 %v6353_v40, %v8816_v39 }
 0x1c4   : > { %v8895_v58 = vpop.f32.mrf.mxu0 }
 0x1c5   : > { %v8900_v38 = vpop.f32.mrf.mxu1  ;;  %v8902_v4 = vadd.f32 %v6371_v57, %v3687_v22  ;;  %v3685_v63 = vadd.f32 %v8895_v58, %v8819_v15 }
 0x1c6   : > { %v8905_v29 = vpop.f32.mrf.mxu0 }
 0x1c7   : > { %v8907_v31 = vpop.f32.mrf.mxu1 }
 0x1c8   : > { %v8909_v2 = vpop.f32.mrf.mxu0 }
 0x1c9   : > { %v6375_v39 = vpop.f32.mrf.mxu1  ;;  %v3686_v15 = vadd.f32 %v8909_v2, %v8828_v28 }
 0x1ca   : > { %v6357_v26 = vpop.f32.mrf.mxu0 }
 0x1cb   : > { %v8911_v16 = vpop.f32.mrf.mxu1  ;;  %v3691_v62 = vadd.f32 %v6357_v26, %v8832_v55 }
 0x1cc   : > { %v8914_v1 = vpop.f32.mrf.mxu0 }
 0x1cd   : > { %v8916_v18 = vpop.f32.mrf.mxu1  ;;  %v8918_v12 = vadd.f32 %v6375_v39, %v3691_v62 }
 0x1ce   : > { %v8920_v59 = vpop.f32.mrf.mxu0 }
 0x1cf   : > { %v8922_v36 = vpop.f32.mrf.mxu1  ;;  %v3692_v28 = vadd.f32 %v8920_v59, %v8842_v48 }
 0x1d0   : > { %v8924_v37 = vpop.f32.mrf.mxu0 }
 0x1d1   : > { %v6379_v8 = vpop.f32.mrf.mxu1 }
 0x1d2   : > { %v6361_v14 = vpop.f32.mrf.mxu0 }
 0x1d3   : > { %v8926_v52 = vpop.f32.mrf.mxu1  ;;  %v3695_v43 = vadd.f32 %v6361_v14, %v3501_v6 }
 0x1d4   : > { %9165 = vst [vmem:[#allocation12_spill] sm:$0xff] %v8926_v52  ;;  %v8928_v3 = vpop.f32.mrf.mxu0 }
 0x1d5   : > { %v8930_v55 = vpop.f32.mrf.mxu1  ;;  %v8932_v25 = vadd.f32 %v6379_v8, %v3695_v43 }
 0x1d6   : > { %9166 = vst [vmem:[#allocation5_spill] sm:$0xff] %v8930_v55  ;;  %v8934_v33 = vpop.f32.mrf.mxu0  ;;  %v3681_v55 = vadd.f32 %v8872_v42, %v8805_v61 }
 0x1d7   : > { %9167 = vst [vmem:[#allocation6_spill] sm:$0xff] %v8932_v25  ;;  %9168 = vst [vmem:[#allocation7_spill] sm:$0xff] %v8934_v33  ;;  %v8936_v53 = vpop.f32.mrf.mxu1 }
 0x1d8   : > { %9169 = vst [vmem:[#allocation8_spill] sm:$0xff] %v8936_v53  ;;  %v8938_v49 = vpop.f32.mrf.mxu0 }
 0x1d9   : > { %9170 = vst [vmem:[#allocation13_spill] sm:$0xff] %v8938_v49  ;;  %v6403_v54 = vpop.f32.mrf.mxu1 }
 0x1da   : > { %v6385_v20 = vpop.f32.mrf.mxu0 }
 0x1db   : > { %v4438_v23 = vpop.f32.mrf.mxu1  ;;  %v4309_v61 = vadd.f32 %v6385_v20, %v8879_v47 }
 0x1dc   : > { %v4244_v10 = vpop.f32.mrf.mxu0 }
 0x1dd   : > { %v6404_v17 = vpop.f32.mrf.mxu1 }
 0x1de   : > { %v6386_v34 = vpop.f32.mrf.mxu0 }
 0x1df   : > { %v4441_v27 = vpop.f32.mrf.mxu1 }
 0x1e0   : > { %v4247_v6 = vpop.f32.mrf.mxu0 }
 0x1e1   : > { %v8940_v13 = vpop.f32.mrf.mxu1 }
 0x1e3   : > { %v6389_v60 = vpop.f32.mrf.mxu0  ;;  %v8942_v50 = vpop.f32.mrf.mxu1 }
 0x1e5   : > { %v4260_v41 = vpop.f32.mrf.mxu0  ;;  %v8944_v57 = vpop.f32.mrf.mxu1 }
 0x1e7   : > { %v6390_v40 = vpop.f32.mrf.mxu0  ;;  %v8946_v22 = vpop.f32.mrf.mxu1 }
 0x1e9   : > { %v8948_v19 = vpop.f32.mrf.mxu0  ;;  %v8950_v39 = vpop.f32.mrf.mxu1 }
 0x1ea   : > { %9171 = vst [vmem:[#allocation14_spill] sm:$0xff] %v8950_v39 }
 0x1eb   : > { %v8952_v26 = vpop.f32.mrf.mxu0  ;;  %v8954_v62 = vpop.f32.mrf.mxu1 }
 0x1ed   : > { %v8956_v8 = vpop.f32.mrf.mxu0  ;;  %v8958_v14 = vpop.f32.mrf.mxu1 }
 0x1ee   : > { %9172 = vst [vmem:[#allocation15_spill] sm:$0xff] %v8958_v14  ;;  %v3682_v14 = vadd.f32 %v8886_v35, %v8813_v32 }
 0x1ef   : > { %v8960_v43 = vpop.f32.mrf.mxu0  ;;  %v8962_v51 = vpop.f32.mrf.mxu1 }
 0x1f0   : > { %9173 = vst [vmem:[#allocation16_spill] sm:$0xff] %v8962_v51  ;;  %v4058_v51 = vadd.f32 %v8867_v0, %v3681_v55  ;;  %v4059_v32 = vadd.f32 %v8884_v30, %v3682_v14 }
 0x1f1   : > { %v8964_v53 = vpop.f32.mrf.mxu0  ;;  %v8968_v25 = vpop.f32.mrf.mxu1 }
 0x1f2   : > { %9174 = vst [vmem:[#allocation17_spill] sm:$0xff] %v8968_v25  ;;  %v4307_v42 = vadd.f32 %v4244_v10, %v4058_v51  ;;  %v4061_v25 = vadd.f32 %v8877_v5, %v3684_v44  ;;  %v4308_v55 = vadd.f32 %v4247_v6, %v4059_v32  ;;  %v3688_v51 = vadd.f32 %v8905_v29, %v8822_v24 }
 0x1f3   : > { %v8974_v52 = vpop.f32.mrf.mxu1  ;;  %v4062_v5 = vadd.f32 %v8892_v46, %v3685_v63  ;;  %v4313_v24 = vadd.f32 %v6389_v60, %v8902_v4 }
 0x1f4   : > { %v8970_v49 = vpop.f32.mrf.mxu0  ;;  %9176 = vst [vmem:[#allocation19_spill] sm:$0xff] %v8974_v52  ;;  %v4310_v52 = vadd.f32 %v6386_v34, %v4061_v25  ;;  %v4065_v46 = vadd.f32 %v8900_v38, %v3688_v51  ;;  %v3690_v38 = vadd.f32 %v8924_v37, %v8849_v56 }
 0x1f5   : > { %9175 = vst [vmem:[#allocation18_spill] sm:$0xff] %v8970_v49  ;;  %v8981_v33 = vpop.f32.mrf.mxu1  ;;  %v4311_v58 = vadd.f32 %v4260_v41, %v4062_v5  ;;  %v4507_v48 = vadd.f32 %v8940_v13, %v4313_v24 }
 0x1f6   : > { %v8976_v39 = vpop.f32.mrf.mxu0  ;;  %9178 = vst [vmem:[#allocation21_spill] sm:$0xff] %v8981_v33  ;;  %v4314_v2 = vadd.f32 %v6390_v40, %v4065_v46 }
 0x1f7   : > { %9177 = vst [vmem:[#allocation20_spill] sm:$0xff] %v8976_v39  ;;  %v8987_v49 = vpop.f32.mrf.mxu1  ;;  %v4501_v39 = vadd.f32 %v4438_v23, %v4307_v42  ;;  %v3689_v23 = vadd.f32 %v8914_v1, %v8839_v7  ;;  %v4505_v4 = vadd.f32 %v8942_v50, %v4311_v58  ;;  %v4069_v50 = vadd.f32 %v8916_v18, %v3692_v28 }
 0x1f8   : > { %v8983_v9 = vpop.f32.mrf.mxu0  ;;  %9180 = vst [vmem:[#allocation23_spill] sm:$0xff] %v8987_v49  ;;  %v4504_v49 = vadd.f32 %v6404_v17, %v4310_v52  ;;  %v4508_v56 = vadd.f32 %v8944_v57, %v4314_v2  ;;  %v3693_v18 = vadd.f32 %v8928_v3, %v8858_v11 }
 0x1f9   : > { %9179 = vst [vmem:[#allocation22_spill] sm:$0xff] %v8983_v9  ;;  %v4503_v9 = vadd.f32 %v6403_v54, %v4309_v61  ;;  %v4502_v54 = vadd.f32 %v4441_v27, %v4308_v55  ;;  %v4066_v60 = vadd.f32 %v8911_v16, %v3689_v23  ;;  %v4067_v55 = vadd.f32 %v8922_v36, %v3690_v38  ;;  %v9183_v23 = vld [vmem:[#allocation14_spill] sm:$0xff] }
 0x1fa   : > { %v8989_v21 = vpop.f32.mrf.mxu0 }
 0x1fb   : > { %v6439_v0 = vpop.f32.mrf.mxu1  ;;  %v4315_v42 = vadd.f32 %v8956_v8, %v4066_v60  ;;  %v9188_v60 = vld [vmem:[#allocation16_spill] sm:$0xff] }
 0x1fc   : > { %v6421_v35 = vpop.f32.mrf.mxu0 }
 0x1fd   : > { %v5064_v33 = vpop.f32.mrf.mxu1  ;;  %v4880_v47 = vadd.f32 %v6421_v35, %v4503_v9  ;;  %v4317_v35 = vadd.f32 %v8952_v26, %v8918_v12  ;;  %v4316_v12 = vadd.f32 %v8964_v53, %v4067_v55 }
 0x1fe   : > { %v4815_v44 = vpop.f32.mrf.mxu0 }
 0x1ff   : > { %v6440_v20 = vpop.f32.mrf.mxu1  ;;  %v4878_v10 = vadd.f32 %v4815_v44, %v4501_v39  ;;  %v5129_v29 = vadd.f32 %v6439_v0, %v4880_v47  ;;  %v4511_v24 = vadd.f32 %v9183_v23, %v4317_v35 }
 0x200   : > { %v6422_v30 = vpop.f32.mrf.mxu0 }
 0x201   : > { %v5127_v25 = vadd.f32 %v5064_v33, %v4878_v10  ;;  %v5067_v34 = vpop.f32.mrf.mxu1  ;;  %v4881_v6 = vadd.f32 %v6422_v30, %v4504_v49  ;;  %v4063_v33 = vadd.f32 %v8907_v31, %v3686_v15  ;;  %v5145_v31 = vadd.f32 %v8744_v45, %v5129_v29 }
 0x202   : > { %v4818_v9 = vpop.f32.mrf.mxu0  ;;  %v4318_v10 = vadd.f32 %v8960_v43, %v4069_v50 }
 0x203   : > { %v6443_v39 = vpop.f32.mrf.mxu1  ;;  %v4879_v52 = vadd.f32 %v4818_v9, %v4502_v54  ;;  %v5143_v49 = vadd.f32 %v8744_v45, %v5127_v25  ;;  %v5130_v27 = vadd.f32 %v6440_v20, %v4881_v6  ;;  %v4312_v1 = vadd.f32 %v8948_v19, %v4063_v33  ;;  %v9182_v6 = vld [vmem:[#allocation7_spill] sm:$0xff]  ;;  %v9184_v9 = vld [vmem:[#allocation12_spill] sm:$0xff] }
 0x204   : > { %v6425_v17 = vpop.f32.mrf.mxu0  ;;  %v5161_v57 = vmax.f32 %v5145_v31, 0.0  ;;  %v4070_v43 = vadd.f32 %v9184_v9, %v3693_v18 }
 0x205   : > { %v5128_v41 = vadd.f32 %v5067_v34, %v4879_v52  ;;  %v5080_v7 = vpop.f32.mrf.mxu1  ;;  %v4884_v63 = vadd.f32 %v6425_v17, %v4507_v48  ;;  %v5159_v19 = vmax.f32 %v5143_v49, 0.0  ;;  %v5146_v16 = vadd.f32 %v8744_v45, %v5130_v27  ;;  %v9181_v34 = vld [vmem:[#allocation10_spill] sm:$0xff]  ;;  %v9186_v27 = vld [vmem:[#allocation11_spill] sm:$0xff] }
 0x206   : > { %v4831_v59 = vpop.f32.mrf.mxu0  ;;  %v4506_v8 = vadd.f32 %v8946_v22, %v4312_v1  ;;  %v4509_v22 = vadd.f32 %v8954_v62, %v4315_v42  ;;  %v3696_v11 = vadd.f32 %v9182_v6, %v9181_v34  ;;  %v9185_v62 = vld [vmem:[#allocation15_spill] sm:$0xff]  ;;  %v4510_v48 = vadd.f32 %v9188_v60, %v4316_v12  ;;  %v9190_v42 = vld [vmem:[#allocation18_spill] sm:$0xff] }
 0x207   : > { %v5144_v40 = vadd.f32 %v8744_v45, %v5128_v41  ;;  %v6444_v14 = vpop.f32.mrf.mxu1  ;;  %v4882_v61 = vadd.f32 %v4831_v59, %v4505_v4  ;;  %v5133_v15 = vadd.f32 %v6443_v39, %v4884_v63  ;;  %v5162_v36 = vmax.f32 %v5146_v16, 0.0  ;;  %v9187_v41 = vld [vmem:[#allocation13_spill] sm:$0xff]  ;;  %v9191_v63 = vld [vmem:[#allocation20_spill] sm:$0xff] }
 0x208   : > { %v6426_v37 = vpop.f32.mrf.mxu0  ;;  %v4512_v17 = vadd.f32 %v9185_v62, %v4318_v10 }
 0x209   : > { %v5160_v32 = vmax.f32 %v5144_v40, 0.0  ;;  %v5131_v13 = vadd.f32 %v5080_v7, %v4882_v61  ;;  %v5083_v0 = vpop.f32.mrf.mxu1  ;;  %v4885_v51 = vadd.f32 %v6426_v37, %v4508_v56  ;;  %v5149_v53 = vadd.f32 %v8744_v45, %v5133_v15  ;;  %v9189_v61 = vld [vmem:[#allocation6_spill] sm:$0xff]  ;;  %v9192_v37 = vld [vmem:[#allocation5_spill] sm:$0xff] }
 0x20a   : > { %v4834_v44 = vpop.f32.mrf.mxu0  ;;  %v3694_v7 = vadd.f32 %v9187_v41, %v9186_v27  ;;  %v4321_v50 = vadd.f32 %v9190_v42, %v9189_v61  ;;  %v4319_v56 = vadd.f32 %v9191_v63, %v4070_v43 }
 0x20b   : > { %v5175_v5 = vadd.f32 %v5160_v32, %v5159_v19  ;;  %v5147_v47 = vadd.f32 %v8744_v45, %v5131_v13  ;;  %v4883_v30 = vadd.f32 %v4834_v44, %v4506_v8  ;;  %v5134_v3 = vadd.f32 %v6444_v14, %v4885_v51  ;;  %v9193_v51 = vld [vmem:[#allocation22_spill] sm:$0xff]  ;;  %v9194_v44 = vld [vmem:[#allocation8_spill] sm:$0xff] }
 0x20c   : > { %v6447_v20 = vpop.f32.mrf.mxu1  ;;  %v6429_v58 = vpop.f32.mrf.mxu0  ;;  %v4073_v19 = vadd.f32 %v9192_v37, %v3696_v11  ;;  %v5165_v13 = vmax.f32 %v5149_v53, 0.0  ;;  %v4071_v18 = vadd.f32 %v9194_v44, %v3694_v7 }
 0x20d   : > { %v5176_v26 = vadd.f32 %v5175_v5, %v5161_v57  ;;  %v5132_v54 = vadd.f32 %v5083_v0, %v4883_v30  ;;  %v5163_v29 = vmax.f32 %v5147_v47, 0.0  ;;  %v4888_v33 = vadd.f32 %v6429_v58, %v4511_v24  ;;  %v9197_v24 = vld [vmem:[#allocation21_spill] sm:$0xff] }
 0x20e   : > { %v5096_v25 = vpop.f32.mrf.mxu1  ;;  %v4847_v46 = vpop.f32.mrf.mxu0  ;;  %v5150_v59 = vadd.f32 %v8744_v45, %v5134_v3  ;;  %v4322_v8 = vadd.f32 %v9193_v51, %v4073_v19  ;;  %v4320_v58 = vadd.f32 %v8989_v21, %v4071_v18 }
 0x20f   : > { %v5177_v39 = vadd.f32 %v5176_v26, %v5162_v36  ;;  %v4886_v28 = vadd.f32 %v4847_v46, %v4509_v22  ;;  %v5148_v2 = vadd.f32 %v8744_v45, %v5132_v54  ;;  %v5137_v35 = vadd.f32 %v6447_v20, %v4888_v33  ;;  %v9195_v36 = vld [vmem:[#allocation17_spill] sm:$0xff] }
 0x210   : > { %v6448_v52 = vpop.f32.mrf.mxu1  ;;  %v6430_v49 = vpop.f32.mrf.mxu0  ;;  %v5166_v5 = vmax.f32 %v5150_v59, 0.0  ;;  %v4515_v26 = vadd.f32 %v9195_v36, %v4321_v50  ;;  %v4516_v46 = vadd.f32 %v9197_v24, %v4322_v8  ;;  %v9199_v59 = vld [vmem:[#allocation9_spill] sm:$0xff] }
 0x211   : > { %v5178_v4 = vadd.f32 %v5177_v39, %v5163_v29  ;;  %v5135_v38 = vadd.f32 %v5096_v25, %v4886_v28  ;;  %v5164_v31 = vmax.f32 %v5148_v2, 0.0  ;;  %v4889_v40 = vadd.f32 %v6430_v49, %v4512_v17  ;;  %v9196_v25 = vld [vmem:[#allocation19_spill] sm:$0xff] }
 0x212   : > { %v5099_v1 = vpop.f32.mrf.mxu1  ;;  %v4850_v14 = vpop.f32.mrf.mxu0  ;;  %v4513_v20 = vadd.f32 %v9196_v25, %v4319_v56  ;;  %v5153_v22 = vadd.f32 %v8744_v45, %v5137_v35  ;;  %v9198_v28 = vld [vmem:[#allocation23_spill] sm:$0xff] }
 0x213   : > { %v4887_v32 = vadd.f32 %v4850_v14, %v4510_v48  ;;  %v5179_v0 = vadd.f32 %v5178_v4, %v5164_v31  ;;  %v5151_v55 = vadd.f32 %v8744_v45, %v5135_v38  ;;  %v5138_v10 = vadd.f32 %v6448_v52, %v4889_v40 }
 0x214   : > { %v6451_v16 = vpop.f32.mrf.mxu1  ;;  %v4514_v53 = vadd.f32 %v9198_v28, %v4320_v58  ;;  %v5169_v2 = vmax.f32 %v5153_v22, 0.0  ;;  %v2732_v31 = vrot.slane %v9199_v59, 4 }
 0x215   : > { %v5136_v57 = vadd.f32 %v5099_v1, %v4887_v32  ;;  %v5180_v47 = vadd.f32 %v5179_v0, %v5165_v13  ;;  %v6433_v30 = vpop.f32.mrf.mxu0  ;;  %v5167_v34 = vmax.f32 %v5151_v55, 0.0  ;;  %v5154_v43 = vadd.f32 %v8744_v45, %v5138_v10 }
 0x216   : > { %v5112_v15 = vpop.f32.mrf.mxu1  ;;  %v4892_v54 = vadd.f32 %v6433_v30, %v4515_v26  ;;  %v2733_v63 = vadd.f32 %v2732_v31, %v9199_v59 }
 0x217   : > { %v5152_v12 = vadd.f32 %v8744_v45, %v5136_v57  ;;  %v5181_v6 = vadd.f32 %v5180_v47, %v5166_v5  ;;  %v4863_v11 = vpop.f32.mrf.mxu0  ;;  %v5170_v41 = vmax.f32 %v5154_v43, 0.0 }
 0x218   : > { %v4890_v23 = vadd.f32 %v4863_v11, %v4513_v20  ;;  %v6452_v21 = vpop.f32.mrf.mxu1  ;;  %v5141_v17 = vadd.f32 %v6451_v16, %v4892_v54  ;;  %v2734_v32 = vrot.slane %v2733_v63, 2 }
 0x219   : > { %v5168_v3 = vmax.f32 %v5152_v12, 0.0  ;;  %v5182_v9 = vadd.f32 %v5181_v6, %v5167_v34  ;;  %v6434_v29 = vpop.f32.mrf.mxu0 }
 0x21a   : > { %v5139_v39 = vadd.f32 %v5112_v15, %v4890_v23  ;;  %v4893_v52 = vadd.f32 %v6434_v29, %v4516_v46  ;;  %v5115_v4 = vpop.f32.mrf.mxu1  ;;  %v5157_v40 = vadd.f32 %v8744_v45, %v5141_v17  ;;  %v2735_v35 = vadd.f32 %v2734_v32, %v2733_v63  ;;  %v5215_v15 = vld [vmem:[%s9114_s4] sm:$0x1] }
 0x21b   : > { %v5183_v33 = vadd.f32 %v5182_v9, %v5168_v3  ;;  %v4866_v62 = vpop.f32.mrf.mxu0 }
 0x21c   : > { %v5155_v49 = vadd.f32 %v8744_v45, %v5139_v39  ;;  %v4891_v27 = vadd.f32 %v4866_v62, %v4514_v53  ;;  %v5142_v38 = vadd.f32 %v6452_v21, %v4893_v52  ;;  %v5173_v56 = vmax.f32 %v5157_v40, 0.0 }
 0x21d   : > { %v5184_v7 = vadd.f32 %v5183_v33, %v5169_v2  ;;  %v2736_v8 = vrot.slane %v2735_v35, 1 }
 0x21e   : > { %v5140_v1 = vadd.f32 %v5115_v4, %v4891_v27  ;;  %v5171_v60 = vmax.f32 %v5155_v49, 0.0  ;;  %v5158_v42 = vadd.f32 %v8744_v45, %v5142_v38 }
 0x21f   : > { %v5185_v48 = vadd.f32 %v5184_v7, %v5170_v41  ;;  %v2737_v57 = vadd.f32 %v2736_v8, %v2735_v35 }
 0x220   : > { %v5156_v14 = vadd.f32 %v8744_v45, %v5140_v1  ;;  %v5174_v19 = vmax.f32 %v5158_v42, 0.0 }
 0x221   : > { %v5186_v61 = vadd.f32 %v5185_v48, %v5171_v60 }
 0x222   : > { %v5172_v50 = vmax.f32 %v5156_v14, 0.0 }
 0x224   : > { %v5187_v37 = vadd.f32 %v5186_v61, %v5172_v50 }
 0x226   : > { %v5188_v16 = vadd.f32 %v5187_v37, %v5173_v56 }
 0x228   : > { %v5189_v13 = vadd.f32 %v5188_v16, %v5174_v19 }
 0x22a   : > { %v5190_v0 = vrot.slane %v5189_v13, 4 }
 0x22c   : > { %v5191_v55 = vadd.f32 %v5190_v0, %v5189_v13 }
 0x22e   : > { %v5192_v51 = vrot.slane %v5191_v55, 2 }
 0x230   : > { %v5193_v44 = vadd.f32 %v5192_v51, %v5191_v55 }
 0x232   : > { %v5194_v18 = vrot.slane %v5193_v44, 1 }
 0x234   : > { %v5195_v45 = vadd.f32 %v5194_v18, %v5193_v44 }
 0x236   : > { %v5196_v5 = vadd.f32 %v5195_v45, %v2737_v57 }
 0x238   : > { %v5197_v47 = vmul.f32 0.00390625, %v5196_v5 }
 0x23a   : > { %v5198_v10 = vpack.c.bf16 %v5197_v47, %v5197_v47 }
 0x23c   : > { %6470 = vmatmul.mubr.bf16.vlgmr.msra.gmra.mxu0 %v5198_v10 }
 0x2fc   : > { %v5298_v30 = vpop.f32.mrf.mxu0 }
 0x2fd   : > { %v5299_v58 = vadd.f32 %v5298_v30, %v5215_v15 }
 0x2fe   : > { %v6471_v12 = vpop.f32.mrf.mxu0 }
 0x2ff   : > { %5304 = vst [vmem:[%s216_s23] sm:$0x1] %v5299_v58 }
 0x300   : > { %v5301_v36 = vpop.f32.mrf.mxu0 }
 0x301   : > { %6610 = shalt.err (!%p6607_p3)
}
 0x302   : > { %s6611_s12 = scalar_lea.hbm %s9069_s6, 16  ;;  %s6615_s14 = scalar_lea.hbm %s9115_s5, 32 }
 0x303   : > { %p6612_p4 = scmp.ne.s32.totalorder %s9069_s6, %s6611_s12  ;;  %p6616_p9 = scmp.lt.s32.totalorder %s9069_s6, %s9115_s5 }
 0x304   : > { %p6617_p10 = scmp.lt.s32.totalorder %s6615_s14, %s6611_s12 }
 0x305   : > { %p6613_p7 = pnand %p6612_p4, %p6730_p5 }
 0x306   : > { %p6618_p11 = por %p6617_p10, %p6616_p9 }
 0x307   : > { %p6614_p8 = pneg %p6613_p7 }
 0x309   : > { %p6619_p12 = pnand %p6618_p11, %p6614_p8 }
 0x30b   : > { %6622 = shalt.err (!%p6619_p12)
}
 0x30c   : > { %6492 = dma.vmem_to_hbm [thread:$0]  (%p6730_p5), %s9071_s25, 16, %s9069_s6, %s5306_s7   ;;  %v6472_v26 = vpop.f32.mrf.mxu0 }
 0x30d PF: > { %p6498_p13 = scmp.ge.s32.totalorder %s6657_s21, 2  ;;  %s5330_s17 = sand.u32 1, %s6645_s18  }
 0x30e   : > { %s5331_s23 = scalar_lea.sflag [#allocation3], %s5330_s17 }
 0x30f   : > { %p6495_p0 = pnand %p6498_p13, %p6734_p6 }
 0x311   : > { %p6496_p1 = pneg %p6495_p0 }
 0x313   : > { %6640 = dma.done.wait (%p6496_p1), %s5331_s23, 16  }
 0x314   : > { %6642 = vsyncadd (%p6496_p1), %s5331_s23, 4294967280  ;;  %p15_p2 = scmp.ge.s32.totalorder %s6717_s24, 4   ;;  %s9200_s18 = smov %s6649_s19 }
 0x315   : > { %s9201_s19 = smov %s6653_s20  ;;  %s9202_s20 = smov %s6728_s27 }
 0x316   : > { %s9203_s21 = smov %s6717_s24  ;;  %17 = sbr.rel (!%p15_p2) target bundleno = 3 (0x3), region = 88 }
 0x31b   :  { %5335 = vsyncpa [#allocation3], 1 }
 0x31c   :  { %5337 = vsyncpa [#allocation3 + $0x1], 1 }

</bundles_post_ra>
